<compile_context>
chip_gen: v5e
topology: v5e:2x2
jax: 0.10.0
libtpu: 0.0.40
codegen_flags: <defaults>
</compile_context>

<pallas_src>
import functools

import numpy as np
import jax
import jax.numpy as jnp
from jax.experimental import pallas as pl
from jax.experimental.pallas import tpu as pltpu

CFG = dict(
    vocab_size=32,
    embedding_dim=16,
    input_encoder_hidden_size=16,
    bidirectional_encoder=False,
    vrnn_hidden_size=32,
    user_number_z_vectors=1,
    user_z_logits_dim=16,
    user_z_total_size=16,
    system_number_z_vectors=2,
    system_z_logits_dim=8,
    system_z_total_size=16,
    user_decoder_hidden_size=16,
    system_decoder_hidden_size=16,
    db_cutoff=4,                          # db one-hot dim = 5
    bow_layer_size=16,
    with_bow_loss=True,
)

# ------------------------- static dims & slab layout -------------------------
V = CFG["vocab_size"]
E = CFG["embedding_dim"]
HE = CFG["input_encoder_hidden_size"]
HV = CFG["vrnn_hidden_size"]
HD = CFG["user_decoder_hidden_size"]
DB = CFG["db_cutoff"] + 1
NZ_U, ZD_U = CFG["user_number_z_vectors"], CFG["user_z_logits_dim"]
NZ_S, ZD_S = CFG["system_number_z_vectors"], CFG["system_z_logits_dim"]
ZW_U, ZW_S = NZ_U * ZD_U, NZ_S * ZD_S
BOW = CFG["bow_layer_size"]

assert CFG["system_decoder_hidden_size"] == HD
assert CFG["user_z_total_size"] == ZW_U and CFG["system_z_total_size"] == ZW_S
assert not CFG["bidirectional_encoder"]

WSLAB_W = 192                                   # widest fused weight (12*Hd)
Z_IN, Z_OUT = HV + 2 * HE + ZW_U + ZW_S, 2 * ZW_U + 2 * ZW_S
INIT_IN, INIT_OUT = HV + ZW_U + ZW_S + 8, 4 * HD + BOW
VRN_IN, VRN_OUT = BOW + ZW_S + HE + HV, 4 * HV + V

R_ENC_X = 0                                     # [2V, 8He]  enc x-proj (emb folded, dup)
R_ENC_H = R_ENC_X + 2 * V                       # [2He, 8He] enc W_hh (block-diag dup)
R_DEC_X = R_ENC_H + 2 * HE                      # [2V, 12Hd] 4-decoder x-proj (emb folded)
R_DEC_H = R_DEC_X + 2 * V                       # [4Hd, 12Hd] 4-decoder W_hh (block-diag)
R_DEC_O = R_DEC_H + 4 * HD                      # [4Hd, 4V]  4-decoder W_out (block-diag)
R_Z = R_DEC_O + 4 * HD                          # [Z_IN, Z_OUT] q_u|p_u|q_s|p_s heads
R_INIT = R_Z + Z_IN                             # [INIT_IN, INIT_OUT] dec inits + bow l1
R_VRN = R_INIT + INIT_IN                        # [VRN_IN, VRN_OUT] vrnn LSTMCell + bow l2
R_B_ENC = R_VRN + VRN_IN                        # 7 bias blocks, 8 replicated rows each
R_B_DECX = R_B_ENC + 8
R_B_DECH = R_B_DECX + 8
R_B_DECO = R_B_DECH + 8
R_B_Z = R_B_DECO + 8
R_B_INIT = R_B_Z + 8
R_B_VRN = R_B_INIT + 8
R_TOTAL = R_B_VRN + 8

VECIN_W = 128
VECOUT_W = 4 * ZW_U + 4 * ZW_S + 2 * HE + V + 2 * HV       # 256

assert max(8 * HE, 12 * HD, 4 * V, Z_OUT, INIT_OUT, VRN_OUT) <= WSLAB_W
assert all(r % 8 == 0 for r in (R_ENC_H, R_DEC_X, R_DEC_H, R_DEC_O, R_Z,
                                R_INIT, R_VRN, R_B_ENC))
assert 2 * HV + ZW_U + ZW_S + DB <= VECIN_W


# --------------------------------------------------------------------------
# Fused Pallas kernel: whole VAECell forward in a single call, 3 in / 3 out
# --------------------------------------------------------------------------
def _vaecell_kernel(w_ref, oh_ref, vec_ref,
                    logits_ref, encouts_ref, vecout_ref,
                    *, T, Bp, use_prior):
    f32 = jnp.float32

    def mm(a, b):
        return jnp.dot(a, b, preferred_element_type=f32)

    vec = vec_ref[...]                                   # [Bp, 128] packed per-batch inputs
    prev_h = vec[:, 0:HV]
    prev_c = vec[:, HV:2 * HV]
    z_prev = vec[:, 2 * HV:2 * HV + ZW_U + ZW_S]         # [u_z_prev | s_z_prev]
    db_pad = vec[:, 2 * HV + ZW_U + ZW_S:2 * HV + ZW_U + ZW_S + 8]  # db one-hot + 0 pad

    oh = oh_ref[...]                                     # [T*Bp, 2V] user|system one-hots

    # ---- user + system encoder LSTM, one batched recurrence (shared weights) ----
    w_enc_h = w_ref[R_ENC_H:R_ENC_H + 2 * HE, 0:8 * HE]
    b_enc = w_ref[R_B_ENC:R_B_ENC + Bp, 0:8 * HE]
    xp_enc = mm(oh, w_ref[R_ENC_X:R_ENC_X + 2 * V, 0:8 * HE])     # [T*Bp, 8He]
    h = jnp.zeros((Bp, 2 * HE), f32)                     # zero_hidden(...), [h_u | h_s]
    c = jnp.zeros((Bp, 2 * HE), f32)
    enc_hs = []
    for t in range(T):                                   # static unroll (T small)
        g = xp_enc[t * Bp:(t + 1) * Bp, :] + b_enc + mm(h, w_enc_h)
        sg = jax.nn.sigmoid(g[:, 0:6 * HE])              # [i_u i_s | f_u f_s | o_u o_s]
        gg = jnp.tanh(g[:, 6 * HE:8 * HE])               # [g_u g_s]
        c = sg[:, 2 * HE:4 * HE] * c + sg[:, 0:2 * HE] * gg
        h = sg[:, 4 * HE:6 * HE] * jnp.tanh(c)
        enc_hs.append(h)
    encouts_ref[...] = jnp.concatenate(enc_hs, axis=0)   # single consolidated store
    last_h_u = h[:, 0:HE]
    last_h_s = h[:, HE:2 * HE]

    # ---- the four z heads (q_u | p_u | q_s | p_s) as ONE fused matmul ----
    act_z = jnp.concatenate([prev_h, h, z_prev], axis=-1)          # [Bp, Z_IN]
    zl = mm(act_z, w_ref[R_Z:R_Z + Z_IN, 0:Z_OUT]) + w_ref[R_B_Z:R_B_Z + Bp, 0:Z_OUT]
    q_u = zl[:, 0:ZW_U]
    p_u = zl[:, ZW_U:2 * ZW_U]
    q_s = zl[:, 2 * ZW_U:2 * ZW_U + ZW_S]
    p_s = zl[:, 2 * ZW_U + ZW_S:2 * ZW_U + 2 * ZW_S]

    def head_softmax(x, nz, zd):       # per z-head softmax, lane-concatenated back
        if nz == 1:
            return jax.nn.softmax(x, axis=-1)
        return jnp.concatenate(
            [jax.nn.softmax(x[:, k * zd:(k + 1) * zd], axis=-1) for k in range(nz)],
            axis=-1)

    # TODO(synk): deterministic "samples" (no gumbel / reparameterization noise)
    post_u = head_softmax(q_u, NZ_U, ZD_U)
    prior_u = head_softmax(p_u, NZ_U, ZD_U)
    post_s = head_softmax(q_s, NZ_S, ZD_S)
    prior_s = head_softmax(p_s, NZ_S, ZD_S)
    sampled_u = post_u                                   # user turn uses posterior (spec)
    sampled_s = prior_s if use_prior else post_s         # static python choice

    # ---- decoder inits (all 4 decoders) + bow layer 1, ONE fused matmul ----
    act_i = jnp.concatenate([prev_h, sampled_u, sampled_s, db_pad], axis=-1)   # [Bp, 72]
    pre = (mm(act_i, w_ref[R_INIT:R_INIT + INIT_IN, 0:INIT_OUT])
           + w_ref[R_B_INIT:R_B_INIT + Bp, 0:INIT_OUT])
    h0 = jnp.tanh(pre[:, 0:4 * HD])                      # [Bp, 4Hd] = [u1|u2|s1|s2]
    bow_h = pre[:, 4 * HD:4 * HD + BOW]                  # FFNet layer-1 activation = None

    # ---- vrnn LSTMCell + bow layer 2, ONE fused matmul ----
    act_v = jnp.concatenate([bow_h, sampled_s, last_h_u, prev_h], axis=-1)     # [Bp, 80]
    vres = (mm(act_v, w_ref[R_VRN:R_VRN + VRN_IN, 0:VRN_OUT])
            + w_ref[R_B_VRN:R_B_VRN + Bp, 0:VRN_OUT])
    sgv = jax.nn.sigmoid(vres[:, 0:3 * HV])              # [i | f | o]
    ggv = jnp.tanh(vres[:, 3 * HV:4 * HV])
    bow = jnp.tanh(vres[:, 4 * HV:4 * HV + V])           # bow_projection layer-2 (tanh)
    c_new = sgv[:, HV:2 * HV] * prev_c + sgv[:, 0:HV] * ggv
    h_new = sgv[:, 2 * HV:3 * HV] * jnp.tanh(c_new)

    # ---- all FOUR GRU decoders, one batched recurrence ----
    xp_dec = mm(oh, w_ref[R_DEC_X:R_DEC_X + 2 * V, 0:12 * HD])     # [T*Bp, 12Hd]
    b_dx = w_ref[R_B_DECX:R_B_DECX + Bp, 0:12 * HD]
    w_dh = w_ref[R_DEC_H:R_DEC_H + 4 * HD, 0:12 * HD]
    b_dh = w_ref[R_B_DECH:R_B_DECH + Bp, 0:12 * HD]
    hd = h0
    dec_hs = []
    for t in range(T):
        xpt = xp_dec[t * Bp:(t + 1) * Bp, :] + b_dx
        hp = mm(hd, w_dh) + b_dh
        rz = jax.nn.sigmoid(xpt[:, 0:8 * HD] + hp[:, 0:8 * HD])
        n = jnp.tanh(xpt[:, 8 * HD:12 * HD] + rz[:, 0:4 * HD] * hp[:, 8 * HD:12 * HD])
        z = rz[:, 4 * HD:8 * HD]
        hd = (1.0 - z) * n + z * hd
        dec_hs.append(hd)
    dec_all = jnp.concatenate(dec_hs, axis=0)                      # [T*Bp, 4Hd]
    logits_ref[...] = (mm(dec_all, w_ref[R_DEC_O:R_DEC_O + 4 * HD, 0:4 * V])
                       + w_ref[R_B_DECO:R_B_DECO + 1, 0:4 * V])    # one 128-lane store

    # ---- single packed per-batch output store (2 vregs wide) ----
    vecout_ref[...] = jnp.concatenate(
        [q_u, p_u, post_u, prior_u, q_s, p_s, post_s, prior_s,
         last_h_u, last_h_s, bow, h_new, c_new], axis=-1)          # [Bp, 256]


# --------------------------------------------------------------------------
# Parameter init (deterministic, synthetic, per-module) + host-side packing
# --------------------------------------------------------------------------
def init_params(key):
    keys = iter(jax.random.split(key, 64))

    def nrm(shape):
        return np.asarray(jax.random.normal(next(keys), shape) * 0.1, np.float32)

    p = dict(
        emb=nrm((V, E)),
        # embedding_encoder (torch.nn.LSTM stand-in); enc_b represents b_ih + b_hh folded
        enc_w_ih=nrm((E, 4 * HE)), enc_w_hh=nrm((HE, 4 * HE)), enc_b=nrm((4 * HE,)),
        # ZNet stand-in q/p heads (heads of one turn concatenated)
        uq_w=nrm((HV + HE, ZW_U)), uq_b=nrm((ZW_U,)),
        up_w=nrm((CFG["user_z_total_size"], ZW_U)), up_b=nrm((ZW_U,)),
        sq_w=nrm((HV + HE, ZW_S)), sq_b=nrm((ZW_S,)),
        sp_w=nrm((CFG["system_z_total_size"] + HE, ZW_S)), sp_b=nrm((ZW_S,)),
        # bow_projection: FFNet(Hv + user_z_logits_dim, [bow, V]), activations=[None, tanh]
        bow_w1=nrm((HV + ZW_U, BOW)), bow_b1=nrm((BOW,)),
        bow_w2=nrm((BOW, V)), bow_b2=nrm((V,)),
        # vrnn_cell stand-in: LSTMCell(system_z_total + enc_hid -> vrnn_hidden), bias folded
        vrnn_w_ih=nrm((ZW_S + HE, 4 * HV)), vrnn_w_hh=nrm((HV, 4 * HV)), vrnn_b=nrm((4 * HV,)),
    )

    def dec(init_in):                    # RNNDecoder stand-in: GRU language model
        return dict(w_init=nrm((init_in, HD)), b_init=nrm((HD,)),
                    w_ih=nrm((E, 3 * HD)), b_ih=nrm((3 * HD,)),
                    w_hh=nrm((HD, 3 * HD)), b_hh=nrm((3 * HD,)),
                    w_out=nrm((HD, V)), b_out=nrm((V,)))

    p["dec_u1"] = dec(HV + CFG["user_z_total_size"])
    p["dec_u2"] = dec(HV + CFG["user_z_total_size"])
    p["dec_s1"] = dec(HV + CFG["system_z_total_size"] + DB)
    p["dec_s2"] = dec(HV + CFG["system_z_total_size"] + DB)
    return p


def pack_params(p):
    """Pack all weights/biases into ONE lane-dense [R_TOTAL, 192] f32 slab.

    Fusions baked in once at pack time: embedding folded into x-projections,
    encoder duplicated block-diagonally (user|system copies, gate-major i f o g),
    4 decoders packed gate-major (r z n) x (u1 u2 s1 s2) with block-diag W_hh /
    W_out, z heads / decoder-inits+bow1 / vrnn+bow2 each fused into one wide
    matmul, biases replicated to 8 sublane rows (no in-kernel broadcasts).
    """
    w = np.zeros((R_TOTAL, WSLAB_W), np.float32)
    emb = p["emb"]

    def lstm_reorder(x):                 # torch gate order (i,f,g,o) -> (i,f,o,g)
        H = x.shape[-1] // 4
        return np.concatenate([x[..., 0:H], x[..., H:2 * H],
                               x[..., 3 * H:4 * H], x[..., 2 * H:3 * H]], -1)

    # encoder (shared weights, duplicated; embedding folded into x-proj)
    enc_x = lstm_reorder(emb @ p["enc_w_ih"])
    enc_h = lstm_reorder(p["enc_w_hh"])
    enc_b = lstm_reorder(p["enc_b"][None, :])[0]
    for g in range(4):
        src = slice(g * HE, (g + 1) * HE)
        w[R_ENC_X:R_ENC_X + V, (2 * g) * HE:(2 * g + 1) * HE] = enc_x[:, src]
        w[R_ENC_X + V:R_ENC_X + 2 * V, (2 * g + 1) * HE:(2 * g + 2) * HE] = enc_x[:, src]
        w[R_ENC_H:R_ENC_H + HE, (2 * g) * HE:(2 * g + 1) * HE] = enc_h[:, src]
        w[R_ENC_H + HE:R_ENC_H + 2 * HE, (2 * g + 1) * HE:(2 * g + 2) * HE] = enc_h[:, src]
        w[R_B_ENC:R_B_ENC + 8, (2 * g) * HE:(2 * g + 1) * HE] = enc_b[src]
        w[R_B_ENC:R_B_ENC + 8, (2 * g + 1) * HE:(2 * g + 2) * HE] = enc_b[src]

    # four decoders: u1, u2 (user pair), s1, s2 (system pair)
    decs = [p["dec_u1"], p["dec_u2"], p["dec_s1"], p["dec_s2"]]
    for di, d in enumerate(decs):
        x_rows = R_DEC_X + (0 if di < 2 else V)
        dx = emb @ d["w_ih"]                         # embedding folded
        for g in range(3):                           # r, z, n (torch GRU order)
            col = g * 4 * HD + di * HD
            src = slice(g * HD, (g + 1) * HD)
            w[x_rows:x_rows + V, col:col + HD] = dx[:, src]
            w[R_DEC_H + di * HD:R_DEC_H + (di + 1) * HD, col:col + HD] = d["w_hh"][:, src]
            w[R_B_DECX:R_B_DECX + 8, col:col + HD] = d["b_ih"][src]
            w[R_B_DECH:R_B_DECH + 8, col:col + HD] = d["b_hh"][src]
        w[R_DEC_O + di * HD:R_DEC_O + (di + 1) * HD, di * V:(di + 1) * V] = d["w_out"]
        w[R_B_DECO:R_B_DECO + 8, di * V:(di + 1) * V] = d["b_out"]
        # decoder init projections (fused with bow layer 1)
        c0 = di * HD
        w[R_INIT:R_INIT + HV, c0:c0 + HD] = d["w_init"][0:HV]
        if di < 2:       # user decoders: init input = cat([prev_h, sampled_u])
            w[R_INIT + HV:R_INIT + HV + ZW_U, c0:c0 + HD] = d["w_init"][HV:HV + ZW_U]
        else:            # system decoders: init input = cat([prev_h, sampled_s, db_oh])
            w[R_INIT + HV + ZW_U:R_INIT + HV + ZW_U + ZW_S, c0:c0 + HD] = \
                d["w_init"][HV:HV + ZW_S]
            w[R_INIT + HV + ZW_U + ZW_S:R_INIT + HV + ZW_U + ZW_S + DB, c0:c0 + HD] = \
                d["w_init"][HV + ZW_S:HV + ZW_S + DB]
        w[R_B_INIT:R_B_INIT + 8, c0:c0 + HD] = d["b_init"]
    # bow layer 1 (input = user decoder init input = cat([prev_h, sampled_u]))
    w[R_INIT:R_INIT + HV, 4 * HD:4 * HD + BOW] = p["bow_w1"][0:HV]
    w[R_INIT + HV:R_INIT + HV + ZW_U, 4 * HD:4 * HD + BOW] = p["bow_w1"][HV:HV + ZW_U]
    w[R_B_INIT:R_B_INIT + 8, 4 * HD:4 * HD + BOW] = p["bow_b1"]

    # z heads: act rows = [prev_h | last_h_u | last_h_s | u_z_prev | s_z_prev]
    r = R_Z
    w[r:r + HV, 0:ZW_U] = p["uq_w"][0:HV]
    w[r + HV:r + HV + HE, 0:ZW_U] = p["uq_w"][HV:HV + HE]
    w[r + HV + 2 * HE:r + HV + 2 * HE + ZW_U, ZW_U:2 * ZW_U] = p["up_w"]
    w[r:r + HV, 2 * ZW_U:2 * ZW_U + ZW_S] = p["sq_w"][0:HV]
    w[r + HV + HE:r + HV + 2 * HE, 2 * ZW_U:2 * ZW_U + ZW_S] = p["sq_w"][HV:HV + HE]
    w[r + HV + 2 * HE + ZW_U:r + HV + 2 * HE + ZW_U + ZW_S,
      2 * ZW_U + ZW_S:2 * ZW_U + 2 * ZW_S] = p["sp_w"][0:ZW_S]
    w[r + HV:r + HV + HE, 2 * ZW_U + ZW_S:2 * ZW_U + 2 * ZW_S] = p["sp_w"][ZW_S:ZW_S + HE]
    w[R_B_Z:R_B_Z + 8, 0:ZW_U] = p["uq_b"]
    w[R_B_Z:R_B_Z + 8, ZW_U:2 * ZW_U] = p["up_b"]
    w[R_B_Z:R_B_Z + 8, 2 * ZW_U:2 * ZW_U + ZW_S] = p["sq_b"]
    w[R_B_Z:R_B_Z + 8, 2 * ZW_U + ZW_S:2 * ZW_U + 2 * ZW_S] = p["sp_b"]

    # vrnn LSTMCell + bow layer 2: act rows = [bow_h | sampled_s | last_h_u | prev_h]
    vih = lstm_reorder(p["vrnn_w_ih"])
    vhh = lstm_reorder(p["vrnn_w_hh"])
    vb = lstm_reorder(p["vrnn_b"][None, :])[0]
    r = R_VRN
    w[r + BOW:r + BOW + ZW_S, 0:4 * HV] = vih[0:ZW_S]
    w[r + BOW + ZW_S:r + BOW + ZW_S + HE, 0:4 * HV] = vih[ZW_S:ZW_S + HE]
    w[r + BOW + ZW_S + HE:r + BOW + ZW_S + HE + HV, 0:4 * HV] = vhh
    w[r:r + BOW, 4 * HV:4 * HV + V] = p["bow_w2"]
    w[R_B_VRN:R_B_VRN + 8, 0:4 * HV] = vb
    w[R_B_VRN:R_B_VRN + 8, 4 * HV:4 * HV + V] = p["bow_b2"]
    return jnp.asarray(w)


# --------------------------------------------------------------------------
# Forward wrapper: single pallas_call + cheap host-side pack / unpack
# --------------------------------------------------------------------------
def vae_cell_forward(packed_w, user_dials, user_lens, usr_nlu_lens, sys_nlu_lens,
                     system_dials, system_lens, db_res, previous_vrnn_hidden,
                     user_z_previous, system_z_previous, use_prior, copy_coeff):
    # TODO(synk): lens / copy_coeff unused (no packed sequences / copynet / attention)
    del user_lens, usr_nlu_lens, sys_nlu_lens, system_lens, copy_coeff

    B, T = user_dials.shape
    Bp = ((B + 7) // 8) * 8                 # pad batch to a sublane multiple
    f32 = jnp.float32

    def oh_tm(ids):                          # [B, T] -> [T, Bp, V] one-hot, time-major
        oh = jax.nn.one_hot(jnp.transpose(ids, (1, 0)), V, dtype=f32)
        return jnp.pad(oh, ((0, 0), (0, Bp - B), (0, 0)))

    oh = jnp.concatenate([oh_tm(user_dials), oh_tm(system_dials)],
                         axis=-1).reshape(T * Bp, 2 * V)

    db_oh = jax.nn.one_hot(db_res.reshape(B), DB, dtype=f32)
    vec = jnp.concatenate(
        [previous_vrnn_hidden[0].astype(f32), previous_vrnn_hidden[1].astype(f32),
         user_z_previous.astype(f32), system_z_previous.astype(f32), db_oh,
         jnp.zeros((B, VECIN_W - (2 * HV + ZW_U + ZW_S + DB)), f32)], axis=-1)
    vec = jnp.pad(vec, ((0, Bp - B), (0, 0)))                  # [Bp, 128]

    kernel = functools.partial(_vaecell_kernel, T=T, Bp=Bp, use_prior=bool(use_prior))
    logits, encouts, vecout = pl.pallas_call(
        kernel,
        out_shape=(
            jax.ShapeDtypeStruct((T * Bp, 4 * V), f32),        # 4 decoders' logits
            jax.ShapeDtypeStruct((T * Bp, 2 * HE), f32),       # user|system encoder outs
            jax.ShapeDtypeStruct((Bp, VECOUT_W), f32),         # packed per-batch vectors
        ),
        compiler_params=pltpu.CompilerParams(
            vmem_limit_bytes=32 * 1024 * 1024),                # safe on v5e / v6e / v7x
    )(packed_w, oh, vec)

    # ------------------ unpack lane-dense slabs to API shapes ---------------
    logits = logits.reshape(T, Bp, 4 * V)[:, :B]
    encouts = encouts.reshape(T, Bp, 2 * HE)[:, :B]
    vo = vecout[:B]

    pos = [0]

    def take(width):
        s = pos[0]
        pos[0] += width
        return vo[:, s:s + width]

    q_u, p_u, post_u, prior_u = take(ZW_U), take(ZW_U), take(ZW_U), take(ZW_U)
    q_s, p_s, post_s, prior_s = take(ZW_S), take(ZW_S), take(ZW_S), take(ZW_S)
    last_h_u, last_h_s = take(HE), take(HE)
    bow, h_new, c_new = take(V), take(HV), take(HV)

    def turn_output(q, pz, post, prior, nz, zd, decoded, sampled, last_h,
                    enc_hid, bow_logits):
        q3 = q.reshape(B, nz, zd)
        p3 = pz.reshape(B, nz, zd)
        prior3 = prior.reshape(B, nz, zd)
        post3 = post.reshape(B, nz, zd)
        return dict(
            decoded_outputs=decoded,
            q_z=q3, p_z=p3,
            z_samples=prior,                                   # aggregate(prior samples)
            p_z_samples_lst=jnp.transpose(prior3, (0, 2, 1)),
            q_z_samples_lst=jnp.transpose(post3, (0, 2, 1)),
            bow_logits=bow_logits,
            sampled_z=sampled,
            last_encoder_hidden=last_h,
            encoder_hiddens=enc_hid,
        )

    user_out = turn_output(
        q_u, p_u, post_u, prior_u, NZ_U, ZD_U,
        [logits[:, :, 0:V], logits[:, :, V:2 * V]],
        post_u, last_h_u, encouts[:, :, 0:HE], bow)
    sys_sampled = prior_s if use_prior else post_s
    sys_out = turn_output(
        q_s, p_s, post_s, prior_s, NZ_S, ZD_S,
        [logits[:, :, 2 * V:3 * V], logits[:, :, 3 * V:4 * V]],
        sys_sampled, last_h_s, encouts[:, :, HE:2 * HE],
        None)  # TODO(synk): bow_projection input dim only matches the user turn

    return dict(next_vrnn_hidden=(h_new, c_new),
                user_turn_output=user_out,
                system_turn_output=sys_out)


vae_cell_forward_jit = jax.jit(vae_cell_forward, static_argnames=("use_prior",))


# --------------------------------------------------------------------------
if __name__ == "__main__":
    key = jax.random.PRNGKey(0)
    pkey, dkey = jax.random.split(key)
    params = init_params(pkey)
    packed_w = pack_params(params)            # packed once, outside the jitted forward

    B, T = 2, 8
    k1, k2, k3, k4, k5, k6, k7 = jax.random.split(dkey, 7)
    user_dials = jax.random.randint(k1, (B, T), 0, V, dtype=jnp.int32)
    system_dials = jax.random.randint(k2, (B, T), 0, V, dtype=jnp.int32)
    db_res = jax.random.randint(k3, (B, 1), 0, DB, dtype=jnp.int32)
    prev_vrnn_hidden = (
        (jax.random.normal(k4, (B, HV)) * 0.1).astype(jnp.float32),
        (jax.random.normal(k5, (B, HV)) * 0.1).astype(jnp.float32),
    )
    user_z_prev = (jax.random.normal(k6, (B, CFG["user_z_total_size"])) * 0.1).astype(jnp.float32)
    sys_z_prev = (jax.random.normal(k7, (B, CFG["system_z_total_size"])) * 0.1).astype(jnp.float32)
    lens = jnp.full((B,), T, dtype=jnp.int32)

    out = vae_cell_forward_jit(packed_w, user_dials, lens, lens, lens,
                               system_dials, lens, db_res, prev_vrnn_hidden,
                               user_z_prev, sys_z_prev,
                               use_prior=True, copy_coeff=0.0)
    jax.block_until_ready(out)
    print("KERNEL_OK")
</pallas_src>

<mosaic_0001>
module attributes {stable_mosaic.version = 11 : i64} {
  func.func @_vaecell_kernel(%arg0: memref<592x192xf32, #tpu.memory_space<vmem>>, %arg1: memref<64x64xf32, #tpu.memory_space<vmem>>, %arg2: memref<8x128xf32, #tpu.memory_space<vmem>>, %arg3: memref<64x128xf32, #tpu.memory_space<vmem>>, %arg4: memref<64x32xf32, #tpu.memory_space<vmem>>, %arg5: memref<8x256xf32, #tpu.memory_space<vmem>>) attributes {dimension_semantics = [], scalar_prefetch = 0 : i64, scratch_operands = 0 : i64, tpu.core_type = #tpu.core_type<tc>} {
    %c0 = arith.constant 0 : index
    %c0_0 = arith.constant 0 : index
    %0 = vector.load %arg2[%c0, %c0_0] : memref<8x128xf32, #tpu.memory_space<vmem>>, vector<8x128xf32>
    %1 = vector.extract_strided_slice %0 {offsets = [0, 0], sizes = [8, 32], strides = [1, 1]} : vector<8x128xf32> to vector<8x32xf32>
    %2 = vector.extract_strided_slice %0 {offsets = [0, 32], sizes = [8, 32], strides = [1, 1]} : vector<8x128xf32> to vector<8x32xf32>
    %3 = vector.extract_strided_slice %0 {offsets = [0, 64], sizes = [8, 32], strides = [1, 1]} : vector<8x128xf32> to vector<8x32xf32>
    %4 = vector.extract_strided_slice %0 {offsets = [0, 96], sizes = [8, 8], strides = [1, 1]} : vector<8x128xf32> to vector<8x8xf32>
    %c0_1 = arith.constant 0 : index
    %c0_2 = arith.constant 0 : index
    %5 = vector.load %arg1[%c0_1, %c0_2] : memref<64x64xf32, #tpu.memory_space<vmem>>, vector<64x64xf32>
    %c64 = arith.constant 64 : index
    %c0_3 = arith.constant 0 : index
    %6 = vector.load %arg0[%c64, %c0_3] : memref<592x192xf32, #tpu.memory_space<vmem>>, vector<32x128xf32>
    %c536 = arith.constant 536 : index
    %c0_4 = arith.constant 0 : index
    %7 = vector.load %arg0[%c536, %c0_4] : memref<592x192xf32, #tpu.memory_space<vmem>>, vector<8x128xf32>
    %c0_5 = arith.constant 0 : index
    %c0_6 = arith.constant 0 : index
    %8 = vector.load %arg0[%c0_5, %c0_6] : memref<592x192xf32, #tpu.memory_space<vmem>>, vector<64x128xf32>
    %cst = arith.constant dense<0.000000e+00> : vector<64x128xf32>
    %9 = tpu.matmul %5, %8, %cst {dimension_numbers = #tpu.dot_dimension_numbers<[1], [0], [0], [1], [0, 0, 1, 1], [], []>} : vector<64x64xf32>, vector<64x128xf32>, vector<64x128xf32> -> vector<64x128xf32>
    %cst_7 = arith.constant 0.000000e+00 : f32
    %10 = vector.broadcast %cst_7 : f32 to vector<8x32xf32>
    %cst_8 = arith.constant 0.000000e+00 : f32
    %11 = vector.broadcast %cst_8 : f32 to vector<8x32xf32>
    %12 = vector.extract_strided_slice %9 {offsets = [0, 0], sizes = [8, 128], strides = [1, 1]} : vector<64x128xf32> to vector<8x128xf32>
    %13 = arith.addf %12, %7 : vector<8x128xf32>
    %cst_9 = arith.constant dense<0.000000e+00> : vector<8x128xf32>
    %14 = tpu.matmul %10, %6, %cst_9 {dimension_numbers = #tpu.dot_dimension_numbers<[1], [0], [0], [1], [0, 0, 1, 1], [], []>} : vector<8x32xf32>, vector<32x128xf32>, vector<8x128xf32> -> vector<8x128xf32>
    %15 = arith.addf %13, %14 : vector<8x128xf32>
    %16 = vector.extract_strided_slice %15 {offsets = [0, 0], sizes = [8, 96], strides = [1, 1]} : vector<8x128xf32> to vector<8x96xf32>
    %17 = arith.negf %16 : vector<8x96xf32>
    %18 = math.exp %17 : vector<8x96xf32>
    %cst_10 = arith.constant 1.000000e+00 : f32
    %19 = vector.broadcast %cst_10 : f32 to vector<8x96xf32>
    %20 = arith.addf %19, %18 : vector<8x96xf32>
    %21 = arith.divf %19, %20 : vector<8x96xf32>
    %22 = vector.extract_strided_slice %15 {offsets = [0, 96], sizes = [8, 32], strides = [1, 1]} : vector<8x128xf32> to vector<8x32xf32>
    %23 = math.tanh %22 : vector<8x32xf32>
    %24 = vector.extract_strided_slice %21 {offsets = [0, 32], sizes = [8, 32], strides = [1, 1]} : vector<8x96xf32> to vector<8x32xf32>
    %25 = arith.mulf %24, %11 : vector<8x32xf32>
    %26 = vector.extract_strided_slice %21 {offsets = [0, 0], sizes = [8, 32], strides = [1, 1]} : vector<8x96xf32> to vector<8x32xf32>
    %27 = arith.mulf %26, %23 : vector<8x32xf32>
    %28 = arith.addf %25, %27 : vector<8x32xf32>
    %29 = vector.extract_strided_slice %21 {offsets = [0, 64], sizes = [8, 32], strides = [1, 1]} : vector<8x96xf32> to vector<8x32xf32>
    %30 = math.tanh %28 : vector<8x32xf32>
    %31 = arith.mulf %29, %30 : vector<8x32xf32>
    %32 = vector.extract_strided_slice %9 {offsets = [8, 0], sizes = [8, 128], strides = [1, 1]} : vector<64x128xf32> to vector<8x128xf32>
    %33 = arith.addf %32, %7 : vector<8x128xf32>
    %cst_11 = arith.constant dense<0.000000e+00> : vector<8x128xf32>
    %34 = tpu.matmul %31, %6, %cst_11 {dimension_numbers = #tpu.dot_dimension_numbers<[1], [0], [0], [1], [0, 0, 1, 1], [], []>} : vector<8x32xf32>, vector<32x128xf32>, vector<8x128xf32> -> vector<8x128xf32>
    %35 = arith.addf %33, %34 : vector<8x128xf32>
    %36 = vector.extract_strided_slice %35 {offsets = [0, 0], sizes = [8, 96], strides = [1, 1]} : vector<8x128xf32> to vector<8x96xf32>
    %37 = arith.negf %36 : vector<8x96xf32>
    %38 = math.exp %37 : vector<8x96xf32>
    %cst_12 = arith.constant 1.000000e+00 : f32
    %39 = vector.broadcast %cst_12 : f32 to vector<8x96xf32>
    %40 = arith.addf %39, %38 : vector<8x96xf32>
    %41 = arith.divf %39, %40 : vector<8x96xf32>
    %42 = vector.extract_strided_slice %35 {offsets = [0, 96], sizes = [8, 32], strides = [1, 1]} : vector<8x128xf32> to vector<8x32xf32>
    %43 = math.tanh %42 : vector<8x32xf32>
    %44 = vector.extract_strided_slice %41 {offsets = [0, 32], sizes = [8, 32], strides = [1, 1]} : vector<8x96xf32> to vector<8x32xf32>
    %45 = arith.mulf %44, %28 : vector<8x32xf32>
    %46 = vector.extract_strided_slice %41 {offsets = [0, 0], sizes = [8, 32], strides = [1, 1]} : vector<8x96xf32> to vector<8x32xf32>
    %47 = arith.mulf %46, %43 : vector<8x32xf32>
    %48 = arith.addf %45, %47 : vector<8x32xf32>
    %49 = vector.extract_strided_slice %41 {offsets = [0, 64], sizes = [8, 32], strides = [1, 1]} : vector<8x96xf32> to vector<8x32xf32>
    %50 = math.tanh %48 : vector<8x32xf32>
    %51 = arith.mulf %49, %50 : vector<8x32xf32>
    %52 = vector.extract_strided_slice %9 {offsets = [16, 0], sizes = [8, 128], strides = [1, 1]} : vector<64x128xf32> to vector<8x128xf32>
    %53 = arith.addf %52, %7 : vector<8x128xf32>
    %cst_13 = arith.constant dense<0.000000e+00> : vector<8x128xf32>
    %54 = tpu.matmul %51, %6, %cst_13 {dimension_numbers = #tpu.dot_dimension_numbers<[1], [0], [0], [1], [0, 0, 1, 1], [], []>} : vector<8x32xf32>, vector<32x128xf32>, vector<8x128xf32> -> vector<8x128xf32>
    %55 = arith.addf %53, %54 : vector<8x128xf32>
    %56 = vector.extract_strided_slice %55 {offsets = [0, 0], sizes = [8, 96], strides = [1, 1]} : vector<8x128xf32> to vector<8x96xf32>
    %57 = arith.negf %56 : vector<8x96xf32>
    %58 = math.exp %57 : vector<8x96xf32>
    %cst_14 = arith.constant 1.000000e+00 : f32
    %59 = vector.broadcast %cst_14 : f32 to vector<8x96xf32>
    %60 = arith.addf %59, %58 : vector<8x96xf32>
    %61 = arith.divf %59, %60 : vector<8x96xf32>
    %62 = vector.extract_strided_slice %55 {offsets = [0, 96], sizes = [8, 32], strides = [1, 1]} : vector<8x128xf32> to vector<8x32xf32>
    %63 = math.tanh %62 : vector<8x32xf32>
    %64 = vector.extract_strided_slice %61 {offsets = [0, 32], sizes = [8, 32], strides = [1, 1]} : vector<8x96xf32> to vector<8x32xf32>
    %65 = arith.mulf %64, %48 : vector<8x32xf32>
    %66 = vector.extract_strided_slice %61 {offsets = [0, 0], sizes = [8, 32], strides = [1, 1]} : vector<8x96xf32> to vector<8x32xf32>
    %67 = arith.mulf %66, %63 : vector<8x32xf32>
    %68 = arith.addf %65, %67 : vector<8x32xf32>
    %69 = vector.extract_strided_slice %61 {offsets = [0, 64], sizes = [8, 32], strides = [1, 1]} : vector<8x96xf32> to vector<8x32xf32>
    %70 = math.tanh %68 : vector<8x32xf32>
    %71 = arith.mulf %69, %70 : vector<8x32xf32>
    %72 = vector.extract_strided_slice %9 {offsets = [24, 0], sizes = [8, 128], strides = [1, 1]} : vector<64x128xf32> to vector<8x128xf32>
    %73 = arith.addf %72, %7 : vector<8x128xf32>
    %cst_15 = arith.constant dense<0.000000e+00> : vector<8x128xf32>
    %74 = tpu.matmul %71, %6, %cst_15 {dimension_numbers = #tpu.dot_dimension_numbers<[1], [0], [0], [1], [0, 0, 1, 1], [], []>} : vector<8x32xf32>, vector<32x128xf32>, vector<8x128xf32> -> vector<8x128xf32>
    %75 = arith.addf %73, %74 : vector<8x128xf32>
    %76 = vector.extract_strided_slice %75 {offsets = [0, 0], sizes = [8, 96], strides = [1, 1]} : vector<8x128xf32> to vector<8x96xf32>
    %77 = arith.negf %76 : vector<8x96xf32>
    %78 = math.exp %77 : vector<8x96xf32>
    %cst_16 = arith.constant 1.000000e+00 : f32
    %79 = vector.broadcast %cst_16 : f32 to vector<8x96xf32>
    %80 = arith.addf %79, %78 : vector<8x96xf32>
    %81 = arith.divf %79, %80 : vector<8x96xf32>
    %82 = vector.extract_strided_slice %75 {offsets = [0, 96], sizes = [8, 32], strides = [1, 1]} : vector<8x128xf32> to vector<8x32xf32>
    %83 = math.tanh %82 : vector<8x32xf32>
    %84 = vector.extract_strided_slice %81 {offsets = [0, 32], sizes = [8, 32], strides = [1, 1]} : vector<8x96xf32> to vector<8x32xf32>
    %85 = arith.mulf %84, %68 : vector<8x32xf32>
    %86 = vector.extract_strided_slice %81 {offsets = [0, 0], sizes = [8, 32], strides = [1, 1]} : vector<8x96xf32> to vector<8x32xf32>
    %87 = arith.mulf %86, %83 : vector<8x32xf32>
    %88 = arith.addf %85, %87 : vector<8x32xf32>
    %89 = vector.extract_strided_slice %81 {offsets = [0, 64], sizes = [8, 32], strides = [1, 1]} : vector<8x96xf32> to vector<8x32xf32>
    %90 = math.tanh %88 : vector<8x32xf32>
    %91 = arith.mulf %89, %90 : vector<8x32xf32>
    %92 = vector.extract_strided_slice %9 {offsets = [32, 0], sizes = [8, 128], strides = [1, 1]} : vector<64x128xf32> to vector<8x128xf32>
    %93 = arith.addf %92, %7 : vector<8x128xf32>
    %cst_17 = arith.constant dense<0.000000e+00> : vector<8x128xf32>
    %94 = tpu.matmul %91, %6, %cst_17 {dimension_numbers = #tpu.dot_dimension_numbers<[1], [0], [0], [1], [0, 0, 1, 1], [], []>} : vector<8x32xf32>, vector<32x128xf32>, vector<8x128xf32> -> vector<8x128xf32>
    %95 = arith.addf %93, %94 : vector<8x128xf32>
    %96 = vector.extract_strided_slice %95 {offsets = [0, 0], sizes = [8, 96], strides = [1, 1]} : vector<8x128xf32> to vector<8x96xf32>
    %97 = arith.negf %96 : vector<8x96xf32>
    %98 = math.exp %97 : vector<8x96xf32>
    %cst_18 = arith.constant 1.000000e+00 : f32
    %99 = vector.broadcast %cst_18 : f32 to vector<8x96xf32>
    %100 = arith.addf %99, %98 : vector<8x96xf32>
    %101 = arith.divf %99, %100 : vector<8x96xf32>
    %102 = vector.extract_strided_slice %95 {offsets = [0, 96], sizes = [8, 32], strides = [1, 1]} : vector<8x128xf32> to vector<8x32xf32>
    %103 = math.tanh %102 : vector<8x32xf32>
    %104 = vector.extract_strided_slice %101 {offsets = [0, 32], sizes = [8, 32], strides = [1, 1]} : vector<8x96xf32> to vector<8x32xf32>
    %105 = arith.mulf %104, %88 : vector<8x32xf32>
    %106 = vector.extract_strided_slice %101 {offsets = [0, 0], sizes = [8, 32], strides = [1, 1]} : vector<8x96xf32> to vector<8x32xf32>
    %107 = arith.mulf %106, %103 : vector<8x32xf32>
    %108 = arith.addf %105, %107 : vector<8x32xf32>
    %109 = vector.extract_strided_slice %101 {offsets = [0, 64], sizes = [8, 32], strides = [1, 1]} : vector<8x96xf32> to vector<8x32xf32>
    %110 = math.tanh %108 : vector<8x32xf32>
    %111 = arith.mulf %109, %110 : vector<8x32xf32>
    %112 = vector.extract_strided_slice %9 {offsets = [40, 0], sizes = [8, 128], strides = [1, 1]} : vector<64x128xf32> to vector<8x128xf32>
    %113 = arith.addf %112, %7 : vector<8x128xf32>
    %cst_19 = arith.constant dense<0.000000e+00> : vector<8x128xf32>
    %114 = tpu.matmul %111, %6, %cst_19 {dimension_numbers = #tpu.dot_dimension_numbers<[1], [0], [0], [1], [0, 0, 1, 1], [], []>} : vector<8x32xf32>, vector<32x128xf32>, vector<8x128xf32> -> vector<8x128xf32>
    %115 = arith.addf %113, %114 : vector<8x128xf32>
    %116 = vector.extract_strided_slice %115 {offsets = [0, 0], sizes = [8, 96], strides = [1, 1]} : vector<8x128xf32> to vector<8x96xf32>
    %117 = arith.negf %116 : vector<8x96xf32>
    %118 = math.exp %117 : vector<8x96xf32>
    %cst_20 = arith.constant 1.000000e+00 : f32
    %119 = vector.broadcast %cst_20 : f32 to vector<8x96xf32>
    %120 = arith.addf %119, %118 : vector<8x96xf32>
    %121 = arith.divf %119, %120 : vector<8x96xf32>
    %122 = vector.extract_strided_slice %115 {offsets = [0, 96], sizes = [8, 32], strides = [1, 1]} : vector<8x128xf32> to vector<8x32xf32>
    %123 = math.tanh %122 : vector<8x32xf32>
    %124 = vector.extract_strided_slice %121 {offsets = [0, 32], sizes = [8, 32], strides = [1, 1]} : vector<8x96xf32> to vector<8x32xf32>
    %125 = arith.mulf %124, %108 : vector<8x32xf32>
    %126 = vector.extract_strided_slice %121 {offsets = [0, 0], sizes = [8, 32], strides = [1, 1]} : vector<8x96xf32> to vector<8x32xf32>
    %127 = arith.mulf %126, %123 : vector<8x32xf32>
    %128 = arith.addf %125, %127 : vector<8x32xf32>
    %129 = vector.extract_strided_slice %121 {offsets = [0, 64], sizes = [8, 32], strides = [1, 1]} : vector<8x96xf32> to vector<8x32xf32>
    %130 = math.tanh %128 : vector<8x32xf32>
    %131 = arith.mulf %129, %130 : vector<8x32xf32>
    %132 = vector.extract_strided_slice %9 {offsets = [48, 0], sizes = [8, 128], strides = [1, 1]} : vector<64x128xf32> to vector<8x128xf32>
    %133 = arith.addf %132, %7 : vector<8x128xf32>
    %cst_21 = arith.constant dense<0.000000e+00> : vector<8x128xf32>
    %134 = tpu.matmul %131, %6, %cst_21 {dimension_numbers = #tpu.dot_dimension_numbers<[1], [0], [0], [1], [0, 0, 1, 1], [], []>} : vector<8x32xf32>, vector<32x128xf32>, vector<8x128xf32> -> vector<8x128xf32>
    %135 = arith.addf %133, %134 : vector<8x128xf32>
    %136 = vector.extract_strided_slice %135 {offsets = [0, 0], sizes = [8, 96], strides = [1, 1]} : vector<8x128xf32> to vector<8x96xf32>
    %137 = arith.negf %136 : vector<8x96xf32>
    %138 = math.exp %137 : vector<8x96xf32>
    %cst_22 = arith.constant 1.000000e+00 : f32
    %139 = vector.broadcast %cst_22 : f32 to vector<8x96xf32>
    %140 = arith.addf %139, %138 : vector<8x96xf32>
    %141 = arith.divf %139, %140 : vector<8x96xf32>
    %142 = vector.extract_strided_slice %135 {offsets = [0, 96], sizes = [8, 32], strides = [1, 1]} : vector<8x128xf32> to vector<8x32xf32>
    %143 = math.tanh %142 : vector<8x32xf32>
    %144 = vector.extract_strided_slice %141 {offsets = [0, 32], sizes = [8, 32], strides = [1, 1]} : vector<8x96xf32> to vector<8x32xf32>
    %145 = arith.mulf %144, %128 : vector<8x32xf32>
    %146 = vector.extract_strided_slice %141 {offsets = [0, 0], sizes = [8, 32], strides = [1, 1]} : vector<8x96xf32> to vector<8x32xf32>
    %147 = arith.mulf %146, %143 : vector<8x32xf32>
    %148 = arith.addf %145, %147 : vector<8x32xf32>
    %149 = vector.extract_strided_slice %141 {offsets = [0, 64], sizes = [8, 32], strides = [1, 1]} : vector<8x96xf32> to vector<8x32xf32>
    %150 = math.tanh %148 : vector<8x32xf32>
    %151 = arith.mulf %149, %150 : vector<8x32xf32>
    %152 = vector.extract_strided_slice %9 {offsets = [56, 0], sizes = [8, 128], strides = [1, 1]} : vector<64x128xf32> to vector<8x128xf32>
    %153 = arith.addf %152, %7 : vector<8x128xf32>
    %cst_23 = arith.constant dense<0.000000e+00> : vector<8x128xf32>
    %154 = tpu.matmul %151, %6, %cst_23 {dimension_numbers = #tpu.dot_dimension_numbers<[1], [0], [0], [1], [0, 0, 1, 1], [], []>} : vector<8x32xf32>, vector<32x128xf32>, vector<8x128xf32> -> vector<8x128xf32>
    %155 = arith.addf %153, %154 : vector<8x128xf32>
    %156 = vector.extract_strided_slice %155 {offsets = [0, 0], sizes = [8, 96], strides = [1, 1]} : vector<8x128xf32> to vector<8x96xf32>
    %157 = arith.negf %156 : vector<8x96xf32>
    %158 = math.exp %157 : vector<8x96xf32>
    %cst_24 = arith.constant 1.000000e+00 : f32
    %159 = vector.broadcast %cst_24 : f32 to vector<8x96xf32>
    %160 = arith.addf %159, %158 : vector<8x96xf32>
    %161 = arith.divf %159, %160 : vector<8x96xf32>
    %162 = vector.extract_strided_slice %155 {offsets = [0, 96], sizes = [8, 32], strides = [1, 1]} : vector<8x128xf32> to vector<8x32xf32>
    %163 = math.tanh %162 : vector<8x32xf32>
    %164 = vector.extract_strided_slice %161 {offsets = [0, 32], sizes = [8, 32], strides = [1, 1]} : vector<8x96xf32> to vector<8x32xf32>
    %165 = arith.mulf %164, %148 : vector<8x32xf32>
    %166 = vector.extract_strided_slice %161 {offsets = [0, 0], sizes = [8, 32], strides = [1, 1]} : vector<8x96xf32> to vector<8x32xf32>
    %167 = arith.mulf %166, %163 : vector<8x32xf32>
    %168 = arith.addf %165, %167 : vector<8x32xf32>
    %169 = vector.extract_strided_slice %161 {offsets = [0, 64], sizes = [8, 32], strides = [1, 1]} : vector<8x96xf32> to vector<8x32xf32>
    %170 = math.tanh %168 : vector<8x32xf32>
    %171 = arith.mulf %169, %170 : vector<8x32xf32>
    %172 = tpu.concatenate %31, %51, %71, %91, %111, %131, %151, %171 in 0 : vector<8x32xf32>, vector<8x32xf32>, vector<8x32xf32>, vector<8x32xf32>, vector<8x32xf32>, vector<8x32xf32>, vector<8x32xf32>, vector<8x32xf32> -> vector<64x32xf32>
    %c0_25 = arith.constant 0 : index
    %c0_26 = arith.constant 0 : index
    %173 = vector.load %arg4[%c0_25, %c0_26] : memref<64x32xf32, #tpu.memory_space<vmem>>, vector<64x32xf32>
    tpu.vector_store %arg4[%c0_25, %c0_26], %172 {strides = array<i32>} : memref<64x32xf32, #tpu.memory_space<vmem>>, vector<64x32xf32>,
    %174 = vector.extract_strided_slice %171 {offsets = [0, 0], sizes = [8, 16], strides = [1, 1]} : vector<8x32xf32> to vector<8x16xf32>
    %175 = vector.extract_strided_slice %171 {offsets = [0, 16], sizes = [8, 16], strides = [1, 1]} : vector<8x32xf32> to vector<8x16xf32>
    %176 = tpu.concatenate %1, %171, %3 in 1 : vector<8x32xf32>, vector<8x32xf32>, vector<8x32xf32> -> vector<8x96xf32>
    %c288 = arith.constant 288 : index
    %c0_27 = arith.constant 0 : index
    %177 = vector.load %arg0[%c288, %c0_27] : memref<592x192xf32, #tpu.memory_space<vmem>>, vector<96x64xf32>
    %cst_28 = arith.constant dense<0.000000e+00> : vector<8x64xf32>
    %178 = tpu.matmul %176, %177, %cst_28 {dimension_numbers = #tpu.dot_dimension_numbers<[1], [0], [0], [1], [0, 0, 1, 1], [], []>} : vector<8x96xf32>, vector<96x64xf32>, vector<8x64xf32> -> vector<8x64xf32>
    %c568 = arith.constant 568 : index
    %c0_29 = arith.constant 0 : index
    %179 = vector.load %arg0[%c568, %c0_29] : memref<592x192xf32, #tpu.memory_space<vmem>>, vector<8x64xf32>
    %180 = arith.addf %178, %179 : vector<8x64xf32>
    %181 = vector.extract_strided_slice %180 {offsets = [0, 0], sizes = [8, 16], strides = [1, 1]} : vector<8x64xf32> to vector<8x16xf32>
    %182 = vector.extract_strided_slice %180 {offsets = [0, 16], sizes = [8, 16], strides = [1, 1]} : vector<8x64xf32> to vector<8x16xf32>
    %183 = vector.extract_strided_slice %180 {offsets = [0, 32], sizes = [8, 16], strides = [1, 1]} : vector<8x64xf32> to vector<8x16xf32>
    %184 = vector.extract_strided_slice %180 {offsets = [0, 48], sizes = [8, 16], strides = [1, 1]} : vector<8x64xf32> to vector<8x16xf32>
    %cst_30 = arith.constant dense<0xFF800000> : vector<8xf32>
    %185 = vector.multi_reduction <maximumf>, %181, %cst_30 [1] : vector<8x16xf32> to vector<8xf32>
    %cst_31 = arith.constant 0xFF800000 : f32
    %186 = vector.broadcast %cst_31 : f32 to vector<8xf32>
    %187 = arith.maximumf %186, %185 : vector<8xf32>
    %188 = vector.shape_cast %187 : vector<8xf32> to vector<8x1xf32>
    %189 = vector.broadcast %188 : vector<8x1xf32> to vector<8x16xf32>
    %190 = arith.subf %181, %189 : vector<8x16xf32>
    %191 = math.exp %190 : vector<8x16xf32>
    %cst_32 = arith.constant dense<0.000000e+00> : vector<8xf32>
    %192 = vector.multi_reduction <add>, %191, %cst_32 [1] : vector<8x16xf32> to vector<8xf32>
    %193 = vector.shape_cast %192 : vector<8xf32> to vector<8x1xf32>
    %194 = vector.broadcast %193 : vector<8x1xf32> to vector<8x16xf32>
    %195 = arith.divf %191, %194 : vector<8x16xf32>
    %cst_33 = arith.constant dense<0xFF800000> : vector<8xf32>
    %196 = vector.multi_reduction <maximumf>, %182, %cst_33 [1] : vector<8x16xf32> to vector<8xf32>
    %cst_34 = arith.constant 0xFF800000 : f32
    %197 = vector.broadcast %cst_34 : f32 to vector<8xf32>
    %198 = arith.maximumf %197, %196 : vector<8xf32>
    %199 = vector.shape_cast %198 : vector<8xf32> to vector<8x1xf32>
    %200 = vector.broadcast %199 : vector<8x1xf32> to vector<8x16xf32>
    %201 = arith.subf %182, %200 : vector<8x16xf32>
    %202 = math.exp %201 : vector<8x16xf32>
    %cst_35 = arith.constant dense<0.000000e+00> : vector<8xf32>
    %203 = vector.multi_reduction <add>, %202, %cst_35 [1] : vector<8x16xf32> to vector<8xf32>
    %204 = vector.shape_cast %203 : vector<8xf32> to vector<8x1xf32>
    %205 = vector.broadcast %204 : vector<8x1xf32> to vector<8x16xf32>
    %206 = arith.divf %202, %205 : vector<8x16xf32>
    %207 = vector.extract_strided_slice %183 {offsets = [0, 0], sizes = [8, 8], strides = [1, 1]} : vector<8x16xf32> to vector<8x8xf32>
    %cst_36 = arith.constant dense<0xFF800000> : vector<8xf32>
    %208 = vector.multi_reduction <maximumf>, %207, %cst_36 [1] : vector<8x8xf32> to vector<8xf32>
    %cst_37 = arith.constant 0xFF800000 : f32
    %209 = vector.broadcast %cst_37 : f32 to vector<8xf32>
    %210 = arith.maximumf %209, %208 : vector<8xf32>
    %211 = vector.shape_cast %210 : vector<8xf32> to vector<8x1xf32>
    %212 = vector.broadcast %211 : vector<8x1xf32> to vector<8x8xf32>
    %213 = arith.subf %207, %212 : vector<8x8xf32>
    %214 = math.exp %213 : vector<8x8xf32>
    %cst_38 = arith.constant dense<0.000000e+00> : vector<8xf32>
    %215 = vector.multi_reduction <add>, %214, %cst_38 [1] : vector<8x8xf32> to vector<8xf32>
    %216 = vector.shape_cast %215 : vector<8xf32> to vector<8x1xf32>
    %217 = vector.broadcast %216 : vector<8x1xf32> to vector<8x8xf32>
    %218 = arith.divf %214, %217 : vector<8x8xf32>
    %219 = vector.extract_strided_slice %183 {offsets = [0, 8], sizes = [8, 8], strides = [1, 1]} : vector<8x16xf32> to vector<8x8xf32>
    %cst_39 = arith.constant dense<0xFF800000> : vector<8xf32>
    %220 = vector.multi_reduction <maximumf>, %219, %cst_39 [1] : vector<8x8xf32> to vector<8xf32>
    %cst_40 = arith.constant 0xFF800000 : f32
    %221 = vector.broadcast %cst_40 : f32 to vector<8xf32>
    %222 = arith.maximumf %221, %220 : vector<8xf32>
    %223 = vector.shape_cast %222 : vector<8xf32> to vector<8x1xf32>
    %224 = vector.broadcast %223 : vector<8x1xf32> to vector<8x8xf32>
    %225 = arith.subf %219, %224 : vector<8x8xf32>
    %226 = math.exp %225 : vector<8x8xf32>
    %cst_41 = arith.constant dense<0.000000e+00> : vector<8xf32>
    %227 = vector.multi_reduction <add>, %226, %cst_41 [1] : vector<8x8xf32> to vector<8xf32>
    %228 = vector.shape_cast %227 : vector<8xf32> to vector<8x1xf32>
    %229 = vector.broadcast %228 : vector<8x1xf32> to vector<8x8xf32>
    %230 = arith.divf %226, %229 : vector<8x8xf32>
    %231 = tpu.concatenate %218, %230 in 1 : vector<8x8xf32>, vector<8x8xf32> -> vector<8x16xf32>
    %232 = vector.extract_strided_slice %184 {offsets = [0, 0], sizes = [8, 8], strides = [1, 1]} : vector<8x16xf32> to vector<8x8xf32>
    %cst_42 = arith.constant dense<0xFF800000> : vector<8xf32>
    %233 = vector.multi_reduction <maximumf>, %232, %cst_42 [1] : vector<8x8xf32> to vector<8xf32>
    %cst_43 = arith.constant 0xFF800000 : f32
    %234 = vector.broadcast %cst_43 : f32 to vector<8xf32>
    %235 = arith.maximumf %234, %233 : vector<8xf32>
    %236 = vector.shape_cast %235 : vector<8xf32> to vector<8x1xf32>
    %237 = vector.broadcast %236 : vector<8x1xf32> to vector<8x8xf32>
    %238 = arith.subf %232, %237 : vector<8x8xf32>
    %239 = math.exp %238 : vector<8x8xf32>
    %cst_44 = arith.constant dense<0.000000e+00> : vector<8xf32>
    %240 = vector.multi_reduction <add>, %239, %cst_44 [1] : vector<8x8xf32> to vector<8xf32>
    %241 = vector.shape_cast %240 : vector<8xf32> to vector<8x1xf32>
    %242 = vector.broadcast %241 : vector<8x1xf32> to vector<8x8xf32>
    %243 = arith.divf %239, %242 : vector<8x8xf32>
    %244 = vector.extract_strided_slice %184 {offsets = [0, 8], sizes = [8, 8], strides = [1, 1]} : vector<8x16xf32> to vector<8x8xf32>
    %cst_45 = arith.constant dense<0xFF800000> : vector<8xf32>
    %245 = vector.multi_reduction <maximumf>, %244, %cst_45 [1] : vector<8x8xf32> to vector<8xf32>
    %cst_46 = arith.constant 0xFF800000 : f32
    %246 = vector.broadcast %cst_46 : f32 to vector<8xf32>
    %247 = arith.maximumf %246, %245 : vector<8xf32>
    %248 = vector.shape_cast %247 : vector<8xf32> to vector<8x1xf32>
    %249 = vector.broadcast %248 : vector<8x1xf32> to vector<8x8xf32>
    %250 = arith.subf %244, %249 : vector<8x8xf32>
    %251 = math.exp %250 : vector<8x8xf32>
    %cst_47 = arith.constant dense<0.000000e+00> : vector<8xf32>
    %252 = vector.multi_reduction <add>, %251, %cst_47 [1] : vector<8x8xf32> to vector<8xf32>
    %253 = vector.shape_cast %252 : vector<8xf32> to vector<8x1xf32>
    %254 = vector.broadcast %253 : vector<8x1xf32> to vector<8x8xf32>
    %255 = arith.divf %251, %254 : vector<8x8xf32>
    %256 = tpu.concatenate %243, %255 in 1 : vector<8x8xf32>, vector<8x8xf32> -> vector<8x16xf32>
    %257 = tpu.concatenate %1, %195, %256, %4 in 1 : vector<8x32xf32>, vector<8x16xf32>, vector<8x16xf32>, vector<8x8xf32> -> vector<8x72xf32>
    %c384 = arith.constant 384 : index
    %c0_48 = arith.constant 0 : index
    %258 = vector.load %arg0[%c384, %c0_48] : memref<592x192xf32, #tpu.memory_space<vmem>>, vector<72x80xf32>
    %cst_49 = arith.constant dense<0.000000e+00> : vector<8x80xf32>
    %259 = tpu.matmul %257, %258, %cst_49 {dimension_numbers = #tpu.dot_dimension_numbers<[1], [0], [0], [1], [0, 0, 1, 1], [], []>} : vector<8x72xf32>, vector<72x80xf32>, vector<8x80xf32> -> vector<8x80xf32>
    %c576 = arith.constant 576 : index
    %c0_50 = arith.constant 0 : index
    %260 = vector.load %arg0[%c576, %c0_50] : memref<592x192xf32, #tpu.memory_space<vmem>>, vector<8x80xf32>
    %261 = arith.addf %259, %260 : vector<8x80xf32>
    %262 = vector.extract_strided_slice %261 {offsets = [0, 0], sizes = [8, 64], strides = [1, 1]} : vector<8x80xf32> to vector<8x64xf32>
    %263 = math.tanh %262 : vector<8x64xf32>
    %264 = vector.extract_strided_slice %261 {offsets = [0, 64], sizes = [8, 16], strides = [1, 1]} : vector<8x80xf32> to vector<8x16xf32>
    %265 = tpu.concatenate %264, %256, %174, %1 in 1 : vector<8x16xf32>, vector<8x16xf32>, vector<8x16xf32>, vector<8x32xf32> -> vector<8x80xf32>
    %c456 = arith.constant 456 : index
    %c0_51 = arith.constant 0 : index
    %266 = vector.load %arg0[%c456, %c0_51] : memref<592x192xf32, #tpu.memory_space<vmem>>, vector<80x160xf32>
    %cst_52 = arith.constant dense<0.000000e+00> : vector<8x160xf32>
    %267 = tpu.matmul %265, %266, %cst_52 {dimension_numbers = #tpu.dot_dimension_numbers<[1], [0], [0], [1], [0, 0, 1, 1], [], []>} : vector<8x80xf32>, vector<80x160xf32>, vector<8x160xf32> -> vector<8x160xf32>
    %c584 = arith.constant 584 : index
    %c0_53 = arith.constant 0 : index
    %268 = vector.load %arg0[%c584, %c0_53] : memref<592x192xf32, #tpu.memory_space<vmem>>, vector<8x160xf32>
    %269 = arith.addf %267, %268 : vector<8x160xf32>
    %270 = vector.extract_strided_slice %269 {offsets = [0, 0], sizes = [8, 96], strides = [1, 1]} : vector<8x160xf32> to vector<8x96xf32>
    %271 = arith.negf %270 : vector<8x96xf32>
    %272 = math.exp %271 : vector<8x96xf32>
    %cst_54 = arith.constant 1.000000e+00 : f32
    %273 = vector.broadcast %cst_54 : f32 to vector<8x96xf32>
    %274 = arith.addf %273, %272 : vector<8x96xf32>
    %275 = arith.divf %273, %274 : vector<8x96xf32>
    %276 = vector.extract_strided_slice %269 {offsets = [0, 96], sizes = [8, 32], strides = [1, 1]} : vector<8x160xf32> to vector<8x32xf32>
    %277 = math.tanh %276 : vector<8x32xf32>
    %278 = vector.extract_strided_slice %269 {offsets = [0, 128], sizes = [8, 32], strides = [1, 1]} : vector<8x160xf32> to vector<8x32xf32>
    %279 = math.tanh %278 : vector<8x32xf32>
    %280 = vector.extract_strided_slice %275 {offsets = [0, 32], sizes = [8, 32], strides = [1, 1]} : vector<8x96xf32> to vector<8x32xf32>
    %281 = arith.mulf %280, %2 : vector<8x32xf32>
    %282 = vector.extract_strided_slice %275 {offsets = [0, 0], sizes = [8, 32], strides = [1, 1]} : vector<8x96xf32> to vector<8x32xf32>
    %283 = arith.mulf %282, %277 : vector<8x32xf32>
    %284 = arith.addf %281, %283 : vector<8x32xf32>
    %285 = vector.extract_strided_slice %275 {offsets = [0, 64], sizes = [8, 32], strides = [1, 1]} : vector<8x96xf32> to vector<8x32xf32>
    %286 = math.tanh %284 : vector<8x32xf32>
    %287 = arith.mulf %285, %286 : vector<8x32xf32>
    %c96 = arith.constant 96 : index
    %c0_55 = arith.constant 0 : index
    %288 = vector.load %arg0[%c96, %c0_55] : memref<592x192xf32, #tpu.memory_space<vmem>>, vector<64x192xf32>
    %cst_56 = arith.constant dense<0.000000e+00> : vector<64x192xf32>
    %289 = tpu.matmul %5, %288, %cst_56 {dimension_numbers = #tpu.dot_dimension_numbers<[1], [0], [0], [1], [0, 0, 1, 1], [], []>} : vector<64x64xf32>, vector<64x192xf32>, vector<64x192xf32> -> vector<64x192xf32>
    %c544 = arith.constant 544 : index
    %c0_57 = arith.constant 0 : index
    %290 = vector.load %arg0[%c544, %c0_57] : memref<592x192xf32, #tpu.memory_space<vmem>>, vector<8x192xf32>
    %c160 = arith.constant 160 : index
    %c0_58 = arith.constant 0 : index
    %291 = vector.load %arg0[%c160, %c0_58] : memref<592x192xf32, #tpu.memory_space<vmem>>, vector<64x192xf32>
    %c552 = arith.constant 552 : index
    %c0_59 = arith.constant 0 : index
    %292 = vector.load %arg0[%c552, %c0_59] : memref<592x192xf32, #tpu.memory_space<vmem>>, vector<8x192xf32>
    %293 = vector.extract_strided_slice %289 {offsets = [0, 0], sizes = [8, 192], strides = [1, 1]} : vector<64x192xf32> to vector<8x192xf32>
    %294 = arith.addf %293, %290 : vector<8x192xf32>
    %cst_60 = arith.constant dense<0.000000e+00> : vector<8x192xf32>
    %295 = tpu.matmul %263, %291, %cst_60 {dimension_numbers = #tpu.dot_dimension_numbers<[1], [0], [0], [1], [0, 0, 1, 1], [], []>} : vector<8x64xf32>, vector<64x192xf32>, vector<8x192xf32> -> vector<8x192xf32>
    %296 = arith.addf %295, %292 : vector<8x192xf32>
    %297 = vector.extract_strided_slice %294 {offsets = [0, 0], sizes = [8, 128], strides = [1, 1]} : vector<8x192xf32> to vector<8x128xf32>
    %298 = vector.extract_strided_slice %296 {offsets = [0, 0], sizes = [8, 128], strides = [1, 1]} : vector<8x192xf32> to vector<8x128xf32>
    %299 = arith.addf %297, %298 : vector<8x128xf32>
    %300 = arith.negf %299 : vector<8x128xf32>
    %301 = math.exp %300 : vector<8x128xf32>
    %cst_61 = arith.constant 1.000000e+00 : f32
    %302 = vector.broadcast %cst_61 : f32 to vector<8x128xf32>
    %303 = arith.addf %302, %301 : vector<8x128xf32>
    %304 = arith.divf %302, %303 : vector<8x128xf32>
    %305 = vector.extract_strided_slice %294 {offsets = [0, 128], sizes = [8, 64], strides = [1, 1]} : vector<8x192xf32> to vector<8x64xf32>
    %306 = vector.extract_strided_slice %304 {offsets = [0, 0], sizes = [8, 64], strides = [1, 1]} : vector<8x128xf32> to vector<8x64xf32>
    %307 = vector.extract_strided_slice %296 {offsets = [0, 128], sizes = [8, 64], strides = [1, 1]} : vector<8x192xf32> to vector<8x64xf32>
    %308 = arith.mulf %306, %307 : vector<8x64xf32>
    %309 = arith.addf %305, %308 : vector<8x64xf32>
    %310 = math.tanh %309 : vector<8x64xf32>
    %311 = vector.extract_strided_slice %304 {offsets = [0, 64], sizes = [8, 64], strides = [1, 1]} : vector<8x128xf32> to vector<8x64xf32>
    %cst_62 = arith.constant 1.000000e+00 : f32
    %312 = vector.broadcast %cst_62 : f32 to vector<8x64xf32>
    %313 = arith.subf %312, %311 : vector<8x64xf32>
    %314 = arith.mulf %313, %310 : vector<8x64xf32>
    %315 = arith.mulf %311, %263 : vector<8x64xf32>
    %316 = arith.addf %314, %315 : vector<8x64xf32>
    %317 = vector.extract_strided_slice %289 {offsets = [8, 0], sizes = [8, 192], strides = [1, 1]} : vector<64x192xf32> to vector<8x192xf32>
    %318 = arith.addf %317, %290 : vector<8x192xf32>
    %cst_63 = arith.constant dense<0.000000e+00> : vector<8x192xf32>
    %319 = tpu.matmul %316, %291, %cst_63 {dimension_numbers = #tpu.dot_dimension_numbers<[1], [0], [0], [1], [0, 0, 1, 1], [], []>} : vector<8x64xf32>, vector<64x192xf32>, vector<8x192xf32> -> vector<8x192xf32>
    %320 = arith.addf %319, %292 : vector<8x192xf32>
    %321 = vector.extract_strided_slice %318 {offsets = [0, 0], sizes = [8, 128], strides = [1, 1]} : vector<8x192xf32> to vector<8x128xf32>
    %322 = vector.extract_strided_slice %320 {offsets = [0, 0], sizes = [8, 128], strides = [1, 1]} : vector<8x192xf32> to vector<8x128xf32>
    %323 = arith.addf %321, %322 : vector<8x128xf32>
    %324 = arith.negf %323 : vector<8x128xf32>
    %325 = math.exp %324 : vector<8x128xf32>
    %cst_64 = arith.constant 1.000000e+00 : f32
    %326 = vector.broadcast %cst_64 : f32 to vector<8x128xf32>
    %327 = arith.addf %326, %325 : vector<8x128xf32>
    %328 = arith.divf %326, %327 : vector<8x128xf32>
    %329 = vector.extract_strided_slice %318 {offsets = [0, 128], sizes = [8, 64], strides = [1, 1]} : vector<8x192xf32> to vector<8x64xf32>
    %330 = vector.extract_strided_slice %328 {offsets = [0, 0], sizes = [8, 64], strides = [1, 1]} : vector<8x128xf32> to vector<8x64xf32>
    %331 = vector.extract_strided_slice %320 {offsets = [0, 128], sizes = [8, 64], strides = [1, 1]} : vector<8x192xf32> to vector<8x64xf32>
    %332 = arith.mulf %330, %331 : vector<8x64xf32>
    %333 = arith.addf %329, %332 : vector<8x64xf32>
    %334 = math.tanh %333 : vector<8x64xf32>
    %335 = vector.extract_strided_slice %328 {offsets = [0, 64], sizes = [8, 64], strides = [1, 1]} : vector<8x128xf32> to vector<8x64xf32>
    %cst_65 = arith.constant 1.000000e+00 : f32
    %336 = vector.broadcast %cst_65 : f32 to vector<8x64xf32>
    %337 = arith.subf %336, %335 : vector<8x64xf32>
    %338 = arith.mulf %337, %334 : vector<8x64xf32>
    %339 = arith.mulf %335, %316 : vector<8x64xf32>
    %340 = arith.addf %338, %339 : vector<8x64xf32>
    %341 = vector.extract_strided_slice %289 {offsets = [16, 0], sizes = [8, 192], strides = [1, 1]} : vector<64x192xf32> to vector<8x192xf32>
    %342 = arith.addf %341, %290 : vector<8x192xf32>
    %cst_66 = arith.constant dense<0.000000e+00> : vector<8x192xf32>
    %343 = tpu.matmul %340, %291, %cst_66 {dimension_numbers = #tpu.dot_dimension_numbers<[1], [0], [0], [1], [0, 0, 1, 1], [], []>} : vector<8x64xf32>, vector<64x192xf32>, vector<8x192xf32> -> vector<8x192xf32>
    %344 = arith.addf %343, %292 : vector<8x192xf32>
    %345 = vector.extract_strided_slice %342 {offsets = [0, 0], sizes = [8, 128], strides = [1, 1]} : vector<8x192xf32> to vector<8x128xf32>
    %346 = vector.extract_strided_slice %344 {offsets = [0, 0], sizes = [8, 128], strides = [1, 1]} : vector<8x192xf32> to vector<8x128xf32>
    %347 = arith.addf %345, %346 : vector<8x128xf32>
    %348 = arith.negf %347 : vector<8x128xf32>
    %349 = math.exp %348 : vector<8x128xf32>
    %cst_67 = arith.constant 1.000000e+00 : f32
    %350 = vector.broadcast %cst_67 : f32 to vector<8x128xf32>
    %351 = arith.addf %350, %349 : vector<8x128xf32>
    %352 = arith.divf %350, %351 : vector<8x128xf32>
    %353 = vector.extract_strided_slice %342 {offsets = [0, 128], sizes = [8, 64], strides = [1, 1]} : vector<8x192xf32> to vector<8x64xf32>
    %354 = vector.extract_strided_slice %352 {offsets = [0, 0], sizes = [8, 64], strides = [1, 1]} : vector<8x128xf32> to vector<8x64xf32>
    %355 = vector.extract_strided_slice %344 {offsets = [0, 128], sizes = [8, 64], strides = [1, 1]} : vector<8x192xf32> to vector<8x64xf32>
    %356 = arith.mulf %354, %355 : vector<8x64xf32>
    %357 = arith.addf %353, %356 : vector<8x64xf32>
    %358 = math.tanh %357 : vector<8x64xf32>
    %359 = vector.extract_strided_slice %352 {offsets = [0, 64], sizes = [8, 64], strides = [1, 1]} : vector<8x128xf32> to vector<8x64xf32>
    %cst_68 = arith.constant 1.000000e+00 : f32
    %360 = vector.broadcast %cst_68 : f32 to vector<8x64xf32>
    %361 = arith.subf %360, %359 : vector<8x64xf32>
    %362 = arith.mulf %361, %358 : vector<8x64xf32>
    %363 = arith.mulf %359, %340 : vector<8x64xf32>
    %364 = arith.addf %362, %363 : vector<8x64xf32>
    %365 = vector.extract_strided_slice %289 {offsets = [24, 0], sizes = [8, 192], strides = [1, 1]} : vector<64x192xf32> to vector<8x192xf32>
    %366 = arith.addf %365, %290 : vector<8x192xf32>
    %cst_69 = arith.constant dense<0.000000e+00> : vector<8x192xf32>
    %367 = tpu.matmul %364, %291, %cst_69 {dimension_numbers = #tpu.dot_dimension_numbers<[1], [0], [0], [1], [0, 0, 1, 1], [], []>} : vector<8x64xf32>, vector<64x192xf32>, vector<8x192xf32> -> vector<8x192xf32>
    %368 = arith.addf %367, %292 : vector<8x192xf32>
    %369 = vector.extract_strided_slice %366 {offsets = [0, 0], sizes = [8, 128], strides = [1, 1]} : vector<8x192xf32> to vector<8x128xf32>
    %370 = vector.extract_strided_slice %368 {offsets = [0, 0], sizes = [8, 128], strides = [1, 1]} : vector<8x192xf32> to vector<8x128xf32>
    %371 = arith.addf %369, %370 : vector<8x128xf32>
    %372 = arith.negf %371 : vector<8x128xf32>
    %373 = math.exp %372 : vector<8x128xf32>
    %cst_70 = arith.constant 1.000000e+00 : f32
    %374 = vector.broadcast %cst_70 : f32 to vector<8x128xf32>
    %375 = arith.addf %374, %373 : vector<8x128xf32>
    %376 = arith.divf %374, %375 : vector<8x128xf32>
    %377 = vector.extract_strided_slice %366 {offsets = [0, 128], sizes = [8, 64], strides = [1, 1]} : vector<8x192xf32> to vector<8x64xf32>
    %378 = vector.extract_strided_slice %376 {offsets = [0, 0], sizes = [8, 64], strides = [1, 1]} : vector<8x128xf32> to vector<8x64xf32>
    %379 = vector.extract_strided_slice %368 {offsets = [0, 128], sizes = [8, 64], strides = [1, 1]} : vector<8x192xf32> to vector<8x64xf32>
    %380 = arith.mulf %378, %379 : vector<8x64xf32>
    %381 = arith.addf %377, %380 : vector<8x64xf32>
    %382 = math.tanh %381 : vector<8x64xf32>
    %383 = vector.extract_strided_slice %376 {offsets = [0, 64], sizes = [8, 64], strides = [1, 1]} : vector<8x128xf32> to vector<8x64xf32>
    %cst_71 = arith.constant 1.000000e+00 : f32
    %384 = vector.broadcast %cst_71 : f32 to vector<8x64xf32>
    %385 = arith.subf %384, %383 : vector<8x64xf32>
    %386 = arith.mulf %385, %382 : vector<8x64xf32>
    %387 = arith.mulf %383, %364 : vector<8x64xf32>
    %388 = arith.addf %386, %387 : vector<8x64xf32>
    %389 = vector.extract_strided_slice %289 {offsets = [32, 0], sizes = [8, 192], strides = [1, 1]} : vector<64x192xf32> to vector<8x192xf32>
    %390 = arith.addf %389, %290 : vector<8x192xf32>
    %cst_72 = arith.constant dense<0.000000e+00> : vector<8x192xf32>
    %391 = tpu.matmul %388, %291, %cst_72 {dimension_numbers = #tpu.dot_dimension_numbers<[1], [0], [0], [1], [0, 0, 1, 1], [], []>} : vector<8x64xf32>, vector<64x192xf32>, vector<8x192xf32> -> vector<8x192xf32>
    %392 = arith.addf %391, %292 : vector<8x192xf32>
    %393 = vector.extract_strided_slice %390 {offsets = [0, 0], sizes = [8, 128], strides = [1, 1]} : vector<8x192xf32> to vector<8x128xf32>
    %394 = vector.extract_strided_slice %392 {offsets = [0, 0], sizes = [8, 128], strides = [1, 1]} : vector<8x192xf32> to vector<8x128xf32>
    %395 = arith.addf %393, %394 : vector<8x128xf32>
    %396 = arith.negf %395 : vector<8x128xf32>
    %397 = math.exp %396 : vector<8x128xf32>
    %cst_73 = arith.constant 1.000000e+00 : f32
    %398 = vector.broadcast %cst_73 : f32 to vector<8x128xf32>
    %399 = arith.addf %398, %397 : vector<8x128xf32>
    %400 = arith.divf %398, %399 : vector<8x128xf32>
    %401 = vector.extract_strided_slice %390 {offsets = [0, 128], sizes = [8, 64], strides = [1, 1]} : vector<8x192xf32> to vector<8x64xf32>
    %402 = vector.extract_strided_slice %400 {offsets = [0, 0], sizes = [8, 64], strides = [1, 1]} : vector<8x128xf32> to vector<8x64xf32>
    %403 = vector.extract_strided_slice %392 {offsets = [0, 128], sizes = [8, 64], strides = [1, 1]} : vector<8x192xf32> to vector<8x64xf32>
    %404 = arith.mulf %402, %403 : vector<8x64xf32>
    %405 = arith.addf %401, %404 : vector<8x64xf32>
    %406 = math.tanh %405 : vector<8x64xf32>
    %407 = vector.extract_strided_slice %400 {offsets = [0, 64], sizes = [8, 64], strides = [1, 1]} : vector<8x128xf32> to vector<8x64xf32>
    %cst_74 = arith.constant 1.000000e+00 : f32
    %408 = vector.broadcast %cst_74 : f32 to vector<8x64xf32>
    %409 = arith.subf %408, %407 : vector<8x64xf32>
    %410 = arith.mulf %409, %406 : vector<8x64xf32>
    %411 = arith.mulf %407, %388 : vector<8x64xf32>
    %412 = arith.addf %410, %411 : vector<8x64xf32>
    %413 = vector.extract_strided_slice %289 {offsets = [40, 0], sizes = [8, 192], strides = [1, 1]} : vector<64x192xf32> to vector<8x192xf32>
    %414 = arith.addf %413, %290 : vector<8x192xf32>
    %cst_75 = arith.constant dense<0.000000e+00> : vector<8x192xf32>
    %415 = tpu.matmul %412, %291, %cst_75 {dimension_numbers = #tpu.dot_dimension_numbers<[1], [0], [0], [1], [0, 0, 1, 1], [], []>} : vector<8x64xf32>, vector<64x192xf32>, vector<8x192xf32> -> vector<8x192xf32>
    %416 = arith.addf %415, %292 : vector<8x192xf32>
    %417 = vector.extract_strided_slice %414 {offsets = [0, 0], sizes = [8, 128], strides = [1, 1]} : vector<8x192xf32> to vector<8x128xf32>
    %418 = vector.extract_strided_slice %416 {offsets = [0, 0], sizes = [8, 128], strides = [1, 1]} : vector<8x192xf32> to vector<8x128xf32>
    %419 = arith.addf %417, %418 : vector<8x128xf32>
    %420 = arith.negf %419 : vector<8x128xf32>
    %421 = math.exp %420 : vector<8x128xf32>
    %cst_76 = arith.constant 1.000000e+00 : f32
    %422 = vector.broadcast %cst_76 : f32 to vector<8x128xf32>
    %423 = arith.addf %422, %421 : vector<8x128xf32>
    %424 = arith.divf %422, %423 : vector<8x128xf32>
    %425 = vector.extract_strided_slice %414 {offsets = [0, 128], sizes = [8, 64], strides = [1, 1]} : vector<8x192xf32> to vector<8x64xf32>
    %426 = vector.extract_strided_slice %424 {offsets = [0, 0], sizes = [8, 64], strides = [1, 1]} : vector<8x128xf32> to vector<8x64xf32>
    %427 = vector.extract_strided_slice %416 {offsets = [0, 128], sizes = [8, 64], strides = [1, 1]} : vector<8x192xf32> to vector<8x64xf32>
    %428 = arith.mulf %426, %427 : vector<8x64xf32>
    %429 = arith.addf %425, %428 : vector<8x64xf32>
    %430 = math.tanh %429 : vector<8x64xf32>
    %431 = vector.extract_strided_slice %424 {offsets = [0, 64], sizes = [8, 64], strides = [1, 1]} : vector<8x128xf32> to vector<8x64xf32>
    %cst_77 = arith.constant 1.000000e+00 : f32
    %432 = vector.broadcast %cst_77 : f32 to vector<8x64xf32>
    %433 = arith.subf %432, %431 : vector<8x64xf32>
    %434 = arith.mulf %433, %430 : vector<8x64xf32>
    %435 = arith.mulf %431, %412 : vector<8x64xf32>
    %436 = arith.addf %434, %435 : vector<8x64xf32>
    %437 = vector.extract_strided_slice %289 {offsets = [48, 0], sizes = [8, 192], strides = [1, 1]} : vector<64x192xf32> to vector<8x192xf32>
    %438 = arith.addf %437, %290 : vector<8x192xf32>
    %cst_78 = arith.constant dense<0.000000e+00> : vector<8x192xf32>
    %439 = tpu.matmul %436, %291, %cst_78 {dimension_numbers = #tpu.dot_dimension_numbers<[1], [0], [0], [1], [0, 0, 1, 1], [], []>} : vector<8x64xf32>, vector<64x192xf32>, vector<8x192xf32> -> vector<8x192xf32>
    %440 = arith.addf %439, %292 : vector<8x192xf32>
    %441 = vector.extract_strided_slice %438 {offsets = [0, 0], sizes = [8, 128], strides = [1, 1]} : vector<8x192xf32> to vector<8x128xf32>
    %442 = vector.extract_strided_slice %440 {offsets = [0, 0], sizes = [8, 128], strides = [1, 1]} : vector<8x192xf32> to vector<8x128xf32>
    %443 = arith.addf %441, %442 : vector<8x128xf32>
    %444 = arith.negf %443 : vector<8x128xf32>
    %445 = math.exp %444 : vector<8x128xf32>
    %cst_79 = arith.constant 1.000000e+00 : f32
    %446 = vector.broadcast %cst_79 : f32 to vector<8x128xf32>
    %447 = arith.addf %446, %445 : vector<8x128xf32>
    %448 = arith.divf %446, %447 : vector<8x128xf32>
    %449 = vector.extract_strided_slice %438 {offsets = [0, 128], sizes = [8, 64], strides = [1, 1]} : vector<8x192xf32> to vector<8x64xf32>
    %450 = vector.extract_strided_slice %448 {offsets = [0, 0], sizes = [8, 64], strides = [1, 1]} : vector<8x128xf32> to vector<8x64xf32>
    %451 = vector.extract_strided_slice %440 {offsets = [0, 128], sizes = [8, 64], strides = [1, 1]} : vector<8x192xf32> to vector<8x64xf32>
    %452 = arith.mulf %450, %451 : vector<8x64xf32>
    %453 = arith.addf %449, %452 : vector<8x64xf32>
    %454 = math.tanh %453 : vector<8x64xf32>
    %455 = vector.extract_strided_slice %448 {offsets = [0, 64], sizes = [8, 64], strides = [1, 1]} : vector<8x128xf32> to vector<8x64xf32>
    %cst_80 = arith.constant 1.000000e+00 : f32
    %456 = vector.broadcast %cst_80 : f32 to vector<8x64xf32>
    %457 = arith.subf %456, %455 : vector<8x64xf32>
    %458 = arith.mulf %457, %454 : vector<8x64xf32>
    %459 = arith.mulf %455, %436 : vector<8x64xf32>
    %460 = arith.addf %458, %459 : vector<8x64xf32>
    %461 = vector.extract_strided_slice %289 {offsets = [56, 0], sizes = [8, 192], strides = [1, 1]} : vector<64x192xf32> to vector<8x192xf32>
    %462 = arith.addf %461, %290 : vector<8x192xf32>
    %cst_81 = arith.constant dense<0.000000e+00> : vector<8x192xf32>
    %463 = tpu.matmul %460, %291, %cst_81 {dimension_numbers = #tpu.dot_dimension_numbers<[1], [0], [0], [1], [0, 0, 1, 1], [], []>} : vector<8x64xf32>, vector<64x192xf32>, vector<8x192xf32> -> vector<8x192xf32>
    %464 = arith.addf %463, %292 : vector<8x192xf32>
    %465 = vector.extract_strided_slice %462 {offsets = [0, 0], sizes = [8, 128], strides = [1, 1]} : vector<8x192xf32> to vector<8x128xf32>
    %466 = vector.extract_strided_slice %464 {offsets = [0, 0], sizes = [8, 128], strides = [1, 1]} : vector<8x192xf32> to vector<8x128xf32>
    %467 = arith.addf %465, %466 : vector<8x128xf32>
    %468 = arith.negf %467 : vector<8x128xf32>
    %469 = math.exp %468 : vector<8x128xf32>
    %cst_82 = arith.constant 1.000000e+00 : f32
    %470 = vector.broadcast %cst_82 : f32 to vector<8x128xf32>
    %471 = arith.addf %470, %469 : vector<8x128xf32>
    %472 = arith.divf %470, %471 : vector<8x128xf32>
    %473 = vector.extract_strided_slice %462 {offsets = [0, 128], sizes = [8, 64], strides = [1, 1]} : vector<8x192xf32> to vector<8x64xf32>
    %474 = vector.extract_strided_slice %472 {offsets = [0, 0], sizes = [8, 64], strides = [1, 1]} : vector<8x128xf32> to vector<8x64xf32>
    %475 = vector.extract_strided_slice %464 {offsets = [0, 128], sizes = [8, 64], strides = [1, 1]} : vector<8x192xf32> to vector<8x64xf32>
    %476 = arith.mulf %474, %475 : vector<8x64xf32>
    %477 = arith.addf %473, %476 : vector<8x64xf32>
    %478 = math.tanh %477 : vector<8x64xf32>
    %479 = vector.extract_strided_slice %472 {offsets = [0, 64], sizes = [8, 64], strides = [1, 1]} : vector<8x128xf32> to vector<8x64xf32>
    %cst_83 = arith.constant 1.000000e+00 : f32
    %480 = vector.broadcast %cst_83 : f32 to vector<8x64xf32>
    %481 = arith.subf %480, %479 : vector<8x64xf32>
    %482 = arith.mulf %481, %478 : vector<8x64xf32>
    %483 = arith.mulf %479, %460 : vector<8x64xf32>
    %484 = arith.addf %482, %483 : vector<8x64xf32>
    %485 = tpu.concatenate %316, %340, %364, %388, %412, %436, %460, %484 in 0 : vector<8x64xf32>, vector<8x64xf32>, vector<8x64xf32>, vector<8x64xf32>, vector<8x64xf32>, vector<8x64xf32>, vector<8x64xf32>, vector<8x64xf32> -> vector<64x64xf32>
    %c224 = arith.constant 224 : index
    %c0_84 = arith.constant 0 : index
    %486 = vector.load %arg0[%c224, %c0_84] : memref<592x192xf32, #tpu.memory_space<vmem>>, vector<64x128xf32>
    %cst_85 = arith.constant dense<0.000000e+00> : vector<64x128xf32>
    %487 = tpu.matmul %485, %486, %cst_85 {dimension_numbers = #tpu.dot_dimension_numbers<[1], [0], [0], [1], [0, 0, 1, 1], [], []>} : vector<64x64xf32>, vector<64x128xf32>, vector<64x128xf32> -> vector<64x128xf32>
    %c560 = arith.constant 560 : index
    %c0_86 = arith.constant 0 : index
    %488 = vector.load %arg0[%c560, %c0_86] : memref<592x192xf32, #tpu.memory_space<vmem>>, vector<1x128xf32>
    %489 = vector.broadcast %488 : vector<1x128xf32> to vector<64x128xf32>
    %490 = arith.addf %487, %489 : vector<64x128xf32>
    %c0_87 = arith.constant 0 : index
    %c0_88 = arith.constant 0 : index
    %491 = vector.load %arg3[%c0_87, %c0_88] : memref<64x128xf32, #tpu.memory_space<vmem>>, vector<64x128xf32>
    tpu.vector_store %arg3[%c0_87, %c0_88], %490 {strides = array<i32>} : memref<64x128xf32, #tpu.memory_space<vmem>>, vector<64x128xf32>,
    %492 = tpu.concatenate %181, %182, %195, %206, %183, %184, %231, %256, %174, %175, %279, %287, %284 in 1 : vector<8x16xf32>, vector<8x16xf32>, vector<8x16xf32>, vector<8x16xf32>, vector<8x16xf32>, vector<8x16xf32>, vector<8x16xf32>, vector<8x16xf32>, vector<8x16xf32>, vector<8x16xf32>, vector<8x32xf32>, vector<8x32xf32>, vector<8x32xf32> -> vector<8x256xf32>
    %c0_89 = arith.constant 0 : index
    %c0_90 = arith.constant 0 : index
    %493 = vector.load %arg5[%c0_89, %c0_90] : memref<8x256xf32, #tpu.memory_space<vmem>>, vector<8x256xf32>
    tpu.vector_store %arg5[%c0_89, %c0_90], %492 {strides = array<i32>} : memref<8x256xf32, #tpu.memory_space<vmem>>, vector<8x256xf32>,
    return
  }
}

</mosaic_0001>

<bundles_post_ra>
// kernel: vae_cell_forward.1
= control target key start
LH: loop header
LB: loop body
LE: loop exit
PB: predicated region body
PF: predicated region fallthrough
CT: control target
= control target key end

     0   :  { %v2127_v11 = vmov 0.0   ;;  %vm39_vm0 = vcmask 523264   ;;  %s2128_s21 = smov 32   ;;  %s2129_s22 = smov 64   ;;  %vm106_vm5 = vcmask 261120   ;;  %s3155_s0 = inlined_call_operand.vmem [shape: f32[592,192], index: 0, kind: input, shape index: {}]   ;;  %s3156_s1 = inlined_call_operand.vmem [shape: f32[64,64], index: 1, kind: input, shape index: {}]   ;;  %s3157_s4 = inlined_call_operand.vmem [shape: f32[64,32], index: 4, kind: output, shape index: {1}]   ;;  %s3158_s2 = inlined_call_operand.vmem [shape: f32[8,128], index: 2, kind: input, shape index: {}]   ;;  %s3159_s3 = inlined_call_operand.vmem [shape: f32[64,128], index: 3, kind: output, shape index: {0}]   ;;  %s3160_s5 = inlined_call_operand.vmem [shape: f32[8,256], index: 5, kind: output, shape index: {2}]  }
   0x1   :  { %v38_v0 = vld [vmem:[%s3155_s0 + $0x70] sm:$0xff]  ;;  %v37_v1 = vld [vmem:[%s3155_s0 + $0x60] sm:$0xff]  ;;  %v2252_v41 = vld [vmem:[%s3156_s1 + $0x8] sm:$0xff]  ;;  %s2130_s29 = smov 96   ;;  %s2131_s9 = smov 80  }
   0x2   :  { %72 = vmatpush.msra.mxu0 %v38_v0  ;;  %v36_v2 = vld [vmem:[%s3155_s0 + $0x50] sm:$0xff]  ;;  %v2184_v4 = vld [vmem:[%s3155_s0 + $0xa0] sm:$0xff]  ;;  %s2132_s10 = smov 72   ;;  %s2133_s11 = smov 48  }
   0x3   :  { %v2179_v3 = vld [vmem:[%s3155_s0 + $0xb0] sm:$0xff]  ;;  %v35_v5 = vld [vmem:[%s3155_s0 + $0x40] sm:$0xff]  ;;  %s2134_s12 = smov 16   ;;  %s2135_s7 = smov 88  }
   0x4   :  { %73 = vmatpush.msra.mxu0 %v37_v1  ;;  %122 = vmatpush.msra.mxu1 %v2179_v3  ;;  %v2193_v6 = vld [vmem:[%s3155_s0 + $0x90] sm:$0xff]  ;;  %v2204_v8 = vld [vmem:[%s3155_s0 + $0x80] sm:$0xff] }
   0x5   :  { %186 = vmatpush.msra.mxu2 %v2179_v3  ;;  %442 = vmatpush.msra.mxu3 %v2179_v3  ;;  %v34_v7 = vld [vmem:[%s3155_s0 + $0x30] sm:$0xff]  ;;  %v33_v9 = vld [vmem:[%s3155_s0 + $0x20] sm:$0xff] }
   0x6   :  { %74 = vmatpush.msra.mxu0 %v36_v2  ;;  %123 = vmatpush.msra.mxu1 %v2184_v4  ;;  %v32_v10 = vld [vmem:[%s3155_s0 + $0x10] sm:$0xff]  ;;  %v31_v12 = vld [vmem:[%s3155_s0] sm:$0xff] }
   0x7   :  { %187 = vmatpush.msra.mxu2 %v2184_v4  ;;  %443 = vmatpush.msra.mxu3 %v2184_v4  ;;  %v18_v13 = vld [vmem:[%s3156_s1] sm:$0xff]  ;;  %v2242_v14 = vld [vmem:[%s3155_s0 + $0x430] sm:$0xff] }
   0x8   :  { %75 = vmatpush.msra.mxu0 %v35_v5  ;;  %124 = vmatpush.msra.mxu1 %v2193_v6 }
   0x9   :  { %188 = vmatpush.msra.mxu2 %v2193_v6  ;;  %444 = vmatpush.msra.mxu3 %v2193_v6 }
   0xa   :  { %76 = vmatpush.msra.mxu0 %v34_v7  ;;  %125 = vmatpush.msra.mxu1 %v2204_v8 }
   0xb   :  { %126 = vmatmul.f32.vlgmr.msra.gmra.mxu1 %v2127_v11  ;;  %189 = vmatpush.msra.mxu2 %v2204_v8 }
   0xc   :  { %77 = vmatpush.msra.mxu0 %v33_v9  ;;  %314 = vmatpush.msrb.mxu1 %v2179_v3  ;;  %v2273_v9 = vld [vmem:[%s3156_s1 + $0x10] sm:$0xff] }
   0xd   :  { %250 = vmatpush.msrb.mxu2 %v2179_v3  ;;  %445 = vmatpush.msra.mxu3 %v2204_v8 }
   0xe   :  { %78 = vmatpush.msra.mxu0 %v32_v10  ;;  %315 = vmatpush.msrb.mxu1 %v2184_v4 }
   0xf   :  { %251 = vmatpush.msrb.mxu2 %v2184_v4 }
  0x10   :  { %79 = vmatpush.msra.mxu0 %v31_v12  ;;  %316 = vmatpush.msrb.mxu1 %v2193_v6 }
  0x11   :  { %252 = vmatpush.msrb.mxu2 %v2193_v6  ;;  %1887 = vmatmul.msk.f32.vlgmr.msra.gmra.mxu0 %vm39_vm0, %v18_v13 }
  0x12   :  { %317 = vmatpush.msrb.mxu1 %v2204_v8 }
  0x13   :  { %253 = vmatpush.msrb.mxu2 %v2204_v8 }
  0x14   :  { %506 = vmatpush.msra.mxu1 %v2179_v3 }
  0x16   :  { %507 = vmatpush.msra.mxu1 %v2184_v4 }
  0x18   :  { %508 = vmatpush.msra.mxu1 %v2193_v6 }
  0x19   :  { %1888 = vmatmul.msk.f32.gmra.mxu0 %vm39_vm0, %v2252_v41 }
  0x1a   :  { %509 = vmatpush.msra.mxu1 %v2204_v8 }
  0x21   :  { %1889 = vmatmul.msk.f32.gmra.mxu0 %vm39_vm0, %v2273_v9 }
  0x88   :  { %v127_v16 = vpop.f32.mrf.mxu1 }
  0x8e   :  { %v81_v15 = vpop.f32.mrf.mxu0 }
  0x8f   :  { %v105_v17 = vadd.f32 %v81_v15, %v2242_v14 }
  0x91   :  { %v130_v18 = vadd.f32 %v127_v16, %v105_v17 }
  0x93   :  { %1973 = vtanh.f32 %v130_v18  ;;  %v1895_v20 = vmul.f32 -1.442695, %v130_v18 }
  0x95   :  { %1975 = vpow2.f32 %v1895_v20 }
  0x96   :  { %v84_v43 = vpop.f32.mrf.mxu0 }
  0x97   :  { %v168_v44 = vadd.f32 %v84_v43, %v2242_v14 }
  0x99   :  { %v1974_v19 = vpop.eup %1973 }
  0x9a   :  { %153 = vrot.lane.b32.xlu0 %v1974_v19, %s2128_s21 }
  0x9b   :  { %v1976_v21 = vpop.eup %1975 }
  0x9c   :  { %v134_v22 = vadd.f32 1.0, %v1976_v21 }
  0x9e   :  { %1977 = vrcp.f32 %v134_v22  ;;  %v146_v28 = vand.u32 2147483648, %v134_v22  ;;  %vm140_vm2 = vweird.f32 %v134_v22  ;;  %v144_v29 = vand.u32 2147483647, %v134_v22  ;;  %v87_v11 = vpop.f32.mrf.mxu0 }
  0x9f   :  { %v232_v12 = vadd.f32 %v87_v11, %v2242_v14 }
  0xa0   :  { %v147_v31 = vor.u32 1.1754944e-38, %v146_v28  ;;  %vm145_vm4 = vcmp.eq.f32.partialorder %v144_v29, 8.507059e+37 }
  0xa4   :  { %v1978_v23 = vpop.eup %1977 }
  0xa5   :  { %v136_v24 = vmul.f32 %v1978_v23, %v134_v22  ;;  %vm141_vm1 = vweird.f32 %v1978_v23 }
  0xa6   :  { %vm142_vm3 = vmor %vm140_vm2, %vm141_vm1 }
  0xa7   :  { %v137_v25 = vsub.f32 1.0, %v136_v24 }
  0xa9   :  { %v138_v26 = vmul.f32 %v1978_v23, %v137_v25 }
  0xab   :  { %v139_v27 = vadd.f32 %v1978_v23, %v138_v26 }
  0xad   :  { %v143_v30 = vsel %vm142_vm3, %v1978_v23, %v139_v27 }
  0xae   :  { %v148_v33 = vsel %vm145_vm4, %v147_v31, %v143_v30 }
  0xaf   :  { %v151_v35 = vmul.f32 0.0, %v148_v33 }
 0x10c   :  { %v154_v32 = vpop.permute.xlu0 %153 }
 0x10d   :  { %v156_v34 = vmul.f32 %v154_v32, %v148_v33  ;;  %v2293_v32 = vld [vmem:[%s3156_s1 + $0x18] sm:$0xff] }
 0x10e   :  { %1890 = vmatmul.msk.f32.gmra.mxu0 %vm39_vm0, %v2293_v32 }
 0x10f   :  { %158 = vrot.lane.b32.xlu0 %v156_v34, %s2128_s21 }
 0x181   :  { %v159_v36 = vpop.permute.xlu0 %158 }
 0x182   :  { %v161_v37 = vadd.f32 %v159_v36, %v151_v35 }
 0x184   :  { %1979 = vtanh.f32 %v161_v37 }
 0x18a   :  { %v1980_v38 = vpop.eup %1979 }
 0x18b   :  { %164 = vrot.lane.b32.xlu1 %v1980_v38, %s2128_s21  ;;  %v90_v36 = vpop.f32.mrf.mxu0 }
 0x1fd   :  { %v165_v39 = vpop.permute.xlu1 %164 }
 0x1fe   :  { %v167_v40 = vmul.f32 %v165_v39, %v148_v33 }
 0x200   :  { %170 = vrot.lane.b32.xlu1 %v167_v40, %s2129_s22 }
 0x272   :  { %v171_v42 = vpop.permute.xlu1 %170 }
 0x273   :  { %627 = vst.msk [vmem:[%s3157_s4] sm:$0xff] %vm106_vm5, %v171_v42  ;;  %1896 = vmatmul.msk.f32.vlgmr.msra.gmra.mxu2 %vm106_vm5, %v171_v42 }
 0x274   :  { %378 = vmatpush.msra.mxu2 %v2179_v3 }
 0x276   :  { %379 = vmatpush.msra.mxu2 %v2184_v4 }
 0x278   :  { %380 = vmatpush.msra.mxu2 %v2193_v6 }
 0x27a   :  { %381 = vmatpush.msra.mxu2 %v2204_v8 }
 0x2f6   :  { %v191_v45 = vpop.f32.mrf.mxu2 }
 0x2f7   :  { %v194_v46 = vadd.f32 %v191_v45, %v168_v44 }
 0x2f9   :  { %1981 = vtanh.f32 %v194_v46  ;;  %v1897_v48 = vmul.f32 -1.442695, %v194_v46 }
 0x2fb   :  { %1983 = vpow2.f32 %v1897_v48 }
 0x2ff   :  { %v1982_v47 = vpop.eup %1981 }
 0x300   :  { %217 = vrot.lane.b32.xlu2 %v1982_v47, %s2128_s21 }
 0x301   :  { %v1984_v49 = vpop.eup %1983 }
 0x302   :  { %v198_v50 = vadd.f32 1.0, %v1984_v49 }
 0x304   :  { %1985 = vrcp.f32 %v198_v50  ;;  %v210_v56 = vand.u32 2147483648, %v198_v50  ;;  %vm204_vm7 = vweird.f32 %v198_v50  ;;  %v208_v57 = vand.u32 2147483647, %v198_v50 }
 0x306   :  { %v211_v59 = vor.u32 1.1754944e-38, %v210_v56  ;;  %vm209_vm9 = vcmp.eq.f32.partialorder %v208_v57, 8.507059e+37 }
 0x30a   :  { %v1986_v51 = vpop.eup %1985 }
 0x30b   :  { %v200_v52 = vmul.f32 %v1986_v51, %v198_v50  ;;  %vm205_vm6 = vweird.f32 %v1986_v51 }
 0x30c   :  { %vm206_vm8 = vmor %vm204_vm7, %vm205_vm6 }
 0x30d   :  { %v201_v53 = vsub.f32 1.0, %v200_v52 }
 0x30f   :  { %v202_v54 = vmul.f32 %v1986_v51, %v201_v53 }
 0x311   :  { %v203_v55 = vadd.f32 %v1986_v51, %v202_v54 }
 0x313   :  { %v207_v58 = vsel %vm206_vm8, %v1986_v51, %v203_v55 }
 0x314   :  { %v212_v61 = vsel %vm209_vm9, %v211_v59, %v207_v58 }
 0x315   :  { %v215_v63 = vmul.f32 %v212_v61, %v161_v37  ;;  %v296_v37 = vadd.f32 %v90_v36, %v2242_v14 }
 0x35a   :  { %v218_v60 = vpop.permute.xlu2 %217 }
 0x35b   :  { %v220_v62 = vmul.f32 %v218_v60, %v212_v61 }
 0x35d   :  { %222 = vrot.lane.b32.xlu2 %v220_v62, %s2128_s21 }
 0x3b7   :  { %v223_v0 = vpop.permute.xlu2 %222 }
 0x3b8   :  { %v225_v1 = vadd.f32 %v223_v0, %v215_v63  ;;  %v2311_v63 = vld [vmem:[%s3156_s1 + $0x20] sm:$0xff] }
 0x3b9   :  { %1891 = vmatmul.msk.f32.gmra.mxu0 %vm39_vm0, %v2311_v63 }
 0x3ba   :  { %1987 = vtanh.f32 %v225_v1 }
 0x3c0   :  { %v1988_v2 = vpop.eup %1987 }
 0x3c1   :  { %228 = vrot.lane.b32.xlu0 %v1988_v2, %s2128_s21 }
 0x433   :  { %v229_v5 = vpop.permute.xlu0 %228 }
 0x434   :  { %v231_v7 = vmul.f32 %v229_v5, %v212_v61 }
 0x436   :  { %234 = vrot.lane.b32.xlu1 %v231_v7, %s2129_s22 }
 0x4a8   :  { %v235_v10 = vpop.permute.xlu1 %234 }
 0x4a9   :  { %628 = vst.msk [vmem:[%s3157_s4 + $0x8] sm:$0xff] %vm106_vm5, %v235_v10  ;;  %1898 = vmatmul.msk.f32.vlgmr.msrb.gmra.mxu2 %vm106_vm5, %v235_v10 }
 0x4aa   :  { %570 = vmatpush.msrb.mxu2 %v2179_v3 }
 0x4ac   :  { %571 = vmatpush.msrb.mxu2 %v2184_v4 }
 0x4ae   :  { %572 = vmatpush.msrb.mxu2 %v2193_v6 }
 0x4b0   :  { %573 = vmatpush.msrb.mxu2 %v2204_v8 }
 0x52c   :  { %v255_v13 = vpop.f32.mrf.mxu2 }
 0x52d   :  { %v258_v15 = vadd.f32 %v255_v13, %v232_v12 }
 0x52f   :  { %1989 = vtanh.f32 %v258_v15  ;;  %v1899_v17 = vmul.f32 -1.442695, %v258_v15 }
 0x531   :  { %1991 = vpow2.f32 %v1899_v17 }
 0x535   :  { %v1990_v16 = vpop.eup %1989 }
 0x536   :  { %281 = vrot.lane.b32.xlu2 %v1990_v16, %s2128_s21 }
 0x537   :  { %v1992_v18 = vpop.eup %1991 }
 0x538   :  { %v262_v19 = vadd.f32 1.0, %v1992_v18 }
 0x53a   :  { %1993 = vrcp.f32 %v262_v19  ;;  %v274_v8 = vand.u32 2147483648, %v262_v19  ;;  %vm268_vm11 = vweird.f32 %v262_v19  ;;  %v272_v22 = vand.u32 2147483647, %v262_v19 }
 0x53c   :  { %v275_v24 = vor.u32 1.1754944e-38, %v274_v8  ;;  %vm273_vm13 = vcmp.eq.f32.partialorder %v272_v22, 8.507059e+37 }
 0x540   :  { %v1994_v3 = vpop.eup %1993 }
 0x541   :  { %v264_v4 = vmul.f32 %v1994_v3, %v262_v19  ;;  %vm269_vm10 = vweird.f32 %v1994_v3 }
 0x542   :  { %vm270_vm12 = vmor %vm268_vm11, %vm269_vm10 }
 0x543   :  { %v265_v20 = vsub.f32 1.0, %v264_v4 }
 0x545   :  { %v266_v6 = vmul.f32 %v1994_v3, %v265_v20 }
 0x547   :  { %v267_v21 = vadd.f32 %v1994_v3, %v266_v6 }
 0x549   :  { %v271_v23 = vsel %vm270_vm12, %v1994_v3, %v267_v21 }
 0x54a   :  { %v276_v26 = vsel %vm273_vm13, %v275_v24, %v271_v23 }
 0x54b   :  { %v279_v28 = vmul.f32 %v276_v26, %v225_v1  ;;  %v93_v1 = vpop.f32.mrf.mxu0 }
 0x54c   :  { %v360_v2 = vadd.f32 %v93_v1, %v2242_v14 }
 0x590   :  { %v282_v25 = vpop.permute.xlu2 %281 }
 0x591   :  { %v284_v27 = vmul.f32 %v282_v25, %v276_v26 }
 0x593   :  { %286 = vrot.lane.b32.xlu0 %v284_v27, %s2128_s21 }
 0x605   :  { %v287_v29 = vpop.permute.xlu0 %286 }
 0x606   :  { %v289_v30 = vadd.f32 %v287_v29, %v279_v28  ;;  %v2328_v29 = vld [vmem:[%s3156_s1 + $0x28] sm:$0xff] }
 0x607   :  { %1892 = vmatmul.msk.f32.gmra.mxu0 %vm39_vm0, %v2328_v29 }
 0x608   :  { %1995 = vtanh.f32 %v289_v30 }
 0x60e   :  { %v1996_v31 = vpop.eup %1995 }
 0x60f   :  { %292 = vrot.lane.b32.xlu1 %v1996_v31, %s2128_s21 }
 0x681   :  { %v293_v33 = vpop.permute.xlu1 %292 }
 0x682   :  { %v295_v34 = vmul.f32 %v293_v33, %v276_v26 }
 0x684   :  { %298 = vrot.lane.b32.xlu2 %v295_v34, %s2129_s22  ;;  %v96_v31 = vpop.f32.mrf.mxu0 }
 0x685   :  { %v424_v33 = vadd.f32 %v96_v31, %v2242_v14 }
 0x6de   :  { %v299_v35 = vpop.permute.xlu2 %298 }
 0x6df   :  { %629 = vst.msk [vmem:[%s3157_s4 + $0x10] sm:$0xff] %vm106_vm5, %v299_v35  ;;  %1900 = vmatmul.msk.f32.vlgmr.msrb.gmra.mxu1 %vm106_vm5, %v299_v35 }
 0x75c   :  { %v319_v38 = vpop.f32.mrf.mxu1 }
 0x75d   :  { %v322_v39 = vadd.f32 %v319_v38, %v296_v37 }
 0x75f   :  { %1997 = vtanh.f32 %v322_v39  ;;  %v1901_v42 = vmul.f32 -1.442695, %v322_v39 }
 0x761   :  { %1999 = vpow2.f32 %v1901_v42 }
 0x765   :  { %v1998_v40 = vpop.eup %1997 }
 0x766   :  { %345 = vrot.lane.b32.xlu0 %v1998_v40, %s2128_s21 }
 0x767   :  { %v2000_v43 = vpop.eup %1999 }
 0x768   :  { %v326_v44 = vadd.f32 1.0, %v2000_v43 }
 0x76a   :  { %2001 = vrcp.f32 %v326_v44  ;;  %v338_v50 = vand.u32 2147483648, %v326_v44  ;;  %vm332_vm15 = vweird.f32 %v326_v44  ;;  %v336_v51 = vand.u32 2147483647, %v326_v44 }
 0x76c   :  { %v339_v53 = vor.u32 1.1754944e-38, %v338_v50  ;;  %vm337_vm2 = vcmp.eq.f32.partialorder %v336_v51, 8.507059e+37 }
 0x770   :  { %v2002_v45 = vpop.eup %2001 }
 0x771   :  { %v328_v46 = vmul.f32 %v2002_v45, %v326_v44  ;;  %vm333_vm14 = vweird.f32 %v2002_v45 }
 0x772   :  { %vm334_vm1 = vmor %vm332_vm15, %vm333_vm14 }
 0x773   :  { %v329_v47 = vsub.f32 1.0, %v328_v46 }
 0x775   :  { %v330_v48 = vmul.f32 %v2002_v45, %v329_v47 }
 0x777   :  { %v331_v49 = vadd.f32 %v2002_v45, %v330_v48 }
 0x779   :  { %v335_v52 = vsel %vm334_vm1, %v2002_v45, %v331_v49 }
 0x77a   :  { %v340_v55 = vsel %vm337_vm2, %v339_v53, %v335_v52 }
 0x77b   :  { %v343_v57 = vmul.f32 %v340_v55, %v289_v30 }
 0x7d8   :  { %v346_v54 = vpop.permute.xlu0 %345 }
 0x7d9   :  { %v348_v56 = vmul.f32 %v346_v54, %v340_v55 }
 0x7db   :  { %350 = vrot.lane.b32.xlu1 %v348_v56, %s2128_s21 }
 0x84d   :  { %v351_v58 = vpop.permute.xlu1 %350 }
 0x84e   :  { %v353_v59 = vadd.f32 %v351_v58, %v343_v57  ;;  %v2344_v57 = vld [vmem:[%s3156_s1 + $0x30] sm:$0xff] }
 0x84f   :  { %1893 = vmatmul.msk.f32.gmra.mxu0 %vm39_vm0, %v2344_v57 }
 0x850   :  { %2003 = vtanh.f32 %v353_v59 }
 0x856   :  { %v2004_v60 = vpop.eup %2003 }
 0x857   :  { %356 = vrot.lane.b32.xlu2 %v2004_v60, %s2128_s21 }
 0x8b1   :  { %v357_v61 = vpop.permute.xlu2 %356 }
 0x8b2   :  { %v359_v62 = vmul.f32 %v357_v61, %v340_v55 }
 0x8b4   :  { %362 = vrot.lane.b32.xlu0 %v359_v62, %s2129_s22 }
 0x8cc   :  { %v99_v61 = vpop.f32.mrf.mxu0 }
 0x8cd   :  { %v488_v62 = vadd.f32 %v99_v61, %v2242_v14  ;;  %v645_v61 = vld [vmem:[%s3155_s0 + $0x290] sm:$0xff] }
 0x926   :  { %v363_v0 = vpop.permute.xlu0 %362 }
 0x927   :  { %630 = vst.msk [vmem:[%s3157_s4 + $0x18] sm:$0xff] %vm106_vm5, %v363_v0  ;;  %1902 = vmatmul.msk.f32.vlgmr.msra.gmra.mxu2 %vm106_vm5, %v363_v0 }
 0x9aa   :  { %v383_v5 = vpop.f32.mrf.mxu2 }
 0x9ab   :  { %v386_v7 = vadd.f32 %v383_v5, %v360_v2 }
 0x9ad   :  { %2005 = vtanh.f32 %v386_v7  ;;  %v1903_v11 = vmul.f32 -1.442695, %v386_v7 }
 0x9af   :  { %2007 = vpow2.f32 %v1903_v11 }
 0x9b3   :  { %v2006_v10 = vpop.eup %2005 }
 0x9b4   :  { %409 = vrot.lane.b32.xlu1 %v2006_v10, %s2128_s21 }
 0x9b5   :  { %v2008_v12 = vpop.eup %2007 }
 0x9b6   :  { %v390_v13 = vadd.f32 1.0, %v2008_v12 }
 0x9b8   :  { %2009 = vrcp.f32 %v390_v13  ;;  %v402_v3 = vand.u32 2147483648, %v390_v13  ;;  %vm396_vm4 = vweird.f32 %v390_v13  ;;  %v400_v4 = vand.u32 2147483647, %v390_v13 }
 0x9ba   :  { %v403_v6 = vor.u32 1.1754944e-38, %v402_v3  ;;  %vm401_vm7 = vcmp.eq.f32.partialorder %v400_v4, 8.507059e+37 }
 0x9be   :  { %v2010_v15 = vpop.eup %2009 }
 0x9bf   :  { %v392_v16 = vmul.f32 %v2010_v15, %v390_v13  ;;  %vm397_vm3 = vweird.f32 %v2010_v15 }
 0x9c0   :  { %vm398_vm6 = vmor %vm396_vm4, %vm397_vm3 }
 0x9c1   :  { %v393_v17 = vsub.f32 1.0, %v392_v16 }
 0x9c3   :  { %v394_v18 = vmul.f32 %v2010_v15, %v393_v17 }
 0x9c5   :  { %v395_v19 = vadd.f32 %v2010_v15, %v394_v18 }
 0x9c7   :  { %v399_v20 = vsel %vm398_vm6, %v2010_v15, %v395_v19  ;;  %vm653_vm6 = vcmask 785408  }
 0x9c8   :  { %v404_v8 = vsel %vm401_vm7, %v403_v6, %v399_v20  ;;  %vm828_vm7 = vcmask 523712  }
 0x9c9   :  { %v407_v23 = vmul.f32 %v404_v8, %v353_v59 }
 0xa26   :  { %v410_v21 = vpop.permute.xlu1 %409 }
 0xa27   :  { %v412_v22 = vmul.f32 %v410_v21, %v404_v8 }
 0xa29   :  { %414 = vrot.lane.b32.xlu2 %v412_v22, %s2128_s21 }
 0xa83   :  { %v415_v24 = vpop.permute.xlu2 %414 }
 0xa84   :  { %v417_v25 = vadd.f32 %v415_v24, %v407_v23 }
 0xa86   :  { %2011 = vtanh.f32 %v417_v25 }
 0xa8c   :  { %v2012_v26 = vpop.eup %2011 }
 0xa8d   :  { %420 = vrot.lane.b32.xlu0 %v2012_v26, %s2128_s21  ;;  %v2362_v26 = vld [vmem:[%s3156_s1 + $0x38] sm:$0xff] }
 0xa8e   :  { %1894 = vmatmul.msk.f32.gmra.mxu0 %vm39_vm0, %v2362_v26 }
 0xaff   :  { %v421_v27 = vpop.permute.xlu0 %420 }
 0xb00   :  { %v423_v28 = vmul.f32 %v421_v27, %v404_v8 }
 0xb02   :  { %426 = vrot.lane.b32.xlu1 %v423_v28, %s2129_s22 }
 0xb0b   :  { %v102_v28 = vpop.f32.mrf.mxu0 }
 0xb74   :  { %v427_v30 = vpop.permute.xlu1 %426 }
 0xb75   :  { %631 = vst.msk [vmem:[%s3157_s4 + $0x20] sm:$0xff] %vm106_vm5, %v427_v30  ;;  %1904 = vmatmul.msk.f32.vlgmr.msra.gmra.mxu3 %vm106_vm5, %v427_v30  ;;  %v552_v30 = vadd.f32 %v102_v28, %v2242_v14 }
 0xbf8   :  { %v447_v34 = vpop.f32.mrf.mxu3 }
 0xbf9   :  { %v450_v35 = vadd.f32 %v447_v34, %v424_v33 }
 0xbfb   :  { %2013 = vtanh.f32 %v450_v35  ;;  %v1905_v37 = vmul.f32 -1.442695, %v450_v35 }
 0xbfd   :  { %2015 = vpow2.f32 %v1905_v37 }
 0xc01   :  { %v2014_v36 = vpop.eup %2013 }
 0xc02   :  { %473 = vrot.lane.b32.xlu2 %v2014_v36, %s2128_s21 }
 0xc03   :  { %v2016_v38 = vpop.eup %2015 }
 0xc04   :  { %v454_v39 = vadd.f32 1.0, %v2016_v38 }
 0xc06   :  { %2017 = vrcp.f32 %v454_v39  ;;  %v466_v46 = vand.u32 2147483648, %v454_v39  ;;  %vm460_vm9 = vweird.f32 %v454_v39  ;;  %v464_v47 = vand.u32 2147483647, %v454_v39 }
 0xc08   :  { %v467_v49 = vor.u32 1.1754944e-38, %v466_v46  ;;  %vm465_vm11 = vcmp.eq.f32.partialorder %v464_v47, 8.507059e+37 }
 0xc0c   :  { %v2018_v40 = vpop.eup %2017 }
 0xc0d   :  { %v456_v42 = vmul.f32 %v2018_v40, %v454_v39  ;;  %vm461_vm8 = vweird.f32 %v2018_v40 }
 0xc0e   :  { %vm462_vm10 = vmor %vm460_vm9, %vm461_vm8  ;;  %vm799_vm8 = vcmask 458112   ;;  %vm677_vm9 = vcmask 130048  }
 0xc0f   :  { %v457_v43 = vsub.f32 1.0, %v456_v42 }
 0xc11   :  { %v458_v44 = vmul.f32 %v2018_v40, %v457_v43 }
 0xc13   :  { %v459_v45 = vadd.f32 %v2018_v40, %v458_v44 }
 0xc15   :  { %v463_v48 = vsel %vm462_vm10, %v2018_v40, %v459_v45  ;;  %vm742_vm10 = vcmask 64512  }
 0xc16   :  { %v468_v51 = vsel %vm465_vm11, %v467_v49, %v463_v48 }
 0xc17   :  { %v471_v53 = vmul.f32 %v468_v51, %v417_v25 }
 0xc5c   :  { %v474_v50 = vpop.permute.xlu2 %473 }
 0xc5d   :  { %v476_v52 = vmul.f32 %v474_v50, %v468_v51 }
 0xc5f   :  { %478 = vrot.lane.b32.xlu0 %v476_v52, %s2128_s21 }
 0xcd1   :  { %v479_v54 = vpop.permute.xlu0 %478 }
 0xcd2   :  { %v481_v55 = vadd.f32 %v479_v54, %v471_v53  ;;  %v651_v54 = vld [vmem:[%s3155_s0 + $0x2f0] sm:$0xff] }
 0xcd3   :  { %661 = vmatpush.msrb.mxu0 %v651_v54 }
 0xcd4   :  { %2019 = vtanh.f32 %v481_v55 }
 0xcda   :  { %v2020_v56 = vpop.eup %2019 }
 0xcdb   :  { %484 = vrot.lane.b32.xlu1 %v2020_v56, %s2128_s21  ;;  %v649_v56 = vld [vmem:[%s3155_s0 + $0x2d0] sm:$0xff] }
 0xd4d   :  { %v485_v58 = vpop.permute.xlu1 %484 }
 0xd4e   :  { %v487_v59 = vmul.f32 %v485_v58, %v468_v51  ;;  %v648_v58 = vld [vmem:[%s3155_s0 + $0x2c0] sm:$0xff] }
 0xd50   :  { %490 = vrot.lane.b32.xlu2 %v487_v59, %s2129_s22  ;;  %v647_v59 = vld [vmem:[%s3155_s0 + $0x2b0] sm:$0xff] }
 0xdaa   :  { %v491_v60 = vpop.permute.xlu2 %490 }
 0xdab   :  { %632 = vst.msk [vmem:[%s3157_s4 + $0x28] sm:$0xff] %vm106_vm5, %v491_v60  ;;  %1906 = vmatmul.msk.f32.vlgmr.msra.gmra.mxu1 %vm106_vm5, %v491_v60  ;;  %v646_v60 = vld [vmem:[%s3155_s0 + $0x2a0] sm:$0xff] }
 0xe28   :  { %v511_v0 = vpop.f32.mrf.mxu1 }
 0xe29   :  { %v514_v1 = vadd.f32 %v511_v0, %v488_v62  ;;  %v644_v62 = vld [vmem:[%s3155_s0 + $0x280] sm:$0xff]  ;;  %v643_v0 = vld [vmem:[%s3155_s0 + $0x270] sm:$0xff] }
 0xe2b   :  { %2021 = vtanh.f32 %v514_v1  ;;  %v1907_v5 = vmul.f32 -1.442695, %v514_v1  ;;  %v642_v1 = vld [vmem:[%s3155_s0 + $0x260] sm:$0xff] }
 0xe2d   :  { %2023 = vpow2.f32 %v1907_v5  ;;  %v640_v5 = vld [vmem:[%s3155_s0 + $0x240] sm:$0xff] }
 0xe31   :  { %v2022_v2 = vpop.eup %2021 }
 0xe32   :  { %537 = vrot.lane.b32.xlu0 %v2022_v2, %s2128_s21  ;;  %v641_v2 = vld [vmem:[%s3155_s0 + $0x250] sm:$0xff] }
 0xe33   :  { %v2024_v7 = vpop.eup %2023 }
 0xe34   :  { %v518_v10 = vadd.f32 1.0, %v2024_v7 }
 0xe36   :  { %2025 = vrcp.f32 %v518_v10  ;;  %v530_v17 = vand.u32 2147483648, %v518_v10  ;;  %vm524_vm13 = vweird.f32 %v518_v10  ;;  %v528_v18 = vand.u32 2147483647, %v518_v10 }
 0xe38   :  { %v531_v3 = vor.u32 1.1754944e-38, %v530_v17  ;;  %vm529_vm15 = vcmp.eq.f32.partialorder %v528_v18, 8.507059e+37 }
 0xe3c   :  { %v2026_v11 = vpop.eup %2025 }
 0xe3d   :  { %v520_v12 = vmul.f32 %v2026_v11, %v518_v10  ;;  %vm525_vm12 = vweird.f32 %v2026_v11 }
 0xe3e   :  { %vm526_vm14 = vmor %vm524_vm13, %vm525_vm12 }
 0xe3f   :  { %v521_v13 = vsub.f32 1.0, %v520_v12 }
 0xe41   :  { %v522_v15 = vmul.f32 %v2026_v11, %v521_v13 }
 0xe43   :  { %v523_v16 = vadd.f32 %v2026_v11, %v522_v15 }
 0xe45   :  { %v527_v19 = vsel %vm526_vm14, %v2026_v11, %v523_v16  ;;  %v2418_v11 = vld [vmem:[%s3158_s2] sm:$0xff]  ;;  %v652_v16 = vld [vmem:[%s3155_s0 + $0x470] sm:$0xff] }
 0xe46   :  { %v532_v20 = vsel %vm529_vm15, %v531_v3, %v527_v19 }
 0xe47   :  { %v535_v21 = vmul.f32 %v532_v20, %v481_v55  ;;  %v650_v55 = vld [vmem:[%s3155_s0 + $0x2e0] sm:$0xff] }
 0xe48   :  { %662 = vmatpush.msrb.mxu0 %v650_v55 }
 0xe4a   :  { %663 = vmatpush.msrb.mxu0 %v649_v56 }
 0xe4c   :  { %664 = vmatpush.msrb.mxu0 %v648_v58 }
 0xe4e   :  { %665 = vmatpush.msrb.mxu0 %v647_v59 }
 0xe50   :  { %666 = vmatpush.msrb.mxu0 %v646_v60 }
 0xe52   :  { %667 = vmatpush.msrb.mxu0 %v645_v61 }
 0xe54   :  { %668 = vmatpush.msrb.mxu0 %v644_v62 }
 0xe56   :  { %669 = vmatpush.msrb.mxu0 %v643_v0 }
 0xe58   :  { %670 = vmatpush.msrb.mxu0 %v642_v1 }
 0xe5a   :  { %671 = vmatpush.msrb.mxu0 %v641_v2 }
 0xe5c   :  { %672 = vmatpush.msrb.mxu0 %v640_v5 }
 0xea4   :  { %v538_v4 = vpop.permute.xlu0 %537 }
 0xea5   :  { %v540_v6 = vmul.f32 %v538_v4, %v532_v20 }
 0xea7   :  { %542 = vrot.lane.b32.xlu1 %v540_v6, %s2128_s21 }
 0xf19   :  { %v543_v8 = vpop.permute.xlu1 %542 }
 0xf1a   :  { %v545_v22 = vadd.f32 %v543_v8, %v535_v21 }
 0xf1c   :  { %2027 = vtanh.f32 %v545_v22 }
 0xf22   :  { %v2028_v23 = vpop.eup %2027 }
 0xf23   :  { %548 = vrot.lane.b32.xlu2 %v2028_v23, %s2128_s21 }
 0xf7d   :  { %v549_v24 = vpop.permute.xlu2 %548 }
 0xf7e   :  { %v551_v25 = vmul.f32 %v549_v24, %v532_v20 }
 0xf80   :  { %554 = vrot.lane.b32.xlu0 %v551_v25, %s2129_s22 }
 0xff2   :  { %v555_v27 = vpop.permute.xlu0 %554 }
 0xff3   :  { %633 = vst.msk [vmem:[%s3157_s4 + $0x30] sm:$0xff] %vm106_vm5, %v555_v27  ;;  %1908 = vmatmul.msk.f32.vlgmr.msrb.gmra.mxu2 %vm106_vm5, %v555_v27 }
0x1076   :  { %v575_v31 = vpop.f32.mrf.mxu2 }
0x1077   :  { %v578_v33 = vadd.f32 %v575_v31, %v552_v30 }
0x1079   :  { %2029 = vtanh.f32 %v578_v33  ;;  %v1909_v35 = vmul.f32 -1.442695, %v578_v33 }
0x107b   :  { %2031 = vpow2.f32 %v1909_v35 }
0x107f   :  { %v2030_v34 = vpop.eup %2029 }
0x1080   :  { %601 = vrot.lane.b32.xlu1 %v2030_v34, %s2128_s21 }
0x1081   :  { %v2032_v36 = vpop.eup %2031 }
0x1082   :  { %v582_v37 = vadd.f32 1.0, %v2032_v36 }
0x1084   :  { %2033 = vrcp.f32 %v582_v37  ;;  %v594_v44 = vand.u32 2147483648, %v582_v37  ;;  %vm588_vm2 = vweird.f32 %v582_v37  ;;  %v592_v14 = vand.u32 2147483647, %v582_v37 }
0x1086   :  { %v595_v46 = vor.u32 1.1754944e-38, %v594_v44  ;;  %vm593_vm4 = vcmp.eq.f32.partialorder %v592_v14, 8.507059e+37 }
0x108a   :  { %v2034_v38 = vpop.eup %2033 }
0x108b   :  { %v584_v39 = vmul.f32 %v2034_v38, %v582_v37  ;;  %vm589_vm1 = vweird.f32 %v2034_v38 }
0x108c   :  { %vm590_vm3 = vmor %vm588_vm2, %vm589_vm1 }
0x108d   :  { %v585_v40 = vsub.f32 1.0, %v584_v39 }
0x108f   :  { %v586_v42 = vmul.f32 %v2034_v38, %v585_v40 }
0x1091   :  { %v587_v43 = vadd.f32 %v2034_v38, %v586_v42 }
0x1093   :  { %v591_v45 = vsel %vm590_vm3, %v2034_v38, %v587_v43 }
0x1094   :  { %v596_v48 = vsel %vm593_vm4, %v595_v46, %v591_v45 }
0x1095   :  { %v599_v50 = vmul.f32 %v596_v48, %v545_v22 }
0x10f2   :  { %v602_v47 = vpop.permute.xlu1 %601 }
0x10f3   :  { %v604_v49 = vmul.f32 %v602_v47, %v596_v48 }
0x10f5   :  { %606 = vrot.lane.b32.xlu2 %v604_v49, %s2128_s21 }
0x114f   :  { %v607_v51 = vpop.permute.xlu2 %606 }
0x1150   :  { %v609_v52 = vadd.f32 %v607_v51, %v599_v50 }
0x1152   :  { %2035 = vtanh.f32 %v609_v52 }
0x1158   :  { %v2036_v53 = vpop.eup %2035 }
0x1159   :  { %612 = vrot.lane.b32.xlu0 %v2036_v53, %s2128_s21 }
0x11cb   :  { %v613_v7 = vpop.permute.xlu0 %612 }
0x11cc   :  { %v2411_v10 = vmul.f32 %v613_v7, %v596_v48 }
0x11ce   :  { %635 = vrot.lane.b32.xlu1 %v2411_v10, %s2130_s29 }
0x1240   :  { %v2420_v12 = vpop.permute.xlu1 %635 }
0x1241   :  { %v638_v13 = vsel %vm106_vm5, %v2418_v11, %v2420_v12 }
0x1242   :  { %v639_v15 = vsel %vm39_vm0, %v638_v13, %v2418_v11 }
0x1243   :  { %1910 = vmatmul.msk.f32.vlgmr.msrb.gmra.mxu0 %vm653_vm6, %v639_v15 }
0x12c0   :  { %v674_v17 = vpop.f32.mrf.mxu0 }
0x12c1   :  { %v2431_v18 = vadd.f32 %v674_v17, %v652_v16 }
0x12c3   :  { %v829_v19 = vsel %vm828_vm7, %v2431_v18, -inf  ;;  %v800_v3 = vsel %vm799_vm8, %v2431_v18, -inf  ;;  %v678_v25 = vsel %vm677_vm9, %v2431_v18, -inf }
0x12c4   :  { %830 = vmax.xlane.f32.xlu0 %v829_v19  ;;  %801 = vmax.xlane.f32.xlu2 %v800_v3 }
0x1337   :  { %v802_v4 = vpop.xlane.xlu2 %801  ;;  %v831_v6 = vpop.xlane.xlu0 %830 }
0x1338   :  { %v803_v20 = vsub.f32 %v2431_v18, %v802_v4  ;;  %v832_v8 = vsub.f32 %v2431_v18, %v831_v6 }
0x133a   :  { %v804_v21 = vmul.f32 1.442695, %v803_v20  ;;  %v833_v22 = vmul.f32 1.442695, %v832_v8  ;;  %v890_v8 = vld [vmem:[%s3155_s0 + $0x380] sm:$0xff] }
0x133b   :  { %903 = vmatpush.msrb.mxu1 %v890_v8  ;;  %v932_v8 = vld [vmem:[%s3155_s0 + $0x3a0] sm:$0xff] }
0x133c   :  { %2037 = vpow2.f32 %v804_v21 }
0x133d   :  { %2039 = vpow2.f32 %v833_v22  ;;  %v889_v22 = vld [vmem:[%s3155_s0 + $0x370] sm:$0xff] }
0x133e   :  { %904 = vmatpush.msrb.mxu1 %v889_v22  ;;  %v939_v22 = vld [vmem:[%s3155_s0 + $0x3d8] sm:$0xff] }
0x1342   :  { %v2038_v23 = vpop.eup %2037 }
0x1343   :  { %807 = vrot.lane.b32.xlu1 %v2038_v23, %s2131_s9  ;;  %v2040_v24 = vpop.eup %2039 }
0x134b   :  { %836 = vrot.lane.b32.xlu1 %v2040_v24, %s2132_s10 }
0x1375   :  { %679 = vmax.xlane.f32.xlu1 %v678_v25  ;;  %v886_v25 = vld [vmem:[%s3155_s0 + $0x340] sm:$0xff] }
0x13b5   :  { %v808_v27 = vpop.permute.xlu1 %807 }
0x13b6   :  { %v810_v28 = vsel %vm742_vm10, %v808_v27, 0.0  ;;  %v885_v27 = vld [vmem:[%s3155_s0 + $0x330] sm:$0xff] }
0x13b7   :  { %811 = vadd.xlane.f32.xlu2 %v810_v28  ;;  %v884_v28 = vld [vmem:[%s3155_s0 + $0x320] sm:$0xff] }
0x13bd   :  { %v837_v30 = vpop.permute.xlu1 %836 }
0x13be   :  { %v839_v31 = vsel %vm742_vm10, %v837_v30, 0.0  ;;  %v883_v30 = vld [vmem:[%s3155_s0 + $0x310] sm:$0xff] }
0x13bf   :  { %840 = vadd.xlane.f32.xlu2 %v839_v31  ;;  %v882_v31 = vld [vmem:[%s3155_s0 + $0x300] sm:$0xff] }
0x13e8   :  { %v680_v33 = vpop.xlane.xlu1 %679 }
0x13e9   :  { %v681_v34 = vsub.f32 %v2431_v18, %v680_v33  ;;  %v1048_v33 = vld [vmem:[%s3155_s0 + $0x130] sm:$0xff] }
0x13eb   :  { %v682_v35 = vmul.f32 1.442695, %v681_v34  ;;  %v1046_v34 = vld [vmem:[%s3155_s0 + $0x120] sm:$0xff] }
0x13ed   :  { %2041 = vpow2.f32 %v682_v35  ;;  %v1044_v35 = vld [vmem:[%s3155_s0 + $0x110] sm:$0xff] }
0x13f3   :  { %v2042_v36 = vpop.eup %2041 }
0x13f4   :  { %v684_v37 = vsel %vm677_vm9, %v2042_v36, 0.0 }
0x13f5   :  { %685 = vadd.xlane.f32.xlu0 %v684_v37  ;;  %v1040_v37 = vld [vmem:[%s3155_s0 + $0xf0] sm:$0xff] }
0x142a   :  { %v812_v38 = vpop.xlane.xlu2 %811 }
0x142b   :  { %2043 = vrcp.f32 %v812_v38  ;;  %v824_v44 = vand.u32 2147483648, %v812_v38  ;;  %v822_v45 = vand.u32 2147483647, %v812_v38  ;;  %vm818_vm12 = vweird.f32 %v812_v38 }
0x142d   :  { %v825_v48 = vor.u32 1.1754944e-38, %v824_v44  ;;  %vm823_vm14 = vcmp.eq.f32.partialorder %v822_v45, 8.507059e+37 }
0x1431   :  { %v2044_v39 = vpop.eup %2043 }
0x1432   :  { %v814_v40 = vmul.f32 %v2044_v39, %v812_v38  ;;  %v841_v42 = vpop.xlane.xlu2 %840  ;;  %vm819_vm11 = vweird.f32 %v2044_v39  ;;  %v1038_v38 = vld [vmem:[%s3155_s0 + $0xe0] sm:$0xff] }
0x1433   :  { %2045 = vrcp.f32 %v841_v42  ;;  %vm820_vm13 = vmor %vm818_vm12, %vm819_vm11  ;;  %v853_v54 = vand.u32 2147483648, %v841_v42  ;;  %v851_v56 = vand.u32 2147483647, %v841_v42  ;;  %vm847_vm1 = vweird.f32 %v841_v42 }
0x1434   :  { %v815_v43 = vsub.f32 1.0, %v814_v40  ;;  %v1034_v40 = vld [vmem:[%s3155_s0 + $0xc0] sm:$0xff]  ;;  %vm879_vm12 = vcmask 392192  }
0x1435   :  { %v854_v59 = vor.u32 1.1754944e-38, %v853_v54  ;;  %vm852_vm3 = vcmp.eq.f32.partialorder %v851_v56, 8.507059e+37  ;;  %v2602_v54 = vld [vmem:[%s3155_s0 + $0x160] sm:$0xff]  ;;  %v2612_v56 = vld [vmem:[%s3155_s0 + $0x158] sm:$0xff] }
0x1436   :  { %v816_v14 = vmul.f32 %v2044_v39, %v815_v43 }
0x1438   :  { %v817_v46 = vadd.f32 %v2044_v39, %v816_v14 }
0x1439   :  { %v2046_v47 = vpop.eup %2045 }
0x143a   :  { %v843_v49 = vmul.f32 %v2046_v47, %v841_v42  ;;  %v821_v50 = vsel %vm820_vm13, %v2044_v39, %v817_v46  ;;  %vm848_vm15 = vweird.f32 %v2046_v47  ;;  %v1036_v39 = vld [vmem:[%s3155_s0 + $0xd0] sm:$0xff]  ;;  %vm892_vm13 = vcmask 588800  }
0x143b   :  { %v826_v51 = vsel %vm823_vm14, %v825_v48, %v821_v50  ;;  %vm849_vm2 = vmor %vm847_vm1, %vm848_vm15  ;;  %v2532_v48 = vld [vmem:[%s3155_s0 + $0x1b8] sm:$0xff]  ;;  %vm952_vm14 = vcmask 654336  }
0x143c   :  { %v844_v52 = vsub.f32 1.0, %v843_v49  ;;  %v827_v53 = vmul.f32 %v2038_v23, %v826_v51  ;;  %v888_v23 = vld [vmem:[%s3155_s0 + $0x360] sm:$0xff]  ;;  %1185 = vmatpush.msra.mxu0 %v2532_v48  ;;  %v2554_v50 = vld [vmem:[%s3155_s0 + $0x198] sm:$0xff] }
0x143d   :  { %905 = vmatpush.msrb.mxu1 %v888_v23  ;;  %v2537_v49 = vld [vmem:[%s3155_s0 + $0x1a0] sm:$0xff]  ;;  %v930_v23 = vld [vmem:[%s3155_s0 + $0x390] sm:$0xff] }
0x143e   :  { %v845_v55 = vmul.f32 %v2046_v47, %v844_v52  ;;  %858 = vrot.lane.b32.xlu2 %v827_v53, %s2131_s9  ;;  %v2573_v51 = vld [vmem:[%s3155_s0 + $0x180] sm:$0xff]  ;;  %v2590_v52 = vld [vmem:[%s3155_s0 + $0x178] sm:$0xff]  ;;  %v2597_v53 = vld [vmem:[%s3155_s0 + $0x168] sm:$0xff] }
0x1440   :  { %v846_v58 = vadd.f32 %v2046_v47, %v845_v55  ;;  %v2607_v55 = vld [vmem:[%s3155_s0 + $0x150] sm:$0xff] }
0x1442   :  { %v850_v60 = vsel %vm849_vm2, %v2046_v47, %v846_v58  ;;  %v2516_v47 = vld [vmem:[%s3156_s1] sm:$0xff] }
0x1443   :  { %v855_v61 = vsel %vm852_vm3, %v854_v59, %v850_v60  ;;  %v2619_v58 = vld [vmem:[%s3155_s0 + $0x140] sm:$0xff]  ;;  %v2624_v59 = vld [vmem:[%s3155_s0 + $0x148] sm:$0xff] }
0x1444   :  { %v856_v62 = vmul.f32 %v2040_v24, %v855_v61  ;;  %v887_v24 = vld [vmem:[%s3155_s0 + $0x350] sm:$0xff]  ;;  %v948_v60 = vld [vmem:[%s3155_s0 + $0x420] sm:$0xff] }
0x1445   :  { %906 = vmatpush.msrb.mxu1 %v887_v24  ;;  %962 = vmatpush.msra.mxu2 %v948_v60  ;;  %v891_v61 = vld [vmem:[%s3155_s0 + $0x480] sm:$0xff]  ;;  %v937_v24 = vld [vmem:[%s3155_s0 + $0x3c8] sm:$0xff] }
0x1446   :  { %862 = vrot.lane.b32.xlu0 %v856_v62, %s2131_s9  ;;  %875 = vrot.lane.b32.xlu2 %v2418_v11, %s2130_s29 }
0x1447   :  { %907 = vmatpush.msrb.mxu1 %v886_v25  ;;  %v1049_v25 = vld [vmem:[%s3155_s0 + $0x138] sm:$0xff] }
0x1449   :  { %908 = vmatpush.msrb.mxu1 %v885_v27  ;;  %v935_v27 = vld [vmem:[%s3155_s0 + $0x3b8] sm:$0xff] }
0x144b   :  { %909 = vmatpush.msrb.mxu1 %v884_v28  ;;  %v1047_v28 = vld [vmem:[%s3155_s0 + $0x128] sm:$0xff] }
0x144d   :  { %910 = vmatpush.msrb.mxu1 %v883_v30  ;;  %v933_v30 = vld [vmem:[%s3155_s0 + $0x3a8] sm:$0xff] }
0x144f   :  { %911 = vmatpush.msrb.mxu1 %v882_v31  ;;  %v1045_v31 = vld [vmem:[%s3155_s0 + $0x118] sm:$0xff] }
0x1451   :  { %1058 = vmatpush.msra.mxu1 %v1048_v33  ;;  %v931_v33 = vld [vmem:[%s3155_s0 + $0x398] sm:$0xff] }
0x1453   :  { %1059 = vmatpush.msra.mxu1 %v1046_v34  ;;  %v1043_v34 = vld [vmem:[%s3155_s0 + $0x108] sm:$0xff] }
0x1455   :  { %1060 = vmatpush.msra.mxu1 %v1044_v35  ;;  %v1041_v35 = vld [vmem:[%s3155_s0 + $0xf8] sm:$0xff] }
0x1468   :  { %v686_v0 = vpop.xlane.xlu0 %685 }
0x1469   :  { %2047 = vrcp.f32 %v686_v0  ;;  %v698_v7 = vand.u32 2147483648, %v686_v0  ;;  %v696_v15 = vand.u32 2147483647, %v686_v0  ;;  %vm692_vm7 = vweird.f32 %v686_v0 }
0x146b   :  { %v699_v17 = vor.u32 1.1754944e-38, %v698_v7  ;;  %vm697_vm11 = vcmp.eq.f32.partialorder %v696_v15, 8.507059e+37  ;;  %v942_v7 = vld [vmem:[%s3155_s0 + $0x3f0] sm:$0xff]  ;;  %v940_v15 = vld [vmem:[%s3155_s0 + $0x3e0] sm:$0xff] }
0x146f   :  { %v2048_v1 = vpop.eup %2047 }
0x1470   :  { %v688_v2 = vmul.f32 %v2048_v1, %v686_v0  ;;  %vm693_vm4 = vweird.f32 %v2048_v1 }
0x1471   :  { %vm694_vm8 = vmor %vm692_vm7, %vm693_vm4 }
0x1472   :  { %v689_v5 = vsub.f32 1.0, %v688_v2  ;;  %v944_v2 = vld [vmem:[%s3155_s0 + $0x400] sm:$0xff] }
0x1474   :  { %v690_v13 = vmul.f32 %v2048_v1, %v689_v5 }
0x1476   :  { %v691_v16 = vadd.f32 %v2048_v1, %v690_v13  ;;  %v949_v13 = vld [vmem:[%s3155_s0 + $0x428] sm:$0xff] }
0x1477   :  { %982 = vmatpush.msrb.mxu3 %v949_v13 }
0x1478   :  { %v695_v19 = vsel %vm694_vm8, %v2048_v1, %v691_v16  ;;  %v946_v1 = vld [vmem:[%s3155_s0 + $0x410] sm:$0xff]  ;;  %v947_v16 = vld [vmem:[%s3155_s0 + $0x418] sm:$0xff] }
0x1479   :  { %v700_v3 = vsel %vm697_vm11, %v699_v17, %v695_v19  ;;  %963 = vmatpush.msra.mxu2 %v946_v1  ;;  %v938_v17 = vld [vmem:[%s3155_s0 + $0x3d0] sm:$0xff]  ;;  %v945_v19 = vld [vmem:[%s3155_s0 + $0x408] sm:$0xff]  ;;  %983 = vmatpush.msrb.mxu3 %v947_v16  ;;  %v2125_v1 = vld [vmem:[%s3156_s1 + $0x20] sm:$0xff] }
0x147a   :  { %v701_v4 = vmul.f32 %v2042_v36, %v700_v3  ;;  %v1042_v36 = vld [vmem:[%s3155_s0 + $0x100] sm:$0xff] }
0x147b   :  { %1061 = vmatpush.msra.mxu1 %v1042_v36  ;;  %964 = vmatpush.msra.mxu2 %v944_v2  ;;  %v936_v3 = vld [vmem:[%s3155_s0 + $0x3c0] sm:$0xff]  ;;  %v1039_v36 = vld [vmem:[%s3155_s0 + $0xe8] sm:$0xff] }
0x147c   :  { %867 = vrot.lane.b32.xlu1 %v701_v4, %s2128_s21  ;;  %v943_v4 = vld [vmem:[%s3155_s0 + $0x3f8] sm:$0xff]  ;;  %984 = vmatpush.msrb.mxu3 %v945_v19 }
0x147d   :  { %1062 = vmatpush.msra.mxu1 %v1040_v37  ;;  %965 = vmatpush.msra.mxu2 %v942_v7  ;;  %v1037_v37 = vld [vmem:[%s3155_s0 + $0xd8] sm:$0xff] }
0x147e   :  { %985 = vmatpush.msrb.mxu3 %v943_v4 }
0x147f   :  { %1063 = vmatpush.msra.mxu1 %v1038_v38  ;;  %966 = vmatpush.msra.mxu2 %v940_v15  ;;  %v1035_v38 = vld [vmem:[%s3155_s0 + $0xc8] sm:$0xff]  ;;  %v2832_v15 = vld [vmem:[%s3155_s0 + $0x440] sm:$0xff] }
0x1481   :  { %1064 = vmatpush.msra.mxu1 %v1036_v39  ;;  %967 = vmatpush.msra.mxu2 %v938_v17 }
0x1483   :  { %1065 = vmatpush.msra.mxu1 %v1034_v40  ;;  %968 = vmatpush.msra.mxu2 %v936_v3 }
0x1484   :  { %924 = vrot.lane.b32.xlu1 %v2418_v11, %s2133_s11 }
0x1498   :  { %v859_v20 = vpop.permute.xlu2 %858 }
0x14a0   :  { %v876_v14 = vpop.permute.xlu2 %875 }
0x14b8   :  { %v863_v6 = vpop.permute.xlu0 %862 }
0x14b9   :  { %v2451_v21 = vsel %vm742_vm10, %v859_v20, %v863_v6  ;;  %v934_v20 = vld [vmem:[%s3155_s0 + $0x3b0] sm:$0xff]  ;;  %v941_v6 = vld [vmem:[%s3155_s0 + $0x3e8] sm:$0xff] }
0x14ba   :  { %921 = vrot.lane.b32.xlu2 %v2451_v21, %s2134_s12  ;;  %871 = vrot.lane.b32.xlu0 %v2451_v21, %s2133_s11  ;;  %s2136_s12 = smov 112  }
0x14bb   :  { %969 = vmatpush.msra.mxu2 %v934_v20  ;;  %986 = vmatpush.msrb.mxu3 %v941_v6 }
0x14bd   :  { %970 = vmatpush.msra.mxu2 %v932_v8  ;;  %987 = vmatpush.msrb.mxu3 %v939_v22 }
0x14bf   :  { %971 = vmatpush.msra.mxu2 %v930_v23  ;;  %988 = vmatpush.msrb.mxu3 %v937_v24 }
0x14c1   :  { %1099 = vmatpush.msrb.mxu2 %v1049_v25  ;;  %989 = vmatpush.msrb.mxu3 %v935_v27 }
0x14c3   :  { %1100 = vmatpush.msrb.mxu2 %v1047_v28  ;;  %990 = vmatpush.msrb.mxu3 %v933_v30  ;;  %v2846_v30 = vld [vmem:[%s3155_s0 + $0x458] sm:$0xff] }
0x14c5   :  { %1101 = vmatpush.msrb.mxu2 %v1045_v31  ;;  %991 = vmatpush.msrb.mxu3 %v931_v33 }
0x14c7   :  { %1102 = vmatpush.msrb.mxu2 %v1043_v34 }
0x14c9   :  { %1103 = vmatpush.msrb.mxu2 %v1041_v35  ;;  %v2851_v35 = vld [vmem:[%s3155_s0 + $0x448] sm:$0xff] }
0x14cb   :  { %1104 = vmatpush.msrb.mxu2 %v1039_v36 }
0x14cd   :  { %1105 = vmatpush.msrb.mxu2 %v1037_v37 }
0x14cf   :  { %1106 = vmatpush.msrb.mxu2 %v1035_v38 }
0x14ee   :  { %v2506_v42 = vpop.permute.xlu1 %867 }
0x14ef   :  { %v878_v43 = vsel %vm106_vm5, %v2418_v11, %v2506_v42  ;;  %v2527_v11 = vld [vmem:[%s3155_s0 + $0x1b0] sm:$0xff] }
0x14f0   :  { %1246 = vmatpush.msra.mxu3 %v2527_v11 }
0x14f2   :  { %1247 = vmatpush.msra.mxu3 %v2537_v49 }
0x1514   :  { %v922_v39 = vpop.permute.xlu2 %921 }
0x152c   :  { %v872_v44 = vpop.permute.xlu0 %871 }
0x152d   :  { %v880_v45 = vsel %vm879_vm12, %v878_v43, %v872_v44  ;;  %v925_v43 = vpop.permute.xlu1 %924 }
0x152e   :  { %v881_v46 = vsel %vm39_vm0, %v880_v45, %v876_v14 }
0x152f   :  { %1911 = vmatmul.msk.f32.vlgmr.msrb.gmra.mxu1 %vm892_vm13, %v881_v46 }
0x1530   :  { %1165 = vmatpush.msrb.mxu1 %v2527_v11 }
0x1532   :  { %1166 = vmatpush.msrb.mxu1 %v2537_v49 }
0x1537   :  { %1915 = vmatmul.msk.f32.vlgmr.msra.gmra.mxu1 %vm39_vm0, %v2516_v47 }
0x153f   :  { %1916 = vmatmul.msk.f32.gmra.mxu1 %vm39_vm0, %v2252_v41  ;;  %v2544_v41 = vld [vmem:[%s3155_s0 + $0x1a8] sm:$0xff] }
0x1540   :  { %1186 = vmatpush.msra.mxu0 %v2544_v41 }
0x1542   :  { %1187 = vmatpush.msra.mxu0 %v2554_v50 }
0x1547   :  { %1917 = vmatmul.msk.f32.gmra.mxu1 %vm39_vm0, %v2273_v9  ;;  %v2549_v9 = vld [vmem:[%s3155_s0 + $0x190] sm:$0xff] }
0x1548   :  { %1167 = vmatpush.msrb.mxu1 %v2549_v9  ;;  %1248 = vmatpush.msra.mxu3 %v2549_v9 }
0x154a   :  { %1168 = vmatpush.msrb.mxu1 %v2573_v51  ;;  %1249 = vmatpush.msra.mxu3 %v2573_v51 }
0x154f   :  { %1918 = vmatmul.msk.f32.gmra.mxu1 %vm39_vm0, %v2293_v32  ;;  %v2578_v32 = vld [vmem:[%s3155_s0 + $0x188] sm:$0xff] }
0x1550   :  { %1188 = vmatpush.msra.mxu0 %v2578_v32 }
0x1552   :  { %1189 = vmatpush.msra.mxu0 %v2590_v52 }
0x1554   :  { %1190 = vmatpush.msra.mxu0 %v2597_v53 }
0x1556   :  { %1191 = vmatpush.msra.mxu0 %v2612_v56 }
0x1557   :  { %1919 = vmatmul.msk.f32.gmra.mxu1 %vm39_vm0, %v2311_v63  ;;  %v2585_v63 = vld [vmem:[%s3155_s0 + $0x170] sm:$0xff] }
0x1558   :  { %1169 = vmatpush.msrb.mxu1 %v2585_v63  ;;  %1192 = vmatpush.msra.mxu0 %v2624_v59 }
0x1559   :  { %1250 = vmatpush.msra.mxu3 %v2585_v63 }
0x155a   :  { %1170 = vmatpush.msrb.mxu1 %v2602_v54  ;;  %1266 = vmatpush.msrb.mxu0 %v2532_v48 }
0x155b   :  { %1251 = vmatpush.msra.mxu3 %v2602_v54 }
0x155c   :  { %1171 = vmatpush.msrb.mxu1 %v2607_v55  ;;  %1267 = vmatpush.msrb.mxu0 %v2544_v41 }
0x155d   :  { %1252 = vmatpush.msra.mxu3 %v2607_v55 }
0x155e   :  { %1172 = vmatpush.msrb.mxu1 %v2619_v58  ;;  %1268 = vmatpush.msrb.mxu0 %v2554_v50 }
0x155f   :  { %1920 = vmatmul.msk.f32.gmra.mxu1 %vm39_vm0, %v2328_v29  ;;  %1253 = vmatpush.msra.mxu3 %v2619_v58 }
0x1560   :  { %1402 = vmatpush.msra.mxu1 %v2527_v11  ;;  %1269 = vmatpush.msrb.mxu0 %v2578_v32 }
0x1562   :  { %1403 = vmatpush.msra.mxu1 %v2537_v49  ;;  %1270 = vmatpush.msrb.mxu0 %v2590_v52 }
0x1564   :  { %1404 = vmatpush.msra.mxu1 %v2549_v9  ;;  %1271 = vmatpush.msrb.mxu0 %v2597_v53 }
0x1566   :  { %1405 = vmatpush.msra.mxu1 %v2573_v51  ;;  %1272 = vmatpush.msrb.mxu0 %v2612_v56 }
0x1567   :  { %1921 = vmatmul.msk.f32.gmra.mxu1 %vm39_vm0, %v2344_v57 }
0x1568   :  { %1406 = vmatpush.msra.mxu1 %v2585_v63  ;;  %1273 = vmatpush.msrb.mxu0 %v2624_v59 }
0x156a   :  { %1407 = vmatpush.msra.mxu1 %v2602_v54 }
0x156c   :  { %1408 = vmatpush.msra.mxu1 %v2607_v55 }
0x156e   :  { %1409 = vmatpush.msra.mxu1 %v2619_v58 }
0x156f   :  { %1922 = vmatmul.msk.f32.gmra.mxu1 %vm39_vm0, %v2362_v26 }
0x15ac   :  { %v913_v62 = vpop.f32.mrf.mxu1 }
0x15ad   :  { %v914_v0 = vadd.f32 %v913_v62, %v891_v61  ;;  %v2123_v61 = vld [vmem:[%s3156_s1 + $0x10] sm:$0xff] }
0x15af   :  { %2049 = vtanh.f32 %v914_v0  ;;  %918 = vrot.lane.b32.xlu0 %v914_v0, %s2129_s22  ;;  %v2124_v0 = vld [vmem:[%s3156_s1 + $0x18] sm:$0xff] }
0x15b4   :  { %v1067_v46 = vpop.f32.mrf.mxu1 }
0x15b5   :  { %v2050_v5 = vpop.eup %2049 }
0x15b6   :  { %1226 = vrot.lane.b32.xlu2 %v2050_v5, %s2129_s22  ;;  %1931 = vmatmul.msk.f32.vlgmr.msrb.gmra.mxu1 %vm39_vm0, %v2050_v5 }
0x15b7   :  { %1932 = vmatmul.msk.f32.vlgmr.msra.gmra.mxu0 %vm39_vm0, %v2050_v5  ;;  %1558 = vmatpush.msrb.mxu1 %v2527_v11 }
0x15b8   :  { %1344 = vmatpush.msra.mxu0 %v2532_v48 }
0x15b9   :  { %1559 = vmatpush.msrb.mxu1 %v2537_v49 }
0x15ba   :  { %1345 = vmatpush.msra.mxu0 %v2544_v41 }
0x15bb   :  { %1560 = vmatpush.msrb.mxu1 %v2549_v9 }
0x15bc   :  { %1346 = vmatpush.msra.mxu0 %v2554_v50 }
0x15bd   :  { %1561 = vmatpush.msrb.mxu1 %v2573_v51 }
0x15be   :  { %1347 = vmatpush.msra.mxu0 %v2578_v32 }
0x15bf   :  { %1562 = vmatpush.msrb.mxu1 %v2585_v63 }
0x15c0   :  { %1348 = vmatpush.msra.mxu0 %v2590_v52 }
0x15c1   :  { %1563 = vmatpush.msrb.mxu1 %v2602_v54 }
0x15c2   :  { %1349 = vmatpush.msra.mxu0 %v2597_v53 }
0x15c3   :  { %1564 = vmatpush.msrb.mxu1 %v2607_v55 }
0x15c4   :  { %1350 = vmatpush.msra.mxu0 %v2612_v56 }
0x15c5   :  { %1565 = vmatpush.msrb.mxu1 %v2619_v58 }
0x15c6   :  { %1351 = vmatpush.msra.mxu0 %v2624_v59 }
0x1621   :  { %v919_v40 = vpop.permute.xlu0 %918 }
0x1622   :  { %v927_v44 = vsel %vm677_vm9, %v919_v40, %v922_v39 }
0x1623   :  { %v928_v14 = vsel %vm106_vm5, %v927_v44, %v2420_v12  ;;  %v2779_v12 = vpop.f32.mrf.mxu1 }
0x1624   :  { %v929_v45 = vsel %vm879_vm12, %v928_v14, %v925_v43  ;;  %v1227_v14 = vpop.permute.xlu2 %1226 }
0x1625   :  { %1912 = vmatmul.msk.f32.vlgmr.msra.gmra.mxu2 %vm952_vm14, %v929_v45  ;;  %1913 = vmatmul.msk.f32.vlgmr.msrb.gmra.mxu3 %vm952_vm14, %v929_v45 }
0x1626   :  { %1324 = vmatpush.msrb.mxu3 %v2527_v11  ;;  %1422 = vmatpush.msra.mxu2 %v2532_v48 }
0x1628   :  { %1325 = vmatpush.msrb.mxu3 %v2537_v49  ;;  %1423 = vmatpush.msra.mxu2 %v2544_v41 }
0x162a   :  { %1326 = vmatpush.msrb.mxu3 %v2549_v9  ;;  %1424 = vmatpush.msra.mxu2 %v2554_v50 }
0x162b   :  { %v2793_v60 = vpop.f32.mrf.mxu1 }
0x162c   :  { %1327 = vmatpush.msrb.mxu3 %v2573_v51  ;;  %1425 = vmatpush.msra.mxu2 %v2578_v32 }
0x162d   :  { %1923 = vmatmul.msk.f32.vlgmr.msrb.gmra.mxu2 %vm39_vm0, %v2516_v47  ;;  %v2122_v47 = vld [vmem:[%s3156_s1 + $0x8] sm:$0xff] }
0x162e   :  { %1328 = vmatpush.msrb.mxu3 %v2585_v63  ;;  %1426 = vmatpush.msra.mxu2 %v2590_v52 }
0x1630   :  { %1329 = vmatpush.msrb.mxu3 %v2602_v54  ;;  %1427 = vmatpush.msra.mxu2 %v2597_v53 }
0x1632   :  { %1330 = vmatpush.msrb.mxu3 %v2607_v55  ;;  %1428 = vmatpush.msra.mxu2 %v2612_v56 }
0x1633   :  { %v2804_v62 = vpop.f32.mrf.mxu1 }
0x1634   :  { %1331 = vmatpush.msrb.mxu3 %v2619_v58  ;;  %1429 = vmatpush.msra.mxu2 %v2624_v59  ;;  %v1194_v31 = vpop.f32.mrf.mxu0 }
0x1635   :  { %1924 = vmatmul.msk.f32.gmra.mxu2 %vm39_vm0, %v2122_v47  ;;  %v1195_v36 = vadd.f32 %v1194_v31, %v2846_v30 }
0x1636   :  { %1578 = vmatpush.msrb.mxu2 %v2532_v48 }
0x1638   :  { %1579 = vmatpush.msrb.mxu2 %v2544_v41 }
0x163a   :  { %1580 = vmatpush.msrb.mxu2 %v2554_v50 }
0x163b   :  { %v2815_v2 = vpop.f32.mrf.mxu1 }
0x163c   :  { %1581 = vmatpush.msrb.mxu2 %v2578_v32 }
0x163d   :  { %1925 = vmatmul.msk.f32.gmra.mxu2 %vm39_vm0, %v2123_v61 }
0x163e   :  { %1582 = vmatpush.msrb.mxu2 %v2590_v52 }
0x1640   :  { %1583 = vmatpush.msrb.mxu2 %v2597_v53 }
0x1642   :  { %1584 = vmatpush.msrb.mxu2 %v2612_v56 }
0x1643   :  { %v2819_v5 = vpop.f32.mrf.mxu1 }
0x1644   :  { %1585 = vmatpush.msrb.mxu2 %v2624_v59 }
0x1645   :  { %1926 = vmatmul.msk.f32.gmra.mxu2 %vm39_vm0, %v2124_v0 }
0x164b   :  { %v2823_v7 = vpop.f32.mrf.mxu1 }
0x164d   :  { %1927 = vmatmul.msk.f32.gmra.mxu2 %vm39_vm0, %v2125_v1 }
0x1653   :  { %v2827_v13 = vpop.f32.mrf.mxu1 }
0x1655   :  { %1928 = vmatmul.msk.f32.gmra.mxu2 %vm39_vm0, %v2328_v29  ;;  %v2837_v29 = vld [vmem:[%s3155_s0 + $0x450] sm:$0xff] }
0x165b   :  { %v1174_v16 = vpop.f32.mrf.mxu1 }
0x165c   :  { %v1175_v17 = vadd.f32 %v1174_v16, %v2837_v29 }
0x165d   :  { %1929 = vmatmul.msk.f32.gmra.mxu2 %vm39_vm0, %v2344_v57  ;;  %v1152_v57 = vadd.f32 %v2832_v15, %v1067_v46 }
0x165f   :  { %v1197_v19 = vadd.f32 %v1175_v17, %v1152_v57  ;;  %v1231_v57 = vadd.f32 %v2832_v15, %v2779_v12 }
0x1661   :  { %v1933_v3 = vmul.f32 -1.442695, %v1197_v19 }
0x1663   :  { %2051 = vpow2.f32 %v1933_v3 }
0x1665   :  { %1930 = vmatmul.msk.f32.gmra.mxu2 %vm39_vm0, %v2362_v26 }
0x1669   :  { %v2052_v26 = vpop.eup %2051 }
0x166a   :  { %v1201_v4 = vadd.f32 1.0, %v2052_v26 }
0x166c   :  { %2053 = vrcp.f32 %v1201_v4  ;;  %v1213_v24 = vand.u32 2147483648, %v1201_v4  ;;  %vm1207_vm1 = vweird.f32 %v1201_v4  ;;  %v1211_v27 = vand.u32 2147483647, %v1201_v4 }
0x166e   :  { %v1214_v33 = vor.u32 1.1754944e-38, %v1213_v24  ;;  %vm1212_vm3 = vcmp.eq.f32.partialorder %v1211_v27, 8.507059e+37 }
0x1672   :  { %v2054_v20 = vpop.eup %2053 }
0x1673   :  { %v1203_v6 = vmul.f32 %v2054_v20, %v1201_v4  ;;  %vm1208_vm15 = vweird.f32 %v2054_v20 }
0x1674   :  { %vm1209_vm2 = vmor %vm1207_vm1, %vm1208_vm15 }
0x1675   :  { %v1204_v8 = vsub.f32 1.0, %v1203_v6 }
0x1677   :  { %v1205_v22 = vmul.f32 %v2054_v20, %v1204_v8 }
0x1679   :  { %v1206_v23 = vadd.f32 %v2054_v20, %v1205_v22 }
0x167b   :  { %v1210_v28 = vsel %vm1209_vm2, %v2054_v20, %v1206_v23 }
0x167c   :  { %v1215_v34 = vsel %vm1212_vm3, %v1214_v33, %v1210_v28 }
0x167d   :  { %v1217_v38 = vmul.f32 %v1215_v34, %v1195_v36  ;;  %v1220_v44 = vsub.f32 1.0, %v1215_v34  ;;  %v1229_v46 = vmul.f32 %v1227_v14, %v1215_v34 }
0x16a8   :  { %v2841_v25 = vpop.f32.mrf.mxu2  ;;  %v2879_v1 = vpop.f32.mrf.mxu3 }
0x16b0   :  { %v1108_v37 = vpop.f32.mrf.mxu2 }
0x16b1   :  { %v1153_v39 = vadd.f32 %v2851_v35, %v1108_v37 }
0x16b3   :  { %v1218_v40 = vadd.f32 %v1217_v38, %v1153_v39 }
0x16b5   :  { %2055 = vtanh.f32 %v1218_v40 }
0x16b8   :  { %v1111_v28 = vpop.f32.mrf.mxu2 }
0x16b9   :  { %v1232_v34 = vadd.f32 %v2851_v35, %v1111_v28 }
0x16bb   :  { %v2056_v43 = vpop.eup %2055 }
0x16bc   :  { %1222 = vrot.lane.b32.xlu0 %v2056_v43, %s2129_s22 }
0x172e   :  { %v1223_v45 = vpop.permute.xlu0 %1222 }
0x172f   :  { %v1225_v47 = vmul.f32 %v1223_v45, %v1220_v44 }
0x1731   :  { %v1230_v61 = vadd.f32 %v1229_v46, %v1225_v47 }
0x1733   :  { %1234 = vrot.lane.b32.xlu1 %v1230_v61, %s2129_s22 }
0x17a5   :  { %v2857_v0 = vpop.permute.xlu1 %1234 }
0x17a6   :  { %1934 = vmatmul.msk.f32.vlgmr.msra.gmra.mxu3 %vm39_vm0, %v2857_v0  ;;  %1935 = vmatmul.msk.f32.vlgmr.msrb.gmra.mxu0 %vm39_vm0, %v2857_v0 }
0x17a7   :  { %1480 = vmatpush.msra.mxu3 %v2527_v11  ;;  %1500 = vmatpush.msrb.mxu0 %v2532_v48 }
0x17a9   :  { %1481 = vmatpush.msra.mxu3 %v2537_v49  ;;  %1501 = vmatpush.msrb.mxu0 %v2544_v41 }
0x17ab   :  { %1482 = vmatpush.msra.mxu3 %v2549_v9  ;;  %1502 = vmatpush.msrb.mxu0 %v2554_v50 }
0x17ad   :  { %1483 = vmatpush.msra.mxu3 %v2573_v51  ;;  %1503 = vmatpush.msrb.mxu0 %v2578_v32 }
0x17af   :  { %1484 = vmatpush.msra.mxu3 %v2585_v63  ;;  %1504 = vmatpush.msrb.mxu0 %v2590_v52 }
0x17b1   :  { %1485 = vmatpush.msra.mxu3 %v2602_v54  ;;  %1505 = vmatpush.msrb.mxu0 %v2597_v53 }
0x17b3   :  { %1486 = vmatpush.msra.mxu3 %v2607_v55  ;;  %1506 = vmatpush.msrb.mxu0 %v2612_v56 }
0x17b5   :  { %1487 = vmatpush.msra.mxu3 %v2619_v58  ;;  %1507 = vmatpush.msrb.mxu0 %v2624_v59 }
0x1823   :  { %v1275_v27 = vpop.f32.mrf.mxu0 }
0x1824   :  { %v1276_v33 = vadd.f32 %v1275_v27, %v2846_v30  ;;  %v1114_v27 = vpop.f32.mrf.mxu2 }
0x1829   :  { %v1255_v16 = vpop.f32.mrf.mxu3 }
0x182a   :  { %v1256_v17 = vadd.f32 %v1255_v16, %v2837_v29  ;;  %v1309_v16 = vadd.f32 %v2832_v15, %v2793_v60 }
0x182c   :  { %v1278_v19 = vadd.f32 %v1256_v17, %v1231_v57 }
0x182e   :  { %v1936_v3 = vmul.f32 -1.442695, %v1278_v19 }
0x1830   :  { %2057 = vpow2.f32 %v1936_v3 }
0x1836   :  { %v2058_v26 = vpop.eup %2057 }
0x1837   :  { %v1282_v4 = vadd.f32 1.0, %v2058_v26 }
0x1839   :  { %2059 = vrcp.f32 %v1282_v4  ;;  %v1294_v22 = vand.u32 2147483648, %v1282_v4  ;;  %v1292_v24 = vand.u32 2147483647, %v1282_v4  ;;  %vm1288_vm7 = vweird.f32 %v1282_v4 }
0x183b   :  { %v1295_v12 = vor.u32 1.1754944e-38, %v1294_v22  ;;  %vm1293_vm11 = vcmp.eq.f32.partialorder %v1292_v24, 8.507059e+37 }
0x183f   :  { %v2060_v20 = vpop.eup %2059 }
0x1840   :  { %v1284_v6 = vmul.f32 %v2060_v20, %v1282_v4  ;;  %vm1289_vm4 = vweird.f32 %v2060_v20 }
0x1841   :  { %vm1290_vm8 = vmor %vm1288_vm7, %vm1289_vm4 }
0x1842   :  { %v1285_v8 = vsub.f32 1.0, %v1284_v6 }
0x1844   :  { %v1286_v23 = vmul.f32 %v2060_v20, %v1285_v8 }
0x1846   :  { %v1287_v31 = vadd.f32 %v2060_v20, %v1286_v23 }
0x1848   :  { %v1291_v36 = vsel %vm1290_vm8, %v2060_v20, %v1287_v31 }
0x1849   :  { %v1296_v37 = vsel %vm1293_vm11, %v1295_v12, %v1291_v36  ;;  %v1310_v12 = vadd.f32 %v2851_v35, %v1114_v27 }
0x184a   :  { %v1298_v38 = vmul.f32 %v1296_v37, %v1276_v33  ;;  %v1301_v43 = vsub.f32 1.0, %v1296_v37  ;;  %v1307_v14 = vmul.f32 %v1296_v37, %v1230_v61 }
0x184c   :  { %v1299_v39 = vadd.f32 %v1298_v38, %v1232_v34 }
0x184e   :  { %2061 = vtanh.f32 %v1299_v39 }
0x1854   :  { %v2062_v40 = vpop.eup %2061 }
0x1855   :  { %1303 = vrot.lane.b32.xlu0 %v2062_v40, %s2129_s22 }
0x18c7   :  { %v1304_v44 = vpop.permute.xlu0 %1303 }
0x18c8   :  { %v1306_v45 = vmul.f32 %v1304_v44, %v1301_v43 }
0x18ca   :  { %v1308_v46 = vadd.f32 %v1307_v14, %v1306_v45 }
0x18cc   :  { %1312 = vrot.lane.b32.xlu2 %v1308_v46, %s2129_s22 }
0x1926   :  { %v2888_v47 = vpop.permute.xlu2 %1312 }
0x1927   :  { %1937 = vmatmul.msk.f32.vlgmr.msrb.gmra.mxu3 %vm39_vm0, %v2888_v47  ;;  %1938 = vmatmul.msk.f32.vlgmr.msra.gmra.mxu0 %vm39_vm0, %v2888_v47 }
0x1928   :  { %1636 = vmatpush.msrb.mxu3 %v2527_v11  ;;  %1656 = vmatpush.msra.mxu0 %v2532_v48 }
0x192a   :  { %1637 = vmatpush.msrb.mxu3 %v2537_v49  ;;  %1657 = vmatpush.msra.mxu0 %v2544_v41 }
0x192c   :  { %1638 = vmatpush.msrb.mxu3 %v2549_v9  ;;  %1658 = vmatpush.msra.mxu0 %v2554_v50 }
0x192e   :  { %1639 = vmatpush.msrb.mxu3 %v2573_v51  ;;  %1659 = vmatpush.msra.mxu0 %v2578_v32 }
0x1930   :  { %1640 = vmatpush.msrb.mxu3 %v2585_v63  ;;  %1660 = vmatpush.msra.mxu0 %v2590_v52 }
0x1932   :  { %1641 = vmatpush.msrb.mxu3 %v2602_v54  ;;  %1661 = vmatpush.msra.mxu0 %v2597_v53 }
0x1934   :  { %1642 = vmatpush.msrb.mxu3 %v2607_v55  ;;  %1662 = vmatpush.msra.mxu0 %v2612_v56 }
0x1936   :  { %1643 = vmatpush.msrb.mxu3 %v2619_v58  ;;  %1663 = vmatpush.msra.mxu0 %v2624_v59 }
0x19a4   :  { %v1353_v24 = vpop.f32.mrf.mxu0 }
0x19a5   :  { %v1354_v31 = vadd.f32 %v1353_v24, %v2846_v30 }
0x19aa   :  { %v1333_v61 = vpop.f32.mrf.mxu3 }
0x19ab   :  { %v1334_v57 = vadd.f32 %v1333_v61, %v2837_v29 }
0x19ad   :  { %v1356_v17 = vadd.f32 %v1334_v57, %v1309_v16 }
0x19af   :  { %v1939_v19 = vmul.f32 -1.442695, %v1356_v17 }
0x19b1   :  { %2063 = vpow2.f32 %v1939_v19 }
0x19b7   :  { %v2064_v3 = vpop.eup %2063 }
0x19b8   :  { %v1360_v26 = vadd.f32 1.0, %v2064_v3 }
0x19ba   :  { %2065 = vrcp.f32 %v1360_v26  ;;  %v1372_v8 = vand.u32 2147483648, %v1360_v26  ;;  %v1370_v23 = vand.u32 2147483647, %v1360_v26  ;;  %vm1366_vm15 = vweird.f32 %v1360_v26 }
0x19bc   :  { %v1373_v60 = vor.u32 1.1754944e-38, %v1372_v8  ;;  %vm1371_vm2 = vcmp.eq.f32.partialorder %v1370_v23, 8.507059e+37 }
0x19c0   :  { %v2066_v4 = vpop.eup %2065 }
0x19c1   :  { %v1362_v20 = vmul.f32 %v2066_v4, %v1360_v26  ;;  %vm1367_vm13 = vweird.f32 %v2066_v4 }
0x19c2   :  { %vm1368_vm1 = vmor %vm1366_vm15, %vm1367_vm13 }
0x19c3   :  { %v1363_v6 = vsub.f32 1.0, %v1362_v20 }
0x19c5   :  { %v1364_v22 = vmul.f32 %v2066_v4, %v1363_v6 }
0x19c7   :  { %v1365_v28 = vadd.f32 %v2066_v4, %v1364_v22 }
0x19c9   :  { %v1369_v33 = vsel %vm1368_vm1, %v2066_v4, %v1365_v28 }
0x19ca   :  { %v1374_v34 = vsel %vm1371_vm2, %v1373_v60, %v1369_v33 }
0x19cb   :  { %v1376_v36 = vmul.f32 %v1374_v34, %v1354_v31  ;;  %v1379_v39 = vsub.f32 1.0, %v1374_v34  ;;  %v1385_v43 = vmul.f32 %v1374_v34, %v1308_v46  ;;  %v1465_v31 = vadd.f32 %v2832_v15, %v2815_v2 }
0x19cd   :  { %v1377_v37 = vadd.f32 %v1376_v36, %v1310_v12 }
0x19cf   :  { %2067 = vtanh.f32 %v1377_v37 }
0x19d5   :  { %v2068_v38 = vpop.eup %2067 }
0x19d6   :  { %1381 = vrot.lane.b32.xlu1 %v2068_v38, %s2129_s22 }
0x1a48   :  { %v1382_v40 = vpop.permute.xlu1 %1381 }
0x1a49   :  { %v1384_v44 = vmul.f32 %v1382_v40, %v1379_v39 }
0x1a4b   :  { %v1386_v14 = vadd.f32 %v1385_v43, %v1384_v44 }
0x1a4d   :  { %1390 = vrot.lane.b32.xlu0 %v1386_v14, %s2129_s22 }
0x1abf   :  { %v2917_v45 = vpop.permute.xlu0 %1390 }
0x1ac0   :  { %1940 = vmatmul.msk.f32.vlgmr.msra.gmra.mxu1 %vm39_vm0, %v2917_v45  ;;  %1941 = vmatmul.msk.f32.vlgmr.msra.gmra.mxu2 %vm39_vm0, %v2917_v45 }
0x1ac1   :  { %1714 = vmatpush.msra.mxu1 %v2527_v11  ;;  %1734 = vmatpush.msra.mxu2 %v2532_v48  ;;  %v1117_v11 = vpop.f32.mrf.mxu2 }
0x1ac2   :  { %v1388_v26 = vadd.f32 %v2851_v35, %v1117_v11 }
0x1ac3   :  { %1715 = vmatpush.msra.mxu1 %v2537_v49  ;;  %1735 = vmatpush.msra.mxu2 %v2544_v41 }
0x1ac5   :  { %1716 = vmatpush.msra.mxu1 %v2549_v9  ;;  %1736 = vmatpush.msra.mxu2 %v2554_v50  ;;  %v1387_v9 = vadd.f32 %v2832_v15, %v2804_v62 }
0x1ac7   :  { %1717 = vmatpush.msra.mxu1 %v2573_v51  ;;  %1737 = vmatpush.msra.mxu2 %v2578_v32 }
0x1ac9   :  { %1718 = vmatpush.msra.mxu1 %v2585_v63  ;;  %1738 = vmatpush.msra.mxu2 %v2590_v52  ;;  %v2939_v48 = vpop.f32.mrf.mxu2 }
0x1acb   :  { %1719 = vmatpush.msra.mxu1 %v2602_v54  ;;  %1739 = vmatpush.msra.mxu2 %v2597_v53 }
0x1acd   :  { %1720 = vmatpush.msra.mxu1 %v2607_v55  ;;  %1740 = vmatpush.msra.mxu2 %v2612_v56 }
0x1acf   :  { %1721 = vmatpush.msra.mxu1 %v2619_v58  ;;  %1741 = vmatpush.msra.mxu2 %v2624_v59 }
0x1ad1   :  { %v2941_v49 = vpop.f32.mrf.mxu2 }
0x1ad9   :  { %v2946_v63 = vpop.f32.mrf.mxu2 }
0x1ae1   :  { %v2948_v54 = vpop.f32.mrf.mxu2 }
0x1b3d   :  { %v1411_v41 = vpop.f32.mrf.mxu1 }
0x1b3e   :  { %v1412_v50 = vadd.f32 %v1411_v41, %v2837_v29 }
0x1b40   :  { %v1434_v51 = vadd.f32 %v1412_v50, %v1387_v9 }
0x1b42   :  { %v1942_v32 = vmul.f32 -1.442695, %v1434_v51 }
0x1b43   :  { %v1431_v62 = vpop.f32.mrf.mxu2 }
0x1b44   :  { %2069 = vpow2.f32 %v1942_v32  ;;  %v1432_v17 = vadd.f32 %v1431_v62, %v2846_v30  ;;  %v1466_v32 = vadd.f32 %v2851_v35, %v2939_v48 }
0x1b4a   :  { %v2070_v52 = vpop.eup %2069 }
0x1b4b   :  { %v1438_v53 = vadd.f32 1.0, %v2070_v52 }
0x1b4d   :  { %2071 = vrcp.f32 %v1438_v53  ;;  %v1450_v59 = vand.u32 2147483648, %v1438_v53  ;;  %v1448_v61 = vand.u32 2147483647, %v1438_v53  ;;  %vm1444_vm4 = vweird.f32 %v1438_v53 }
0x1b4f   :  { %v1451_v57 = vor.u32 1.1754944e-38, %v1450_v59  ;;  %vm1449_vm8 = vcmp.eq.f32.partialorder %v1448_v61, 8.507059e+37 }
0x1b53   :  { %v2072_v55 = vpop.eup %2071 }
0x1b54   :  { %v1440_v56 = vmul.f32 %v2072_v55, %v1438_v53  ;;  %vm1445_vm3 = vweird.f32 %v2072_v55 }
0x1b55   :  { %vm1446_vm7 = vmor %vm1444_vm4, %vm1445_vm3 }
0x1b56   :  { %v1441_v58 = vsub.f32 1.0, %v1440_v56 }
0x1b58   :  { %v1442_v46 = vmul.f32 %v2072_v55, %v1441_v58 }
0x1b5a   :  { %v1443_v16 = vadd.f32 %v2072_v55, %v1442_v46 }
0x1b5c   :  { %v1447_v19 = vsel %vm1446_vm7, %v2072_v55, %v1443_v16  ;;  %v1543_v16 = vadd.f32 %v2832_v15, %v2819_v5 }
0x1b5d   :  { %v1452_v3 = vsel %vm1449_vm8, %v1451_v57, %v1447_v19  ;;  %vm731_vm8 = vcmask 326912  }
0x1b5e   :  { %v1454_v4 = vmul.f32 %v1452_v3, %v1432_v17  ;;  %v1457_v8 = vsub.f32 1.0, %v1452_v3  ;;  %v1463_v23 = vmul.f32 %v1452_v3, %v1386_v14 }
0x1b60   :  { %v1455_v20 = vadd.f32 %v1454_v4, %v1388_v26 }
0x1b62   :  { %2073 = vtanh.f32 %v1455_v20 }
0x1b68   :  { %v2074_v6 = vpop.eup %2073 }
0x1b69   :  { %1459 = vrot.lane.b32.xlu2 %v2074_v6, %s2129_s22 }
0x1bc3   :  { %v1460_v22 = vpop.permute.xlu2 %1459 }
0x1bc4   :  { %v1462_v24 = vmul.f32 %v1460_v22, %v1457_v8 }
0x1bc6   :  { %v1464_v27 = vadd.f32 %v1463_v23, %v1462_v24 }
0x1bc8   :  { %1468 = vrot.lane.b32.xlu1 %v1464_v27, %s2129_s22 }
0x1c3a   :  { %v2954_v28 = vpop.permute.xlu1 %1468 }
0x1c3b   :  { %1943 = vmatmul.msk.f32.vlgmr.msra.gmra.mxu3 %vm39_vm0, %v2954_v28  ;;  %1944 = vmatmul.msk.f32.vlgmr.msrb.gmra.mxu0 %vm39_vm0, %v2954_v28 }
0x1cb8   :  { %v1509_v11 = vpop.f32.mrf.mxu0 }
0x1cb9   :  { %v1510_v9 = vadd.f32 %v1509_v11, %v2846_v30  ;;  %v1782_v11 = vld [vmem:[%s3155_s0 + $0x210] sm:$0xff] }
0x1cbe   :  { %v1489_v60 = vpop.f32.mrf.mxu3 }
0x1cbf   :  { %v1490_v12 = vadd.f32 %v1489_v60, %v2837_v29 }
0x1cc1   :  { %v1512_v33 = vadd.f32 %v1490_v12, %v1465_v31 }
0x1cc3   :  { %v1945_v34 = vmul.f32 -1.442695, %v1512_v33  ;;  %v1544_v33 = vadd.f32 %v2851_v35, %v2941_v49  ;;  %v1783_v49 = vld [vmem:[%s3155_s0 + $0x220] sm:$0xff] }
0x1cc5   :  { %2075 = vpow2.f32 %v1945_v34 }
0x1ccb   :  { %v2076_v36 = vpop.eup %2075 }
0x1ccc   :  { %v1516_v37 = vadd.f32 1.0, %v2076_v36 }
0x1cce   :  { %2077 = vrcp.f32 %v1516_v37  ;;  %v1528_v43 = vand.u32 2147483648, %v1516_v37  ;;  %v1526_v14 = vand.u32 2147483647, %v1516_v37  ;;  %vm1522_vm13 = vweird.f32 %v1516_v37 }
0x1cd0   :  { %v1529_v2 = vor.u32 1.1754944e-38, %v1528_v43  ;;  %vm1527_vm1 = vcmp.eq.f32.partialorder %v1526_v14, 8.507059e+37  ;;  %v1784_v14 = vld [vmem:[%s3155_s0 + $0x230] sm:$0xff] }
0x1cd1   :  { %1799 = vmatpush.msra.mxu3 %v1784_v14 }
0x1cd3   :  { %1800 = vmatpush.msra.mxu3 %v1783_v49 }
0x1cd4   :  { %v2078_v38 = vpop.eup %2077 }
0x1cd5   :  { %v1518_v39 = vmul.f32 %v2078_v38, %v1516_v37  ;;  %vm1523_vm11 = vweird.f32 %v2078_v38  ;;  %1801 = vmatpush.msra.mxu3 %v1782_v11 }
0x1cd6   :  { %vm1524_vm15 = vmor %vm1522_vm13, %vm1523_vm11 }
0x1cd7   :  { %v1519_v40 = vsub.f32 1.0, %v1518_v39 }
0x1cd9   :  { %v1520_v44 = vmul.f32 %v2078_v38, %v1519_v40 }
0x1cdb   :  { %v1521_v41 = vadd.f32 %v2078_v38, %v1520_v44 }
0x1cdd   :  { %v1525_v50 = vsel %vm1524_vm15, %v2078_v38, %v1521_v41  ;;  %v1781_v41 = vld [vmem:[%s3155_s0 + $0x200] sm:$0xff] }
0x1cde   :  { %v1530_v51 = vsel %vm1527_vm1, %v1529_v2, %v1525_v50  ;;  %1802 = vmatpush.msra.mxu3 %v1781_v41  ;;  %v732_v2 = vsel %vm731_vm8, %v2431_v18, -inf  ;;  %v1779_v50 = vld [vmem:[%s3155_s0 + $0x1e0] sm:$0xff] }
0x1cdf   :  { %v1532_v52 = vmul.f32 %v1530_v51, %v1510_v9  ;;  %v1535_v56 = vsub.f32 1.0, %v1530_v51  ;;  %v1541_v59 = vmul.f32 %v1530_v51, %v1464_v27  ;;  %v1780_v9 = vld [vmem:[%s3155_s0 + $0x1f0] sm:$0xff] }
0x1ce0   :  { %1803 = vmatpush.msra.mxu3 %v1780_v9  ;;  %v1778_v51 = vld [vmem:[%s3155_s0 + $0x1d0] sm:$0xff] }
0x1ce1   :  { %v1533_v53 = vadd.f32 %v1532_v52, %v1466_v32  ;;  %v1777_v32 = vld [vmem:[%s3155_s0 + $0x1c0] sm:$0xff] }
0x1ce2   :  { %1804 = vmatpush.msra.mxu3 %v1779_v50 }
0x1ce3   :  { %2079 = vtanh.f32 %v1533_v53 }
0x1ce4   :  { %1805 = vmatpush.msra.mxu3 %v1778_v51 }
0x1ce6   :  { %1806 = vmatpush.msra.mxu3 %v1777_v32 }
0x1ce9   :  { %v2080_v55 = vpop.eup %2079 }
0x1cea   :  { %1537 = vrot.lane.b32.xlu0 %v2080_v55, %s2129_s22 }
0x1d5c   :  { %v1538_v58 = vpop.permute.xlu0 %1537 }
0x1d5d   :  { %v1540_v46 = vmul.f32 %v1538_v58, %v1535_v56 }
0x1d5f   :  { %v1542_v61 = vadd.f32 %v1541_v59, %v1540_v46  ;;  %v3034_v46 = vld [vmem:[%s3155_s0 + $0x460] ss:$0 sm:$0xff] }
0x1d61   :  { %1546 = vrot.lane.b32.xlu2 %v1542_v61, %s2129_s22 }
0x1dbb   :  { %v2968_v62 = vpop.permute.xlu2 %1546 }
0x1dbc   :  { %1946 = vmatmul.msk.f32.vlgmr.msrb.gmra.mxu1 %vm39_vm0, %v2968_v62  ;;  %1947 = vmatmul.msk.f32.vlgmr.msrb.gmra.mxu2 %vm39_vm0, %v2968_v62 }
0x1e39   :  { %v1567_v48 = vpop.f32.mrf.mxu1 }
0x1e3a   :  { %v1568_v57 = vadd.f32 %v1567_v48, %v2837_v29 }
0x1e3c   :  { %v1590_v17 = vadd.f32 %v1568_v57, %v1543_v16 }
0x1e3e   :  { %v1948_v19 = vmul.f32 -1.442695, %v1590_v17 }
0x1e3f   :  { %v1587_v24 = vpop.f32.mrf.mxu2 }
0x1e40   :  { %2081 = vpow2.f32 %v1948_v19  ;;  %v1588_v60 = vadd.f32 %v1587_v24, %v2846_v30 }
0x1e46   :  { %v2082_v3 = vpop.eup %2081 }
0x1e47   :  { %v1594_v26 = vadd.f32 1.0, %v2082_v3 }
0x1e49   :  { %2083 = vrcp.f32 %v1594_v26  ;;  %v1606_v8 = vand.u32 2147483648, %v1594_v26  ;;  %v1604_v23 = vand.u32 2147483647, %v1594_v26  ;;  %vm1600_vm3 = vweird.f32 %v1594_v26 }
0x1e4b   :  { %v1607_v5 = vor.u32 1.1754944e-38, %v1606_v8  ;;  %vm1605_vm7 = vcmp.eq.f32.partialorder %v1604_v23, 8.507059e+37 }
0x1e4f   :  { %v2084_v4 = vpop.eup %2083 }
0x1e50   :  { %v1596_v20 = vmul.f32 %v2084_v4, %v1594_v26  ;;  %vm1601_vm2 = vweird.f32 %v2084_v4 }
0x1e51   :  { %vm1602_vm4 = vmor %vm1600_vm3, %vm1601_vm2  ;;  %vm761_vm2 = vcmask 392512  }
0x1e52   :  { %v1597_v6 = vsub.f32 1.0, %v1596_v20 }
0x1e54   :  { %v1598_v22 = vmul.f32 %v2084_v4, %v1597_v6 }
0x1e56   :  { %v1599_v27 = vadd.f32 %v2084_v4, %v1598_v22 }
0x1e58   :  { %v1603_v31 = vsel %vm1602_vm4, %v2084_v4, %v1599_v27 }
0x1e59   :  { %v1608_v12 = vsel %vm1605_vm7, %v1607_v5, %v1603_v31 }
0x1e5a   :  { %v1610_v34 = vmul.f32 %v1608_v12, %v1588_v60  ;;  %v1613_v38 = vsub.f32 1.0, %v1608_v12  ;;  %v1619_v40 = vmul.f32 %v1608_v12, %v1542_v61  ;;  %v1622_v12 = vadd.f32 %v2851_v35, %v2946_v63 }
0x1e5c   :  { %v1611_v36 = vadd.f32 %v1610_v34, %v1544_v33 }
0x1e5e   :  { %2085 = vtanh.f32 %v1611_v36 }
0x1e64   :  { %v2086_v37 = vpop.eup %2085 }
0x1e65   :  { %1615 = vrot.lane.b32.xlu1 %v2086_v37, %s2129_s22 }
0x1ed7   :  { %v1616_v39 = vpop.permute.xlu1 %1615 }
0x1ed8   :  { %v1618_v43 = vmul.f32 %v1616_v39, %v1613_v38 }
0x1eda   :  { %v2981_v44 = vadd.f32 %v1619_v40, %v1618_v43  ;;  %v762_v43 = vsel %vm761_vm2, %v2431_v18, -inf }
0x1edc   :  { %1624 = vrot.lane.b32.xlu0 %v2981_v44, %s2129_s22 }
0x1f06   :  { %733 = vmax.xlane.f32.xlu0 %v732_v2 }
0x1f4e   :  { %v1625_v52 = vpop.permute.xlu0 %1624 }
0x1f4f   :  { %1949 = vmatmul.msk.f32.vlgmr.msrb.gmra.mxu3 %vm39_vm0, %v1625_v52  ;;  %1950 = vmatmul.msk.f32.vlgmr.msra.gmra.mxu0 %vm39_vm0, %v1625_v52 }
0x1f57   :  { %1955 = vmatmul.msk.f32.vlgmr.msra.gmra.mxu3 %vm39_vm0, %v2857_v0 }
0x1f5f   :  { %1956 = vmatmul.msk.f32.gmra.mxu3 %vm39_vm0, %v2888_v47 }
0x1f67   :  { %1957 = vmatmul.msk.f32.gmra.mxu3 %vm39_vm0, %v2917_v45  ;;  %v1621_v45 = vadd.f32 %v2832_v15, %v2823_v7 }
0x1f6f   :  { %1958 = vmatmul.msk.f32.gmra.mxu3 %vm39_vm0, %v2954_v28 }
0x1f77   :  { %1959 = vmatmul.msk.f32.gmra.mxu3 %vm39_vm0, %v2968_v62 }
0x1f79   :  { %v734_v53 = vpop.xlane.xlu0 %733 }
0x1f7a   :  { %v735_v55 = vsub.f32 %v2431_v18, %v734_v53 }
0x1f7c   :  { %v736_v56 = vmul.f32 1.442695, %v735_v55 }
0x1f7e   :  { %2087 = vpow2.f32 %v736_v56  ;;  %v1699_v56 = vadd.f32 %v2832_v15, %v2827_v13 }
0x1f7f   :  { %1960 = vmatmul.msk.f32.gmra.mxu3 %vm39_vm0, %v1625_v52 }
0x1f84   :  { %v3024_v0 = vpop.eup %2087 }
0x1f85   :  { %739 = vrot.lane.b32.xlu0 %v3024_v0, %s2130_s29 }
0x1fcc   :  { %v1665_v22 = vpop.f32.mrf.mxu0 }
0x1fcd   :  { %v1666_v27 = vadd.f32 %v1665_v22, %v2846_v30 }
0x1fd2   :  { %v1645_v47 = vpop.f32.mrf.mxu3 }
0x1fd3   :  { %v1646_v28 = vadd.f32 %v1645_v47, %v2837_v29 }
0x1fd5   :  { %v1668_v58 = vadd.f32 %v1646_v28, %v1621_v45 }
0x1fd7   :  { %v1951_v59 = vmul.f32 -1.442695, %v1668_v58 }
0x1fd9   :  { %2089 = vpow2.f32 %v1951_v59 }
0x1fda   :  { %v1808_v61 = vpop.f32.mrf.mxu3 }
0x1fdb   :  { %v1809_v62 = vadd.f32 %v1808_v61, %v3034_v46 }
0x1fdd   :  { %1832 = vst [vmem:[%s3159_s3] sm:$0xff] %v1809_v62 }
0x1fdf   :  { %v2090_v48 = vpop.eup %2089 }
0x1fe0   :  { %v1672_v16 = vadd.f32 1.0, %v2090_v48 }
0x1fe2   :  { %2091 = vrcp.f32 %v1672_v16  ;;  %v1811_v7 = vpop.f32.mrf.mxu3  ;;  %v1684_v20 = vand.u32 2147483648, %v1672_v16  ;;  %v1682_v8 = vand.u32 2147483647, %v1672_v16  ;;  %vm1678_vm13 = vweird.f32 %v1672_v16 }
0x1fe3   :  { %v1812_v57 = vadd.f32 %v1811_v7, %v3034_v46 }
0x1fe4   :  { %v1685_v24 = vor.u32 1.1754944e-38, %v1684_v20  ;;  %vm1683_vm1 = vcmp.eq.f32.partialorder %v1682_v8, 8.507059e+37  ;;  %v1700_v20 = vadd.f32 %v2851_v35, %v2948_v54 }
0x1fe5   :  { %1833 = vst [vmem:[%s3159_s3 + $0x8] sm:$0xff] %v1812_v57 }
0x1fe8   :  { %v2092_v17 = vpop.eup %2091 }
0x1fe9   :  { %v1674_v19 = vmul.f32 %v2092_v17, %v1672_v16  ;;  %vm1679_vm11 = vweird.f32 %v2092_v17 }
0x1fea   :  { %v1814_v3 = vpop.f32.mrf.mxu3  ;;  %vm1680_vm15 = vmor %vm1678_vm13, %vm1679_vm11  ;;  %vm702_vm11 = vcmask 261248  }
0x1feb   :  { %v1675_v26 = vsub.f32 1.0, %v1674_v19  ;;  %v1815_v4 = vadd.f32 %v1814_v3, %v3034_v46 }
0x1fed   :  { %v1676_v6 = vmul.f32 %v2092_v17, %v1675_v26  ;;  %1834 = vst [vmem:[%s3159_s3 + $0x10] sm:$0xff] %v1815_v4 }
0x1fef   :  { %v1677_v23 = vadd.f32 %v2092_v17, %v1676_v6 }
0x1ff1   :  { %v1681_v5 = vsel %vm1680_vm15, %v2092_v17, %v1677_v23  ;;  %v703_v23 = vsel %vm702_vm11, %v2431_v18, -inf }
0x1ff2   :  { %v1817_v60 = vpop.f32.mrf.mxu3  ;;  %v1686_v31 = vsel %vm1683_vm1, %v1685_v24, %v1681_v5 }
0x1ff3   :  { %v1818_v33 = vadd.f32 %v1817_v60, %v3034_v46  ;;  %v1688_v34 = vmul.f32 %v1686_v31, %v1666_v27  ;;  %v1691_v14 = vsub.f32 1.0, %v1686_v31  ;;  %v1697_v11 = vmul.f32 %v1686_v31, %v2981_v44 }
0x1ff5   :  { %1835 = vst [vmem:[%s3159_s3 + $0x18] sm:$0xff] %v1818_v33  ;;  %v1689_v36 = vadd.f32 %v1688_v34, %v1622_v12 }
0x1ff7   :  { %2093 = vtanh.f32 %v1689_v36  ;;  %v740_v52 = vpop.permute.xlu0 %739 }
0x1ff8   :  { %v743_v53 = vsel %vm742_vm10, %v740_v52, 0.0 }
0x1ffa   :  { %v1820_v37 = vpop.f32.mrf.mxu3 }
0x1ffb   :  { %v1821_v38 = vadd.f32 %v1820_v37, %v3034_v46 }
0x1ffd   :  { %v2094_v39 = vpop.eup %2093  ;;  %1836 = vst [vmem:[%s3159_s3 + $0x20] sm:$0xff] %v1821_v38 }
0x1ffe   :  { %1693 = vrot.lane.b32.xlu2 %v2094_v39, %s2129_s22 }
0x2002   :  { %v1823_v63 = vpop.f32.mrf.mxu3 }
0x2003   :  { %v1824_v40 = vadd.f32 %v1823_v63, %v3034_v46 }
0x2005   :  { %1837 = vst [vmem:[%s3159_s3 + $0x28] sm:$0xff] %v1824_v40 }
0x2027   :  { %763 = vmax.xlane.f32.xlu2 %v762_v43 }
0x2058   :  { %v1694_v49 = vpop.permute.xlu2 %1693 }
0x2059   :  { %v1696_v41 = vmul.f32 %v1694_v49, %v1691_v14 }
0x205b   :  { %v1698_v2 = vadd.f32 %v1697_v11, %v1696_v41 }
0x205d   :  { %1702 = vrot.lane.b32.xlu1 %v1698_v2, %s2129_s22 }
0x209a   :  { %v764_v9 = vpop.xlane.xlu2 %763 }
0x209b   :  { %v765_v50 = vsub.f32 %v2431_v18, %v764_v9 }
0x209d   :  { %v766_v51 = vmul.f32 1.442695, %v765_v50 }
0x209f   :  { %2095 = vpow2.f32 %v766_v51 }
0x20a5   :  { %v3068_v32 = vpop.eup %2095 }
0x20a6   :  { %769 = vrot.lane.b32.xlu2 %v3068_v32, %s2135_s7 }
0x20cf   :  { %v1703_v55 = vpop.permute.xlu1 %1702  ;;  %744 = vadd.xlane.f32.xlu2 %v743_v53 }
0x20d0   :  { %1952 = vmatmul.msk.f32.vlgmr.msra.gmra.mxu1 %vm39_vm0, %v1703_v55  ;;  %1953 = vmatmul.msk.f32.vlgmr.msra.gmra.mxu2 %vm39_vm0, %v1703_v55 }
0x20d1   :  { %1961 = vmatmul.msk.f32.gmra.mxu3 %vm39_vm0, %v1703_v55 }
0x2100   :  { %v770_v37 = vpop.permute.xlu2 %769 }
0x2101   :  { %v772_v14 = vsel %vm742_vm10, %v770_v37, 0.0 }
0x214d   :  { %v1723_v44 = vpop.f32.mrf.mxu1 }
0x214e   :  { %v1724_v47 = vadd.f32 %v1723_v44, %v2837_v29 }
0x2150   :  { %v1746_v45 = vadd.f32 %v1724_v47, %v1699_v56 }
0x2152   :  { %v1954_v28 = vmul.f32 -1.442695, %v1746_v45 }
0x2153   :  { %v1743_v29 = vpop.f32.mrf.mxu2 }
0x2154   :  { %2097 = vpow2.f32 %v1954_v28  ;;  %v1826_v58 = vpop.f32.mrf.mxu3  ;;  %v1744_v3 = vadd.f32 %v1743_v29, %v2846_v30  ;;  %v950_v30 = vld [vmem:[%s3155_s0 + $0x490] sm:$0xff]  ;;  %v2126_v29 = vld [vmem:[%s3158_s2] sm:$0xff] }
0x2155   :  { %v1827_v59 = vadd.f32 %v1826_v58, %v3034_v46  ;;  %v974_v35 = vadd.f32 %v2841_v25, %v950_v30  ;;  %v745_v25 = vpop.xlane.xlu2 %744 }
0x2156   :  { %v757_v9 = vand.u32 2147483648, %v745_v25  ;;  %vm751_vm15 = vweird.f32 %v745_v25  ;;  %v755_v50 = vand.u32 2147483647, %v745_v25 }
0x2157   :  { %1838 = vst [vmem:[%s3159_s3 + $0x30] sm:$0xff] %v1827_v59  ;;  %v1914_v38 = vmul.f32 -1.442695, %v974_v35 }
0x2158   :  { %v758_v53 = vor.u32 1.1754944e-38, %v757_v9  ;;  %vm756_vm2 = vcmp.eq.f32.partialorder %v755_v50, 8.507059e+37 }
0x215a   :  { %v2098_v61 = vpop.eup %2097 }
0x215b   :  { %v1750_v62 = vadd.f32 1.0, %v2098_v61 }
0x215d   :  { %2099 = vrcp.f32 %v1750_v62  ;;  %v1762_v57 = vand.u32 2147483648, %v1750_v62  ;;  %v1760_v15 = vand.u32 2147483647, %v1750_v62  ;;  %vm1756_vm4 = vweird.f32 %v1750_v62 }
0x215f   :  { %v1763_v19 = vor.u32 1.1754944e-38, %v1762_v57  ;;  %vm1761_vm8 = vcmp.eq.f32.partialorder %v1760_v15, 8.507059e+37 }
0x2163   :  { %v2100_v48 = vpop.eup %2099 }
0x2164   :  { %v1752_v16 = vmul.f32 %v2100_v48, %v1750_v62  ;;  %vm1757_vm3 = vweird.f32 %v2100_v48 }
0x2165   :  { %vm1758_vm7 = vmor %vm1756_vm4, %vm1757_vm3 }
0x2166   :  { %v1753_v7 = vsub.f32 1.0, %v1752_v16 }
0x2168   :  { %v1754_v13 = vmul.f32 %v2100_v48, %v1753_v7 }
0x216a   :  { %v1755_v17 = vadd.f32 %v2100_v48, %v1754_v13 }
0x216c   :  { %v1759_v26 = vsel %vm1758_vm7, %v2100_v48, %v1755_v17 }
0x216d   :  { %v1764_v4 = vsel %vm1761_vm8, %v1763_v19, %v1759_v26 }
0x216e   :  { %v1766_v6 = vmul.f32 %v1764_v4, %v1744_v3  ;;  %v1769_v24 = vsub.f32 1.0, %v1764_v4  ;;  %v1775_v5 = vmul.f32 %v1764_v4, %v1698_v2 }
0x2170   :  { %v1767_v8 = vadd.f32 %v1766_v6, %v1700_v20 }
0x2172   :  { %2101 = vtanh.f32 %v1767_v8 }
0x2173   :  { %2103 = vtanh.f32 %v974_v35 }
0x2178   :  { %v2102_v22 = vpop.eup %2101 }
0x2179   :  { %1771 = vrot.lane.b32.xlu1 %v2102_v22, %s2129_s22  ;;  %v2104_v31 = vpop.eup %2103 }
0x21a3   :  { %704 = vmax.xlane.f32.xlu1 %v703_v23 }
0x21eb   :  { %v1772_v27 = vpop.permute.xlu1 %1771 }
0x21ec   :  { %v1774_v60 = vmul.f32 %v1772_v27, %v1769_v24 }
0x21ee   :  { %v1776_v54 = vadd.f32 %v1775_v5, %v1774_v60 }
0x21f0   :  { %1787 = vrot.lane.b32.xlu1 %v1776_v54, %s2129_s22 }
0x21f8   :  { %1019 = vrot.lane.b32.xlu1 %v2104_v31, %s2128_s21 }
0x2216   :  { %v705_v12 = vpop.xlane.xlu1 %704 }
0x2217   :  { %v706_v33 = vsub.f32 %v2431_v18, %v705_v12 }
0x2219   :  { %v707_v34 = vmul.f32 1.442695, %v706_v33 }
0x221b   :  { %2105 = vpow2.f32 %v707_v34 }
0x221c   :  { %2107 = vrcp.f32 %v745_v25 }
0x221d   :  { %2109 = vpow2.f32 %v1914_v38 }
0x2221   :  { %v3094_v36 = vpop.eup %2105 }
0x2222   :  { %710 = vrot.lane.b32.xlu0 %v3094_v36, %s2136_s12  ;;  %v2108_v39 = vpop.eup %2107 }
0x2223   :  { %v2110_v63 = vpop.eup %2109  ;;  %v747_v40 = vmul.f32 %v2108_v39, %v745_v25  ;;  %vm752_vm13 = vweird.f32 %v2108_v39 }
0x2224   :  { %v999_v43 = vadd.f32 1.0, %v2110_v63  ;;  %vm753_vm1 = vmor %vm751_vm15, %vm752_vm13 }
0x2225   :  { %v748_v49 = vsub.f32 1.0, %v747_v40 }
0x2226   :  { %2111 = vrcp.f32 %v999_v43  ;;  %v1011_v58 = vand.u32 2147483648, %v999_v43  ;;  %vm1005_vm4 = vweird.f32 %v999_v43  ;;  %v1009_v59 = vand.u32 2147483647, %v999_v43 }
0x2227   :  { %v749_v11 = vmul.f32 %v2108_v39, %v748_v49 }
0x2228   :  { %v1012_v62 = vor.u32 1.1754944e-38, %v1011_v58  ;;  %vm1010_vm8 = vcmp.eq.f32.partialorder %v1009_v59, 8.507059e+37 }
0x2229   :  { %v750_v2 = vadd.f32 %v2108_v39, %v749_v11 }
0x222b   :  { %v754_v52 = vsel %vm753_vm1, %v2108_v39, %v750_v2  ;;  %v951_v39 = vld [vmem:[%s3155_s0 + $0x498] sm:$0xff]  ;;  %v1863_v2 = vsel %vm106_vm5, %v2431_v18, %v2506_v42 }
0x222c   :  { %v2112_v41 = vpop.eup %2111  ;;  %v759_v55 = vsel %vm756_vm2, %v758_v53, %v754_v52  ;;  %v994_v63 = vadd.f32 %v2879_v1, %v951_v39 }
0x222d   :  { %v1001_v51 = vmul.f32 %v2112_v41, %v999_v43  ;;  %v760_v56 = vmul.f32 %v3024_v0, %v759_v55  ;;  %vm1006_vm3 = vweird.f32 %v2112_v41 }
0x222e   :  { %vm1007_vm7 = vmor %vm1005_vm4, %vm1006_vm3 }
0x222f   :  { %v1002_v44 = vsub.f32 1.0, %v1001_v51 }
0x2231   :  { %v1003_v47 = vmul.f32 %v2112_v41, %v1002_v44 }
0x2233   :  { %v1004_v28 = vadd.f32 %v2112_v41, %v1003_v47 }
0x2235   :  { %v1008_v61 = vsel %vm1007_vm7, %v2112_v41, %v1004_v28  ;;  %vm1868_vm7 = vcmask 916480  }
0x2236   :  { %v3102_v48 = vsel %vm1010_vm8, %v1012_v62, %v1008_v61 }
0x2237   :  { %v1017_v17 = vmul.f32 %v2126_v29, %v3102_v48 }
0x224c   :  { %773 = vadd.xlane.f32.xlu0 %v772_v14 }
0x2260   :  { %791 = vrot.lane.b32.xlu0 %v760_v56, %s2130_s29 }
0x2262   :  { %v1788_v45 = vpop.permute.xlu1 %1787 }
0x2263   :  { %1962 = vmatmul.msk.f32.gmra.mxu3 %vm39_vm0, %v1788_v45 }
0x226a   :  { %v1020_v16 = vpop.permute.xlu1 %1019 }
0x226b   :  { %v1022_v0 = vmul.f32 %v1020_v16, %v3102_v48 }
0x226d   :  { %1024 = vrot.lane.b32.xlu2 %v1022_v0, %s2128_s21 }
0x2294   :  { %v711_v7 = vpop.permute.xlu0 %710 }
0x2295   :  { %v713_v57 = vsel %vm677_vm9, %v711_v7, 0.0 }
0x2296   :  { %714 = vadd.xlane.f32.xlu1 %v713_v57 }
0x22bf   :  { %v774_v13 = vpop.xlane.xlu0 %773 }
0x22c0   :  { %2113 = vrcp.f32 %v774_v13  ;;  %v786_v20 = vand.u32 2147483648, %v774_v13  ;;  %v784_v8 = vand.u32 2147483647, %v774_v13  ;;  %vm780_vm9 = vweird.f32 %v774_v13 }
0x22c2   :  { %v787_v23 = vor.u32 1.1754944e-38, %v786_v20  ;;  %vm785_vm15 = vcmp.eq.f32.partialorder %v784_v8, 8.507059e+37 }
0x22c6   :  { %v2114_v15 = vpop.eup %2113 }
0x22c7   :  { %v776_v19 = vmul.f32 %v2114_v15, %v774_v13  ;;  %v1025_v3 = vpop.permute.xlu2 %1024  ;;  %vm781_vm11 = vweird.f32 %v2114_v15 }
0x22c8   :  { %v1027_v26 = vadd.f32 %v1025_v3, %v1017_v17  ;;  %vm782_vm13 = vmor %vm780_vm9, %vm781_vm11 }
0x22c9   :  { %v777_v4 = vsub.f32 1.0, %v776_v19 }
0x22ca   :  { %2115 = vtanh.f32 %v1027_v26 }
0x22cb   :  { %v778_v6 = vmul.f32 %v2114_v15, %v777_v4 }
0x22cd   :  { %v779_v22 = vadd.f32 %v2114_v15, %v778_v6 }
0x22cf   :  { %v783_v30 = vsel %vm782_vm13, %v2114_v15, %v779_v22 }
0x22d0   :  { %v2116_v24 = vpop.eup %2115  ;;  %v788_v27 = vsel %vm785_vm15, %v787_v23, %v783_v30 }
0x22d1   :  { %1030 = vrot.lane.b32.xlu2 %v2116_v24, %s2128_s21  ;;  %v789_v5 = vmul.f32 %v3068_v32, %v788_v27 }
0x22d3   :  { %795 = vrot.lane.b32.xlu1 %v789_v5, %s2130_s29 }
0x22d9   :  { %617 = vrot.lane.b32.xlu2 %v2411_v10, %s2129_s22 }
0x22db   :  { %1852 = vrot.lane.b32.xlu1 %v2451_v21, %s2136_s12 }
0x22e6   :  { %v1829_v60 = vpop.f32.mrf.mxu3 }
0x22e7   :  { %v1830_v35 = vadd.f32 %v1829_v60, %v3034_v46 }
0x22e9   :  { %1839 = vst [vmem:[%s3159_s3 + $0x38] sm:$0xff] %v1830_v35 }
0x2309   :  { %v715_v54 = vpop.xlane.xlu1 %714 }
0x230a   :  { %2117 = vrcp.f32 %v715_v54  ;;  %v727_v33 = vand.u32 2147483648, %v715_v54  ;;  %v725_v37 = vand.u32 2147483647, %v715_v54  ;;  %vm721_vm2 = vweird.f32 %v715_v54 }
0x230b   :  { %2119 = vtanh.f32 %v994_v63 }
0x230c   :  { %v728_v25 = vor.u32 1.1754944e-38, %v727_v33  ;;  %vm726_vm4 = vcmp.eq.f32.partialorder %v725_v37, 8.507059e+37 }
0x2310   :  { %v2118_v31 = vpop.eup %2117 }
0x2311   :  { %v717_v12 = vmul.f32 %v2118_v31, %v715_v54  ;;  %vm722_vm1 = vweird.f32 %v2118_v31  ;;  %v2120_v43 = vpop.eup %2119 }
0x2312   :  { %vm723_vm3 = vmor %vm721_vm2, %vm722_vm1 }
0x2313   :  { %v718_v32 = vsub.f32 1.0, %v717_v12 }
0x2315   :  { %v719_v34 = vmul.f32 %v2118_v31, %v718_v32 }
0x2317   :  { %v720_v10 = vadd.f32 %v2118_v31, %v719_v34 }
0x2319   :  { %v724_v21 = vsel %vm723_vm3, %v2118_v31, %v720_v10 }
0x231a   :  { %v729_v46 = vsel %vm726_vm4, %v728_v25, %v724_v21 }
0x231b   :  { %v730_v38 = vmul.f32 %v3094_v36, %v729_v46  ;;  %v792_v36 = vpop.permute.xlu0 %791 }
0x231d   :  { %1841 = vrot.lane.b32.xlu0 %v730_v38, %s2128_s21 }
0x2325   :  { %1845 = vrot.lane.b32.xlu0 %v2431_v18, %s2128_s21 }
0x232b   :  { %v1031_v40 = vpop.permute.xlu2 %1030 }
0x232c   :  { %v1033_v18 = vmul.f32 %v1031_v40, %v3102_v48 }
0x232d   :  { %1856 = vrot.lane.b32.xlu0 %v2120_v43, %s2128_s21 }
0x2333   :  { %v618_v14 = vpop.permute.xlu2 %617 }
0x2334   :  { %634 = vst.msk [vmem:[%s3157_s4 + $0x38] sm:$0xff] %vm106_vm5, %v618_v14 }
0x2335   :  { %1860 = vrot.lane.b32.xlu0 %v1027_v26, %s2129_s22 }
0x2345   :  { %v796_v49 = vpop.permute.xlu1 %795 }
0x2346   :  { %v798_v1 = vsel %vm742_vm10, %v792_v36, %v796_v49 }
0x2347   :  { %1849 = vrot.lane.b32.xlu2 %v798_v1, %s2130_s29 }
0x234d   :  { %v1853_v55 = vpop.permute.xlu1 %1852 }
0x238f   :  { %v1842_v11 = vpop.permute.xlu0 %1841 }
0x2390   :  { %v1864_v9 = vsel %vm879_vm12, %v1863_v2, %v1842_v11 }
0x2397   :  { %v1846_v41 = vpop.permute.xlu0 %1845 }
0x2398   :  { %v1865_v50 = vsel %vm39_vm0, %v1864_v9, %v1846_v41 }
0x2399   :  { %v1866_v52 = vsel %vm952_vm14, %v1865_v50, %v1846_v41 }
0x239f   :  { %v1857_v51 = vpop.permute.xlu0 %1856 }
0x23a0   :  { %v1870_v47 = vsel %vm106_vm5, %v618_v14, %v1857_v51 }
0x23a1   :  { %v1850_v53 = vpop.permute.xlu2 %1849  ;;  %v1871_v42 = vsel %vm39_vm0, %v1870_v47, %v1033_v18 }
0x23a2   :  { %v1867_v44 = vsel %vm653_vm6, %v1866_v52, %v1850_v53 }
0x23a3   :  { %v1869_v56 = vsel %vm1868_vm7, %v1867_v44, %v1853_v55 }
0x23a4   :  { %1873 = vst [vmem:[%s3160_s5] sm:$0xff] %v1869_v56 }
0x23a7   :  { %v1861_v45 = vpop.permute.xlu0 %1860 }
0x23a8   :  { %v1872_v28 = vsel %vm653_vm6, %v1871_v42, %v1861_v45 }
0x23a9   :  { %1874 = vst [vmem:[%s3160_s5 + $0x8] sm:$0xff] %v1872_v28 }

</bundles_post_ra>
